<compile_context>
chip_gen: v6e
topology: v6e:2x2x1
jax: 0.10.0
libtpu: 0.0.40
codegen_flags: <defaults>
</compile_context>

<pallas_src>
import math

import jax
import jax.numpy as jnp
from jax.experimental import pallas as pl
from jax.experimental.pallas import tpu as pltpu

LANES = 128          # lane width of every packed weight / bias / activation
BLK = 128            # rows per packed weight block
REG_LO = 7           # output lane where regime probs start (3 actor + 1 critic + 3 q)


# ----------------------------------------------------------------------------
# Deterministic parameter construction + lane-dense slab packing.
# (xavier_uniform gain=0.1, zero bias, LayerNorm weight=1 / bias=0 — mirrors
#  ActorCritic._init_weights.)
# ----------------------------------------------------------------------------
def _xavier(key, fin, fout, gain=0.1):
    bound = gain * math.sqrt(6.0 / (fin + fout))
    return jax.random.uniform(key, (fin, fout), jnp.float32, -bound, bound)


class _Packer:
    """Packs every small parameter into lane-dense 128x128 blocks / 128-lane rows.

    Row/col offsets let a weight read its input (or write its output) at the lane
    range where that tensor actually lives, which removes all in-kernel slicing
    and concatenation.  Demo-only limitation: every fin/fout must be <= 128.
    """

    def __init__(self):
        self.w_blocks, self.w_off = [], {}
        self.v_rows, self.v_off = [], {}

    def add_w(self, name, a, row_off=0, col_off=0):
        fin, fout = a.shape
        assert row_off + fin <= BLK and col_off + fout <= LANES, (name, a.shape)
        blk = jnp.zeros((BLK, LANES), jnp.float32)
        blk = blk.at[row_off:row_off + fin, col_off:col_off + fout].set(a)
        self.w_off[name] = len(self.w_blocks) * BLK
        self.w_blocks.append(blk)

    def add_v(self, name, a, col_off=0):
        a = jnp.asarray(a, jnp.float32).reshape(-1)
        assert col_off + a.shape[0] <= LANES, (name, a.shape)
        row = jnp.zeros((LANES,), jnp.float32).at[col_off:col_off + a.shape[0]].set(a)
        self.v_off[name] = len(self.v_rows)
        self.v_rows.append(row)

    def finish(self):
        w = jnp.concatenate(self.w_blocks, axis=0)                  # (n_blk*128, 128)
        v = jnp.stack(self.v_rows, axis=0)                          # (n_rows, 128)
        pad = (-v.shape[0]) % 8
        if pad:
            v = jnp.concatenate([v, jnp.zeros((pad, LANES), jnp.float32)], axis=0)
        return w, v


def build_packed_params(key, D, H, n_heads, n_layers, ffn):
    del n_heads  # head split is done by row-slicing Wo in the kernel
    H2, H4 = H // 2, H // 4
    pk = _Packer()
    keys = iter(jax.random.split(key, 64))
    zeros = lambda n: jnp.zeros((n,), jnp.float32)
    ones_ = lambda n: jnp.ones((n,), jnp.float32)

    # input LayerNorm
    pk.add_v("ln_in_g", ones_(D))
    pk.add_v("ln_in_b", zeros(D))

    # multi-scale extractors — the three first layers all consume x, so fuse them.
    We1 = _xavier(next(keys), D, H)
    We21 = _xavier(next(keys), D, H2)
    We31 = _xavier(next(keys), D, H4)
    pk.add_w("We_in", jnp.concatenate([We1, We21, We31], axis=1))     # e lanes: [0:H | H:H+H2 | H+H2:H+H2+H4]
    pk.add_v("be_in", zeros(H + H2 + H4))
    pk.add_w("We2_2", _xavier(next(keys), H2, H), row_off=H)          # reads e[:, H:H+H2]
    pk.add_v("be2_2", zeros(H))
    pk.add_w("We3_2", _xavier(next(keys), H4, H2), row_off=H + H2)    # reads e[:, H+H2:H+H2+H4]
    pk.add_v("be3_2", zeros(H2))
    pk.add_w("We3_3", _xavier(next(keys), H2, H))                     # reads f3[:, 0:H2]
    pk.add_v("be3_3", zeros(H))

    # feature projection (3H -> H), split into row blocks (no feature concat)
    Wproj = _xavier(next(keys), 3 * H, H)
    pk.add_w("Wp1", Wproj[0:H])                                       # reads e[:, 0:H]  (= f1)
    pk.add_w("Wp2", Wproj[H:2 * H])                                   # reads f2[:, 0:H]
    pk.add_w("Wp3", Wproj[2 * H:])                                    # reads f3[:, 0:H]
    pk.add_v("bproj", zeros(H))

    # transformer encoder layers (fused QKV, Wo kept whole; per-head rows sliced in-kernel)
    for l in range(n_layers):
        Wq = _xavier(next(keys), H, H)
        Wk = _xavier(next(keys), H, H)
        Wv = _xavier(next(keys), H, H)
        pk.add_w(f"l{l}_Wqkv", jnp.concatenate([Wq, Wk, Wv], axis=1))
        pk.add_v(f"l{l}_bqkv", zeros(3 * H))
        pk.add_w(f"l{l}_Wo", _xavier(next(keys), H, H))
        pk.add_v(f"l{l}_bo", zeros(H))
        pk.add_v(f"l{l}_ln1_g", ones_(H))
        pk.add_v(f"l{l}_ln1_b", zeros(H))
        pk.add_w(f"l{l}_ffW1", _xavier(next(keys), H, ffn))
        pk.add_v(f"l{l}_ffb1", zeros(ffn))
        pk.add_w(f"l{l}_ffW2", _xavier(next(keys), ffn, H))
        pk.add_v(f"l{l}_ffb2", zeros(H))
        pk.add_v(f"l{l}_ln2_g", ones_(H))
        pk.add_v(f"l{l}_ln2_b", zeros(H))

    # regime classifier — final logits placed directly at output lanes REG_LO..REG_LO+3
    pk.add_w("Wrg1", _xavier(next(keys), H, 128)); pk.add_v("brg1", zeros(128))
    pk.add_w("Wrg2", _xavier(next(keys), 128, 64)); pk.add_v("brg2", zeros(64))
    pk.add_w("Wrg3", _xavier(next(keys), 64, 4), col_off=REG_LO)
    pk.add_v("brg3", zeros(4), col_off=REG_LO)

    # risk processor ((H+4) -> H -> H); concat replaced by split, row-placed weights
    Wrk1 = _xavier(next(keys), H + 4, H)
    pk.add_w("Wrk1a", Wrk1[:H])                                       # reads pooled[:, 0:H]
    pk.add_w("Wrk1b", Wrk1[H:], row_off=REG_LO)                       # reads regime[:, REG_LO:REG_LO+4]
    pk.add_v("brk1", zeros(H))
    pk.add_w("Wrk2", _xavier(next(keys), H, H)); pk.add_v("brk2", zeros(H))

    # actor / critic / q heads: layer-1 fused (shared input), layers 2/3 block-diagonal
    Wa1 = _xavier(next(keys), H, H2)
    Wc1 = _xavier(next(keys), H, H2)
    Wq1 = _xavier(next(keys), H, H2)
    pk.add_w("Whead1", jnp.concatenate([Wa1, Wc1, Wq1], axis=1))
    pk.add_v("bhead1", zeros(3 * H2))

    Wa2 = _xavier(next(keys), H2, H4)
    Wc2 = _xavier(next(keys), H2, H4)
    Wq2 = _xavier(next(keys), H2, H4)
    W2 = jnp.zeros((3 * H2, 3 * H4), jnp.float32)
    W2 = (W2.at[0:H2, 0:H4].set(Wa2)
             .at[H2:2 * H2, H4:2 * H4].set(Wc2)
             .at[2 * H2:, 2 * H4:].set(Wq2))
    pk.add_w("Whead2", W2); pk.add_v("bhead2", zeros(3 * H4))

    Wa3 = _xavier(next(keys), H4, 3)
    Wc3 = _xavier(next(keys), H4, 1)
    Wq3 = _xavier(next(keys), H4, 3)
    W3 = jnp.zeros((3 * H4, 7), jnp.float32)
    W3 = (W3.at[0:H4, 0:3].set(Wa3)
             .at[H4:2 * H4, 3:4].set(Wc3)
             .at[2 * H4:, 4:7].set(Wq3))
    pk.add_w("Whead3", W3); pk.add_v("bhead3", zeros(7))

    return (*pk.finish(), pk.w_off, pk.v_off)


# ----------------------------------------------------------------------------
# Pallas kernel: one grid step = one batch *block* (TB elements) end-to-end.
# Weights stay VMEM-resident (constant index_map); everything is 128-lane dense.
# ----------------------------------------------------------------------------
def actor_critic_forward(x, w_slab, v_slab, w_off, v_off, *, H, n_heads, n_layers):
    B, S, D = x.shape
    assert D <= LANES and H <= LANES
    nh, dh = n_heads, H // n_heads
    assert dh % 8 == 0 or dh == H // n_heads  # dh=8 here; Wo row-blocks stay sublane aligned
    scale = 1.0 / math.sqrt(dh)

    # Batch blocking: fold TB batch elements into the sublane/M dimension.
    tb_target = max(8, LANES // S) if S <= LANES else 8
    TB = tb_target if (B % tb_target == 0) else B
    M = TB * S
    grid = (B // TB,)

    # Lane-dense input tile (layout plumbing only; padding lanes stay zero).
    x_p = jnp.pad(x.astype(jnp.float32), ((0, 0), (0, 0), (0, LANES - D)))

    def kernel(x_ref, w_ref, v_ref, out_ref):
        lane = jax.lax.broadcasted_iota(jnp.int32, (1, LANES), 1)

        def W(name):                       # full 128x128 weight block (unmasked load)
            r = w_off[name]
            return w_ref[r:r + BLK, :]

        def Wrows(name, r0, nrows):        # sublane-aligned row window of a block
            r = w_off[name] + r0
            return w_ref[r:r + nrows, :]

        def V(name):                       # one 128-lane bias / LN row
            r = v_off[name]
            return v_ref[r:r + 1, :]

        def mm(a, b):
            return jnp.dot(a, b, preferred_element_type=jnp.float32)

        def relu(a):
            return jnp.maximum(a, 0.0)

        def layernorm(hh, g, b, width):    # reductions restricted to true feature width
            inv = 1.0 / width
            mu = jnp.sum(hh, axis=-1, keepdims=True) * inv
            xc = jnp.where(lane < width, hh - mu, 0.0)
            var = jnp.sum(xc * xc, axis=-1, keepdims=True) * inv
            return xc * jax.lax.rsqrt(var + 1e-5) * g + b

        def masked_softmax(hh, lo, width):  # exact division (returned probabilities)
            msk = jnp.logical_and(lane >= lo, lane < lo + width)
            neg = jnp.where(msk, hh, -1e30)
            m = jnp.max(neg, axis=-1, keepdims=True)
            e = jnp.exp(neg - m)
            return e / jnp.sum(e, axis=-1, keepdims=True)

        # ---- input sanitation + norm + clamp (token-major (M,128)) ------------
        xt = x_ref[...].reshape(M, LANES)
        xt = jnp.where(jnp.isnan(xt), 0.0, xt)                        # nan_to_num: NaN -> 0
        xt = jnp.clip(xt, jnp.finfo(jnp.float32).min,
                      jnp.finfo(jnp.float32).max)                     # nan_to_num: ±inf -> ±max
        xt = layernorm(xt, V("ln_in_g"), V("ln_in_b"), D)
        xt = jnp.clip(xt, -10.0, 10.0)

        # ---- multi-scale extractors (row-placed weights: no slices, no concat) -
        e = relu(mm(xt, W("We_in")) + V("be_in"))                     # lanes [f1 | e2 hidden | e3 hidden]
        f2 = relu(mm(e, W("We2_2")) + V("be2_2"))
        f3 = relu(mm(e, W("We3_2")) + V("be3_2"))
        f3 = relu(mm(f3, W("We3_3")) + V("be3_3"))
        h = mm(e, W("Wp1")) + mm(f2, W("Wp2")) + mm(f3, W("Wp3")) + V("bproj")

        # ---- transformer encoder (post-norm), fused QKV, per-head Wo blocks ----
        for l in range(n_layers):
            qkv = mm(h, W(f"l{l}_Wqkv")) + V(f"l{l}_bqkv")            # (M,128): [Q|K|V] in lanes 0..3H
            attn = V(f"l{l}_bo")                                      # (1,128), broadcasts
            for hi in range(nh):
                q3 = qkv[:, hi * dh:(hi + 1) * dh].reshape(TB, S, dh)
                k3 = qkv[:, H + hi * dh:H + (hi + 1) * dh].reshape(TB, S, dh)
                v3 = qkv[:, 2 * H + hi * dh:2 * H + (hi + 1) * dh].reshape(TB, S, dh)
                s = jnp.einsum("bqd,bkd->bqk", q3, k3,
                               preferred_element_type=jnp.float32) * scale
                mmax = jnp.max(s, axis=-1, keepdims=True)
                p = jnp.exp(s - mmax)
                p = p * pl.reciprocal(jnp.sum(p, axis=-1, keepdims=True), approx=True)
                o3 = jnp.einsum("bqk,bkd->bqd", p, v3,
                                preferred_element_type=jnp.float32)
                attn = attn + mm(o3.reshape(M, dh), Wrows(f"l{l}_Wo", hi * dh, dh))
            h = layernorm(h + attn, V(f"l{l}_ln1_g"), V(f"l{l}_ln1_b"), H)
            ff = mm(relu(mm(h, W(f"l{l}_ffW1")) + V(f"l{l}_ffb1")),
                    W(f"l{l}_ffW2")) + V(f"l{l}_ffb2")
            h = layernorm(h + ff, V(f"l{l}_ln2_g"), V(f"l{l}_ln2_b"), H)

        # ---- mean-pool over sequence ------------------------------------------
        pooled = jnp.mean(h.reshape(TB, S, LANES), axis=1)            # (TB,128)

        # ---- regime classifier (logits land directly at output lanes 7..10) ----
        r = relu(mm(pooled, W("Wrg1")) + V("brg1"))
        r = relu(mm(r, W("Wrg2")) + V("brg2"))
        regime = masked_softmax(mm(r, W("Wrg3")) + V("brg3"), REG_LO, 4)

        # ---- risk processor (concat via row-placed split weights) --------------
        rk = relu(mm(pooled, W("Wrk1a")) + mm(regime, W("Wrk1b")) + V("brk1"))
        proc = mm(rk, W("Wrk2")) + V("brk2")

        # ---- fused actor / critic / q heads ------------------------------------
        h1 = relu(mm(proc, W("Whead1")) + V("bhead1"))
        h2 = relu(mm(h1, W("Whead2")) + V("bhead2"))
        h3 = mm(h2, W("Whead3")) + V("bhead3")        # lanes: 0:3 actor | 3 critic | 4:7 q

        action_probs = masked_softmax(jnp.clip(h3, -10.0, 10.0), 0, 3)
        out = (action_probs
               + jnp.where(lane == 3, jnp.clip(h3, -100.0, 100.0), 0.0)
               + jnp.where(jnp.logical_and(lane >= 4, lane < REG_LO), h3, 0.0)
               + regime)
        out_ref[...] = out                            # (TB,128) lane-dense output row

    # Advisory cost hint for the XLA scheduler (padded-matmul flop count).
    n_wblk = w_slab.shape[0] // BLK
    flops = 2 * B * S * n_wblk * BLK * LANES + 4 * B * n_layers * nh * S * S * dh
    transcendentals = B * n_layers * nh * S * S + 2 * B * LANES + B * S * (2 * n_layers + 1)
    bytes_accessed = (x_p.size + w_slab.size + v_slab.size + B * LANES) * 4

    out = pl.pallas_call(
        kernel,
        out_shape=jax.ShapeDtypeStruct((B, LANES), jnp.float32),
        grid=grid,
        in_specs=[
            pl.BlockSpec((TB, S, LANES), lambda b: (b, 0, 0)),   # batch-blocked input tile
            pl.BlockSpec(w_slab.shape, lambda b: (0, 0)),        # weights resident in VMEM
            pl.BlockSpec(v_slab.shape, lambda b: (0, 0)),        # biases / LN params resident
        ],
        out_specs=pl.BlockSpec((TB, LANES), lambda b: (b, 0)),
        compiler_params=pltpu.CompilerParams(
            dimension_semantics=("parallel",)),                  # 2 TCs on v7x when grid > 1
        cost_estimate=pl.CostEstimate(flops=int(flops),
                                      transcendentals=int(transcendentals),
                                      bytes_accessed=int(bytes_accessed)),
    )(x_p, w_slab, v_slab)

    return (out[:, 0:3],                 # action_probs
            out[:, 3:4],                 # state_values
            out[:, 4:REG_LO],            # q_values
            out[:, REG_LO:REG_LO + 4])   # regime_probs


# ----------------------------------------------------------------------------
if __name__ == "__main__":
    # Small, module-consistent shapes.
    B, S, D = 2, 8, 16           # batch, sequence_length, input_dim
    H = 32                       # hidden_dim
    N_HEADS = 4                  # attention_heads
    N_LAYERS = 2                 # transformer_layers
    ATT_DIM = 16                 # attention_dim -> ffn = 4 * ATT_DIM
    FFN = 4 * ATT_DIM

    key = jax.random.PRNGKey(0)
    kx, kp = jax.random.split(key)
    x = jax.random.normal(kx, (B, S, D), dtype=jnp.float32)
    w_slab, v_slab, w_off, v_off = build_packed_params(kp, D, H, N_HEADS, N_LAYERS, FFN)

    outs = actor_critic_forward(
        x, w_slab, v_slab, w_off, v_off, H=H, n_heads=N_HEADS, n_layers=N_LAYERS)
    jax.block_until_ready(outs)

    action_probs, state_values, q_values, regime_probs = outs
    assert action_probs.shape == (B, 3)
    assert state_values.shape == (B, 1)
    assert q_values.shape == (B, 3)
    assert regime_probs.shape == (B, 4)
    assert abs(float(jnp.sum(action_probs[0])) - 1.0) < 1e-3
    assert abs(float(jnp.sum(regime_probs[0])) - 1.0) < 1e-3
    print("KERNEL_OK")
</pallas_src>

<mosaic_0001>
module attributes {stable_mosaic.version = 11 : i64} {
  func.func @kernel(%arg0: i32, %arg1: memref<2x8x128xf32, #tpu.memory_space<vmem>>, %arg2: memref<3072x128xf32, #tpu.memory_space<vmem>>, %arg3: memref<32x128xf32, #tpu.memory_space<vmem>>, %arg4: memref<2x128xf32, #tpu.memory_space<vmem>>) attributes {dimension_semantics = [#tpu.dimension_semantics<parallel>], iteration_bounds = array<i64: 1>, scalar_prefetch = 0 : i64, scratch_operands = 0 : i64, tpu.core_type = #tpu.core_type<tc>, window_params = [{transform_indices = @transform_0, window_bounds = array<i64: 2, 8, 128>}, {pipeline_mode = #tpu.pipeline_mode<synchronous>, transform_indices = @transform_1, window_bounds = array<i64: 3072, 128>}, {pipeline_mode = #tpu.pipeline_mode<synchronous>, transform_indices = @transform_2, window_bounds = array<i64: 32, 128>}, {transform_indices = @transform_3, window_bounds = array<i64: 2, 128>}]} {
    %0 = tpu.iota {dimensions = array<i32: 1>} : vector<1x128xi32>
    %c0 = arith.constant 0 : index
    %c0_0 = arith.constant 0 : index
    %c0_1 = arith.constant 0 : index
    %1 = vector.load %arg1[%c0, %c0_0, %c0_1] : memref<2x8x128xf32, #tpu.memory_space<vmem>>, vector<2x8x128xf32>
    %2 = vector.shape_cast %1 : vector<2x8x128xf32> to vector<16x128xf32>
    %3 = arith.cmpf one, %2, %2 : vector<16x128xf32>
    %cst = arith.constant 0.000000e+00 : f32
    %4 = vector.broadcast %cst : f32 to vector<16x128xf32>
    %5 = arith.select %3, %4, %2 : vector<16x128xi1>, vector<16x128xf32>
    %cst_2 = arith.constant -3.40282347E+38 : f32
    %cst_3 = arith.constant 3.40282347E+38 : f32
    %6 = vector.broadcast %cst_2 : f32 to vector<16x128xf32>
    %7 = arith.maximumf %6, %5 : vector<16x128xf32>
    %8 = vector.broadcast %cst_3 : f32 to vector<16x128xf32>
    %9 = arith.minimumf %8, %7 : vector<16x128xf32>
    %c0_4 = arith.constant 0 : index
    %c0_5 = arith.constant 0 : index
    %10 = vector.load %arg3[%c0_4, %c0_5] : memref<32x128xf32, #tpu.memory_space<vmem>>, vector<1x128xf32>
    %c1 = arith.constant 1 : index
    %c0_6 = arith.constant 0 : index
    %11 = vector.load %arg3[%c1, %c0_6] : memref<32x128xf32, #tpu.memory_space<vmem>>, vector<1x128xf32>
    %cst_7 = arith.constant dense<0.000000e+00> : vector<16xf32>
    %12 = vector.multi_reduction <add>, %9, %cst_7 [1] : vector<16x128xf32> to vector<16xf32>
    %13 = vector.shape_cast %12 : vector<16xf32> to vector<16x1xf32>
    %cst_8 = arith.constant 6.250000e-02 : f32
    %14 = vector.broadcast %cst_8 : f32 to vector<16x1xf32>
    %15 = arith.mulf %13, %14 : vector<16x1xf32>
    %c16_i32 = arith.constant 16 : i32
    %16 = vector.broadcast %c16_i32 : i32 to vector<1x128xi32>
    %17 = arith.cmpi slt, %0, %16 : vector<1x128xi32>
    %18 = vector.broadcast %15 : vector<16x1xf32> to vector<16x128xf32>
    %19 = arith.subf %9, %18 : vector<16x128xf32>
    %cst_9 = arith.constant 0.000000e+00 : f32
    %20 = vector.shape_cast %17 : vector<1x128xi1> to vector<1x128xi1>
    %21 = vector.broadcast %20 : vector<1x128xi1> to vector<16x128xi1>
    %22 = vector.broadcast %cst_9 : f32 to vector<16x128xf32>
    %23 = arith.select %21, %19, %22 : vector<16x128xi1>, vector<16x128xf32>
    %24 = arith.mulf %23, %23 : vector<16x128xf32>
    %cst_10 = arith.constant dense<0.000000e+00> : vector<16xf32>
    %25 = vector.multi_reduction <add>, %24, %cst_10 [1] : vector<16x128xf32> to vector<16xf32>
    %26 = vector.shape_cast %25 : vector<16xf32> to vector<16x1xf32>
    %cst_11 = arith.constant 6.250000e-02 : f32
    %27 = vector.broadcast %cst_11 : f32 to vector<16x1xf32>
    %28 = arith.mulf %26, %27 : vector<16x1xf32>
    %cst_12 = arith.constant 9.99999974E-6 : f32
    %29 = vector.broadcast %cst_12 : f32 to vector<16x1xf32>
    %30 = arith.addf %28, %29 : vector<16x1xf32>
    %31 = math.rsqrt %30 : vector<16x1xf32>
    %32 = vector.broadcast %31 : vector<16x1xf32> to vector<16x128xf32>
    %33 = arith.mulf %23, %32 : vector<16x128xf32>
    %34 = vector.broadcast %10 : vector<1x128xf32> to vector<16x128xf32>
    %35 = arith.mulf %33, %34 : vector<16x128xf32>
    %36 = vector.broadcast %11 : vector<1x128xf32> to vector<16x128xf32>
    %37 = arith.addf %35, %36 : vector<16x128xf32>
    %cst_13 = arith.constant -1.000000e+01 : f32
    %cst_14 = arith.constant 1.000000e+01 : f32
    %38 = vector.broadcast %cst_13 : f32 to vector<16x128xf32>
    %39 = arith.maximumf %38, %37 : vector<16x128xf32>
    %40 = vector.broadcast %cst_14 : f32 to vector<16x128xf32>
    %41 = arith.minimumf %40, %39 : vector<16x128xf32>
    %c0_15 = arith.constant 0 : index
    %c0_16 = arith.constant 0 : index
    %42 = vector.load %arg2[%c0_15, %c0_16] : memref<3072x128xf32, #tpu.memory_space<vmem>>, vector<128x128xf32>
    %cst_17 = arith.constant dense<0.000000e+00> : vector<16x128xf32>
    %43 = tpu.matmul %41, %42, %cst_17 {dimension_numbers = #tpu.dot_dimension_numbers<[1], [0], [0], [1], [0, 0, 1, 1], [], []>} : vector<16x128xf32>, vector<128x128xf32>, vector<16x128xf32> -> vector<16x128xf32>
    %c2 = arith.constant 2 : index
    %c0_18 = arith.constant 0 : index
    %44 = vector.load %arg3[%c2, %c0_18] : memref<32x128xf32, #tpu.memory_space<vmem>>, vector<1x128xf32>
    %45 = vector.broadcast %44 : vector<1x128xf32> to vector<16x128xf32>
    %46 = arith.addf %43, %45 : vector<16x128xf32>
    %cst_19 = arith.constant 0.000000e+00 : f32
    %47 = vector.broadcast %cst_19 : f32 to vector<16x128xf32>
    %48 = arith.maximumf %46, %47 : vector<16x128xf32>
    %c128 = arith.constant 128 : index
    %c0_20 = arith.constant 0 : index
    %49 = vector.load %arg2[%c128, %c0_20] : memref<3072x128xf32, #tpu.memory_space<vmem>>, vector<128x128xf32>
    %cst_21 = arith.constant dense<0.000000e+00> : vector<16x128xf32>
    %50 = tpu.matmul %48, %49, %cst_21 {dimension_numbers = #tpu.dot_dimension_numbers<[1], [0], [0], [1], [0, 0, 1, 1], [], []>} : vector<16x128xf32>, vector<128x128xf32>, vector<16x128xf32> -> vector<16x128xf32>
    %c3 = arith.constant 3 : index
    %c0_22 = arith.constant 0 : index
    %51 = vector.load %arg3[%c3, %c0_22] : memref<32x128xf32, #tpu.memory_space<vmem>>, vector<1x128xf32>
    %52 = vector.broadcast %51 : vector<1x128xf32> to vector<16x128xf32>
    %53 = arith.addf %50, %52 : vector<16x128xf32>
    %cst_23 = arith.constant 0.000000e+00 : f32
    %54 = vector.broadcast %cst_23 : f32 to vector<16x128xf32>
    %55 = arith.maximumf %53, %54 : vector<16x128xf32>
    %c256 = arith.constant 256 : index
    %c0_24 = arith.constant 0 : index
    %56 = vector.load %arg2[%c256, %c0_24] : memref<3072x128xf32, #tpu.memory_space<vmem>>, vector<128x128xf32>
    %cst_25 = arith.constant dense<0.000000e+00> : vector<16x128xf32>
    %57 = tpu.matmul %48, %56, %cst_25 {dimension_numbers = #tpu.dot_dimension_numbers<[1], [0], [0], [1], [0, 0, 1, 1], [], []>} : vector<16x128xf32>, vector<128x128xf32>, vector<16x128xf32> -> vector<16x128xf32>
    %c4 = arith.constant 4 : index
    %c0_26 = arith.constant 0 : index
    %58 = vector.load %arg3[%c4, %c0_26] : memref<32x128xf32, #tpu.memory_space<vmem>>, vector<1x128xf32>
    %59 = vector.broadcast %58 : vector<1x128xf32> to vector<16x128xf32>
    %60 = arith.addf %57, %59 : vector<16x128xf32>
    %cst_27 = arith.constant 0.000000e+00 : f32
    %61 = vector.broadcast %cst_27 : f32 to vector<16x128xf32>
    %62 = arith.maximumf %60, %61 : vector<16x128xf32>
    %c384 = arith.constant 384 : index
    %c0_28 = arith.constant 0 : index
    %63 = vector.load %arg2[%c384, %c0_28] : memref<3072x128xf32, #tpu.memory_space<vmem>>, vector<128x128xf32>
    %cst_29 = arith.constant dense<0.000000e+00> : vector<16x128xf32>
    %64 = tpu.matmul %62, %63, %cst_29 {dimension_numbers = #tpu.dot_dimension_numbers<[1], [0], [0], [1], [0, 0, 1, 1], [], []>} : vector<16x128xf32>, vector<128x128xf32>, vector<16x128xf32> -> vector<16x128xf32>
    %c5 = arith.constant 5 : index
    %c0_30 = arith.constant 0 : index
    %65 = vector.load %arg3[%c5, %c0_30] : memref<32x128xf32, #tpu.memory_space<vmem>>, vector<1x128xf32>
    %66 = vector.broadcast %65 : vector<1x128xf32> to vector<16x128xf32>
    %67 = arith.addf %64, %66 : vector<16x128xf32>
    %cst_31 = arith.constant 0.000000e+00 : f32
    %68 = vector.broadcast %cst_31 : f32 to vector<16x128xf32>
    %69 = arith.maximumf %67, %68 : vector<16x128xf32>
    %c512 = arith.constant 512 : index
    %c0_32 = arith.constant 0 : index
    %70 = vector.load %arg2[%c512, %c0_32] : memref<3072x128xf32, #tpu.memory_space<vmem>>, vector<128x128xf32>
    %cst_33 = arith.constant dense<0.000000e+00> : vector<16x128xf32>
    %71 = tpu.matmul %48, %70, %cst_33 {dimension_numbers = #tpu.dot_dimension_numbers<[1], [0], [0], [1], [0, 0, 1, 1], [], []>} : vector<16x128xf32>, vector<128x128xf32>, vector<16x128xf32> -> vector<16x128xf32>
    %c640 = arith.constant 640 : index
    %c0_34 = arith.constant 0 : index
    %72 = vector.load %arg2[%c640, %c0_34] : memref<3072x128xf32, #tpu.memory_space<vmem>>, vector<128x128xf32>
    %cst_35 = arith.constant dense<0.000000e+00> : vector<16x128xf32>
    %73 = tpu.matmul %55, %72, %cst_35 {dimension_numbers = #tpu.dot_dimension_numbers<[1], [0], [0], [1], [0, 0, 1, 1], [], []>} : vector<16x128xf32>, vector<128x128xf32>, vector<16x128xf32> -> vector<16x128xf32>
    %74 = arith.addf %71, %73 : vector<16x128xf32>
    %c768 = arith.constant 768 : index
    %c0_36 = arith.constant 0 : index
    %75 = vector.load %arg2[%c768, %c0_36] : memref<3072x128xf32, #tpu.memory_space<vmem>>, vector<128x128xf32>
    %cst_37 = arith.constant dense<0.000000e+00> : vector<16x128xf32>
    %76 = tpu.matmul %69, %75, %cst_37 {dimension_numbers = #tpu.dot_dimension_numbers<[1], [0], [0], [1], [0, 0, 1, 1], [], []>} : vector<16x128xf32>, vector<128x128xf32>, vector<16x128xf32> -> vector<16x128xf32>
    %77 = arith.addf %74, %76 : vector<16x128xf32>
    %c6 = arith.constant 6 : index
    %c0_38 = arith.constant 0 : index
    %78 = vector.load %arg3[%c6, %c0_38] : memref<32x128xf32, #tpu.memory_space<vmem>>, vector<1x128xf32>
    %79 = vector.broadcast %78 : vector<1x128xf32> to vector<16x128xf32>
    %80 = arith.addf %77, %79 : vector<16x128xf32>
    %c896 = arith.constant 896 : index
    %c0_39 = arith.constant 0 : index
    %81 = vector.load %arg2[%c896, %c0_39] : memref<3072x128xf32, #tpu.memory_space<vmem>>, vector<128x128xf32>
    %cst_40 = arith.constant dense<0.000000e+00> : vector<16x128xf32>
    %82 = tpu.matmul %80, %81, %cst_40 {dimension_numbers = #tpu.dot_dimension_numbers<[1], [0], [0], [1], [0, 0, 1, 1], [], []>} : vector<16x128xf32>, vector<128x128xf32>, vector<16x128xf32> -> vector<16x128xf32>
    %c7 = arith.constant 7 : index
    %c0_41 = arith.constant 0 : index
    %83 = vector.load %arg3[%c7, %c0_41] : memref<32x128xf32, #tpu.memory_space<vmem>>, vector<1x128xf32>
    %84 = vector.broadcast %83 : vector<1x128xf32> to vector<16x128xf32>
    %85 = arith.addf %82, %84 : vector<16x128xf32>
    %c8 = arith.constant 8 : index
    %c0_42 = arith.constant 0 : index
    %86 = vector.load %arg3[%c8, %c0_42] : memref<32x128xf32, #tpu.memory_space<vmem>>, vector<1x128xf32>
    %87 = vector.extract_strided_slice %85 {offsets = [0, 0], sizes = [16, 8], strides = [1, 1]} : vector<16x128xf32> to vector<16x8xf32>
    %88 = vector.shape_cast %87 : vector<16x8xf32> to vector<2x8x8xf32>
    %89 = vector.extract_strided_slice %85 {offsets = [0, 32], sizes = [16, 8], strides = [1, 1]} : vector<16x128xf32> to vector<16x8xf32>
    %90 = vector.shape_cast %89 : vector<16x8xf32> to vector<2x8x8xf32>
    %91 = vector.extract_strided_slice %85 {offsets = [0, 64], sizes = [16, 8], strides = [1, 1]} : vector<16x128xf32> to vector<16x8xf32>
    %92 = vector.shape_cast %91 : vector<16x8xf32> to vector<2x8x8xf32>
    "tpu.trace_start"() <{level = 10 : i32, message = "bqd,bkd->bqk"}> : () -> ()
    %cst_43 = arith.constant dense<0.000000e+00> : vector<2x8x8xf32>
    %93 = tpu.matmul %88, %90, %cst_43 {dimension_numbers = #tpu.dot_dimension_numbers<[2], [2], [1], [1], [0, 0, 0, 1, 1, 1], [0], [0]>} : vector<2x8x8xf32>, vector<2x8x8xf32>, vector<2x8x8xf32> -> vector<2x8x8xf32>
    "tpu.trace_stop"() : () -> ()
    %cst_44 = arith.constant 0.353553385 : f32
    %94 = vector.broadcast %cst_44 : f32 to vector<2x8x8xf32>
    %95 = arith.mulf %93, %94 : vector<2x8x8xf32>
    %cst_45 = arith.constant dense<0xFF800000> : vector<2x8xf32>
    %96 = vector.multi_reduction <maximumf>, %95, %cst_45 [2] : vector<2x8x8xf32> to vector<2x8xf32>
    %97 = vector.shape_cast %96 : vector<2x8xf32> to vector<2x8x1xf32>
    %98 = vector.broadcast %97 : vector<2x8x1xf32> to vector<2x8x8xf32>
    %99 = arith.subf %95, %98 : vector<2x8x8xf32>
    %100 = math.exp %99 : vector<2x8x8xf32>
    %cst_46 = arith.constant dense<0.000000e+00> : vector<2x8xf32>
    %101 = vector.multi_reduction <add>, %100, %cst_46 [2] : vector<2x8x8xf32> to vector<2x8xf32>
    %102 = vector.shape_cast %101 : vector<2x8xf32> to vector<2x8x1xf32>
    %103 = tpu.reciprocal %102 {approx = true} : vector<2x8x1xf32> -> vector<2x8x1xf32>
    %104 = vector.broadcast %103 : vector<2x8x1xf32> to vector<2x8x8xf32>
    %105 = arith.mulf %100, %104 : vector<2x8x8xf32>
    "tpu.trace_start"() <{level = 10 : i32, message = "bqk,bkd->bqd"}> : () -> ()
    %cst_47 = arith.constant dense<0.000000e+00> : vector<2x8x8xf32>
    %106 = tpu.matmul %105, %92, %cst_47 {dimension_numbers = #tpu.dot_dimension_numbers<[2], [1], [1], [2], [0, 0, 0, 1, 1, 2], [0], [0]>} : vector<2x8x8xf32>, vector<2x8x8xf32>, vector<2x8x8xf32> -> vector<2x8x8xf32>
    "tpu.trace_stop"() : () -> ()
    %107 = vector.shape_cast %106 : vector<2x8x8xf32> to vector<16x8xf32>
    %c1024 = arith.constant 1024 : index
    %c0_48 = arith.constant 0 : index
    %108 = vector.load %arg2[%c1024, %c0_48] : memref<3072x128xf32, #tpu.memory_space<vmem>>, vector<8x128xf32>
    %cst_49 = arith.constant dense<0.000000e+00> : vector<16x128xf32>
    %109 = tpu.matmul %107, %108, %cst_49 {dimension_numbers = #tpu.dot_dimension_numbers<[1], [0], [0], [1], [0, 0, 1, 1], [], []>} : vector<16x8xf32>, vector<8x128xf32>, vector<16x128xf32> -> vector<16x128xf32>
    %110 = vector.broadcast %86 : vector<1x128xf32> to vector<16x128xf32>
    %111 = arith.addf %110, %109 : vector<16x128xf32>
    %112 = vector.extract_strided_slice %85 {offsets = [0, 8], sizes = [16, 8], strides = [1, 1]} : vector<16x128xf32> to vector<16x8xf32>
    %113 = vector.shape_cast %112 : vector<16x8xf32> to vector<2x8x8xf32>
    %114 = vector.extract_strided_slice %85 {offsets = [0, 40], sizes = [16, 8], strides = [1, 1]} : vector<16x128xf32> to vector<16x8xf32>
    %115 = vector.shape_cast %114 : vector<16x8xf32> to vector<2x8x8xf32>
    %116 = vector.extract_strided_slice %85 {offsets = [0, 72], sizes = [16, 8], strides = [1, 1]} : vector<16x128xf32> to vector<16x8xf32>
    %117 = vector.shape_cast %116 : vector<16x8xf32> to vector<2x8x8xf32>
    "tpu.trace_start"() <{level = 10 : i32, message = "bqd,bkd->bqk"}> : () -> ()
    %cst_50 = arith.constant dense<0.000000e+00> : vector<2x8x8xf32>
    %118 = tpu.matmul %113, %115, %cst_50 {dimension_numbers = #tpu.dot_dimension_numbers<[2], [2], [1], [1], [0, 0, 0, 1, 1, 1], [0], [0]>} : vector<2x8x8xf32>, vector<2x8x8xf32>, vector<2x8x8xf32> -> vector<2x8x8xf32>
    "tpu.trace_stop"() : () -> ()
    %cst_51 = arith.constant 0.353553385 : f32
    %119 = vector.broadcast %cst_51 : f32 to vector<2x8x8xf32>
    %120 = arith.mulf %118, %119 : vector<2x8x8xf32>
    %cst_52 = arith.constant dense<0xFF800000> : vector<2x8xf32>
    %121 = vector.multi_reduction <maximumf>, %120, %cst_52 [2] : vector<2x8x8xf32> to vector<2x8xf32>
    %122 = vector.shape_cast %121 : vector<2x8xf32> to vector<2x8x1xf32>
    %123 = vector.broadcast %122 : vector<2x8x1xf32> to vector<2x8x8xf32>
    %124 = arith.subf %120, %123 : vector<2x8x8xf32>
    %125 = math.exp %124 : vector<2x8x8xf32>
    %cst_53 = arith.constant dense<0.000000e+00> : vector<2x8xf32>
    %126 = vector.multi_reduction <add>, %125, %cst_53 [2] : vector<2x8x8xf32> to vector<2x8xf32>
    %127 = vector.shape_cast %126 : vector<2x8xf32> to vector<2x8x1xf32>
    %128 = tpu.reciprocal %127 {approx = true} : vector<2x8x1xf32> -> vector<2x8x1xf32>
    %129 = vector.broadcast %128 : vector<2x8x1xf32> to vector<2x8x8xf32>
    %130 = arith.mulf %125, %129 : vector<2x8x8xf32>
    "tpu.trace_start"() <{level = 10 : i32, message = "bqk,bkd->bqd"}> : () -> ()
    %cst_54 = arith.constant dense<0.000000e+00> : vector<2x8x8xf32>
    %131 = tpu.matmul %130, %117, %cst_54 {dimension_numbers = #tpu.dot_dimension_numbers<[2], [1], [1], [2], [0, 0, 0, 1, 1, 2], [0], [0]>} : vector<2x8x8xf32>, vector<2x8x8xf32>, vector<2x8x8xf32> -> vector<2x8x8xf32>
    "tpu.trace_stop"() : () -> ()
    %132 = vector.shape_cast %131 : vector<2x8x8xf32> to vector<16x8xf32>
    %c1032 = arith.constant 1032 : index
    %c0_55 = arith.constant 0 : index
    %133 = vector.load %arg2[%c1032, %c0_55] : memref<3072x128xf32, #tpu.memory_space<vmem>>, vector<8x128xf32>
    %cst_56 = arith.constant dense<0.000000e+00> : vector<16x128xf32>
    %134 = tpu.matmul %132, %133, %cst_56 {dimension_numbers = #tpu.dot_dimension_numbers<[1], [0], [0], [1], [0, 0, 1, 1], [], []>} : vector<16x8xf32>, vector<8x128xf32>, vector<16x128xf32> -> vector<16x128xf32>
    %135 = arith.addf %111, %134 : vector<16x128xf32>
    %136 = vector.extract_strided_slice %85 {offsets = [0, 16], sizes = [16, 8], strides = [1, 1]} : vector<16x128xf32> to vector<16x8xf32>
    %137 = vector.shape_cast %136 : vector<16x8xf32> to vector<2x8x8xf32>
    %138 = vector.extract_strided_slice %85 {offsets = [0, 48], sizes = [16, 8], strides = [1, 1]} : vector<16x128xf32> to vector<16x8xf32>
    %139 = vector.shape_cast %138 : vector<16x8xf32> to vector<2x8x8xf32>
    %140 = vector.extract_strided_slice %85 {offsets = [0, 80], sizes = [16, 8], strides = [1, 1]} : vector<16x128xf32> to vector<16x8xf32>
    %141 = vector.shape_cast %140 : vector<16x8xf32> to vector<2x8x8xf32>
    "tpu.trace_start"() <{level = 10 : i32, message = "bqd,bkd->bqk"}> : () -> ()
    %cst_57 = arith.constant dense<0.000000e+00> : vector<2x8x8xf32>
    %142 = tpu.matmul %137, %139, %cst_57 {dimension_numbers = #tpu.dot_dimension_numbers<[2], [2], [1], [1], [0, 0, 0, 1, 1, 1], [0], [0]>} : vector<2x8x8xf32>, vector<2x8x8xf32>, vector<2x8x8xf32> -> vector<2x8x8xf32>
    "tpu.trace_stop"() : () -> ()
    %cst_58 = arith.constant 0.353553385 : f32
    %143 = vector.broadcast %cst_58 : f32 to vector<2x8x8xf32>
    %144 = arith.mulf %142, %143 : vector<2x8x8xf32>
    %cst_59 = arith.constant dense<0xFF800000> : vector<2x8xf32>
    %145 = vector.multi_reduction <maximumf>, %144, %cst_59 [2] : vector<2x8x8xf32> to vector<2x8xf32>
    %146 = vector.shape_cast %145 : vector<2x8xf32> to vector<2x8x1xf32>
    %147 = vector.broadcast %146 : vector<2x8x1xf32> to vector<2x8x8xf32>
    %148 = arith.subf %144, %147 : vector<2x8x8xf32>
    %149 = math.exp %148 : vector<2x8x8xf32>
    %cst_60 = arith.constant dense<0.000000e+00> : vector<2x8xf32>
    %150 = vector.multi_reduction <add>, %149, %cst_60 [2] : vector<2x8x8xf32> to vector<2x8xf32>
    %151 = vector.shape_cast %150 : vector<2x8xf32> to vector<2x8x1xf32>
    %152 = tpu.reciprocal %151 {approx = true} : vector<2x8x1xf32> -> vector<2x8x1xf32>
    %153 = vector.broadcast %152 : vector<2x8x1xf32> to vector<2x8x8xf32>
    %154 = arith.mulf %149, %153 : vector<2x8x8xf32>
    "tpu.trace_start"() <{level = 10 : i32, message = "bqk,bkd->bqd"}> : () -> ()
    %cst_61 = arith.constant dense<0.000000e+00> : vector<2x8x8xf32>
    %155 = tpu.matmul %154, %141, %cst_61 {dimension_numbers = #tpu.dot_dimension_numbers<[2], [1], [1], [2], [0, 0, 0, 1, 1, 2], [0], [0]>} : vector<2x8x8xf32>, vector<2x8x8xf32>, vector<2x8x8xf32> -> vector<2x8x8xf32>
    "tpu.trace_stop"() : () -> ()
    %156 = vector.shape_cast %155 : vector<2x8x8xf32> to vector<16x8xf32>
    %c1040 = arith.constant 1040 : index
    %c0_62 = arith.constant 0 : index
    %157 = vector.load %arg2[%c1040, %c0_62] : memref<3072x128xf32, #tpu.memory_space<vmem>>, vector<8x128xf32>
    %cst_63 = arith.constant dense<0.000000e+00> : vector<16x128xf32>
    %158 = tpu.matmul %156, %157, %cst_63 {dimension_numbers = #tpu.dot_dimension_numbers<[1], [0], [0], [1], [0, 0, 1, 1], [], []>} : vector<16x8xf32>, vector<8x128xf32>, vector<16x128xf32> -> vector<16x128xf32>
    %159 = arith.addf %135, %158 : vector<16x128xf32>
    %160 = vector.extract_strided_slice %85 {offsets = [0, 24], sizes = [16, 8], strides = [1, 1]} : vector<16x128xf32> to vector<16x8xf32>
    %161 = vector.shape_cast %160 : vector<16x8xf32> to vector<2x8x8xf32>
    %162 = vector.extract_strided_slice %85 {offsets = [0, 56], sizes = [16, 8], strides = [1, 1]} : vector<16x128xf32> to vector<16x8xf32>
    %163 = vector.shape_cast %162 : vector<16x8xf32> to vector<2x8x8xf32>
    %164 = vector.extract_strided_slice %85 {offsets = [0, 88], sizes = [16, 8], strides = [1, 1]} : vector<16x128xf32> to vector<16x8xf32>
    %165 = vector.shape_cast %164 : vector<16x8xf32> to vector<2x8x8xf32>
    "tpu.trace_start"() <{level = 10 : i32, message = "bqd,bkd->bqk"}> : () -> ()
    %cst_64 = arith.constant dense<0.000000e+00> : vector<2x8x8xf32>
    %166 = tpu.matmul %161, %163, %cst_64 {dimension_numbers = #tpu.dot_dimension_numbers<[2], [2], [1], [1], [0, 0, 0, 1, 1, 1], [0], [0]>} : vector<2x8x8xf32>, vector<2x8x8xf32>, vector<2x8x8xf32> -> vector<2x8x8xf32>
    "tpu.trace_stop"() : () -> ()
    %cst_65 = arith.constant 0.353553385 : f32
    %167 = vector.broadcast %cst_65 : f32 to vector<2x8x8xf32>
    %168 = arith.mulf %166, %167 : vector<2x8x8xf32>
    %cst_66 = arith.constant dense<0xFF800000> : vector<2x8xf32>
    %169 = vector.multi_reduction <maximumf>, %168, %cst_66 [2] : vector<2x8x8xf32> to vector<2x8xf32>
    %170 = vector.shape_cast %169 : vector<2x8xf32> to vector<2x8x1xf32>
    %171 = vector.broadcast %170 : vector<2x8x1xf32> to vector<2x8x8xf32>
    %172 = arith.subf %168, %171 : vector<2x8x8xf32>
    %173 = math.exp %172 : vector<2x8x8xf32>
    %cst_67 = arith.constant dense<0.000000e+00> : vector<2x8xf32>
    %174 = vector.multi_reduction <add>, %173, %cst_67 [2] : vector<2x8x8xf32> to vector<2x8xf32>
    %175 = vector.shape_cast %174 : vector<2x8xf32> to vector<2x8x1xf32>
    %176 = tpu.reciprocal %175 {approx = true} : vector<2x8x1xf32> -> vector<2x8x1xf32>
    %177 = vector.broadcast %176 : vector<2x8x1xf32> to vector<2x8x8xf32>
    %178 = arith.mulf %173, %177 : vector<2x8x8xf32>
    "tpu.trace_start"() <{level = 10 : i32, message = "bqk,bkd->bqd"}> : () -> ()
    %cst_68 = arith.constant dense<0.000000e+00> : vector<2x8x8xf32>
    %179 = tpu.matmul %178, %165, %cst_68 {dimension_numbers = #tpu.dot_dimension_numbers<[2], [1], [1], [2], [0, 0, 0, 1, 1, 2], [0], [0]>} : vector<2x8x8xf32>, vector<2x8x8xf32>, vector<2x8x8xf32> -> vector<2x8x8xf32>
    "tpu.trace_stop"() : () -> ()
    %180 = vector.shape_cast %179 : vector<2x8x8xf32> to vector<16x8xf32>
    %c1048 = arith.constant 1048 : index
    %c0_69 = arith.constant 0 : index
    %181 = vector.load %arg2[%c1048, %c0_69] : memref<3072x128xf32, #tpu.memory_space<vmem>>, vector<8x128xf32>
    %cst_70 = arith.constant dense<0.000000e+00> : vector<16x128xf32>
    %182 = tpu.matmul %180, %181, %cst_70 {dimension_numbers = #tpu.dot_dimension_numbers<[1], [0], [0], [1], [0, 0, 1, 1], [], []>} : vector<16x8xf32>, vector<8x128xf32>, vector<16x128xf32> -> vector<16x128xf32>
    %183 = arith.addf %159, %182 : vector<16x128xf32>
    %184 = arith.addf %80, %183 : vector<16x128xf32>
    %c9 = arith.constant 9 : index
    %c0_71 = arith.constant 0 : index
    %185 = vector.load %arg3[%c9, %c0_71] : memref<32x128xf32, #tpu.memory_space<vmem>>, vector<1x128xf32>
    %c10 = arith.constant 10 : index
    %c0_72 = arith.constant 0 : index
    %186 = vector.load %arg3[%c10, %c0_72] : memref<32x128xf32, #tpu.memory_space<vmem>>, vector<1x128xf32>
    %cst_73 = arith.constant dense<0.000000e+00> : vector<16xf32>
    %187 = vector.multi_reduction <add>, %184, %cst_73 [1] : vector<16x128xf32> to vector<16xf32>
    %188 = vector.shape_cast %187 : vector<16xf32> to vector<16x1xf32>
    %cst_74 = arith.constant 3.125000e-02 : f32
    %189 = vector.broadcast %cst_74 : f32 to vector<16x1xf32>
    %190 = arith.mulf %188, %189 : vector<16x1xf32>
    %c32_i32 = arith.constant 32 : i32
    %191 = vector.broadcast %c32_i32 : i32 to vector<1x128xi32>
    %192 = arith.cmpi slt, %0, %191 : vector<1x128xi32>
    %193 = vector.broadcast %190 : vector<16x1xf32> to vector<16x128xf32>
    %194 = arith.subf %184, %193 : vector<16x128xf32>
    %cst_75 = arith.constant 0.000000e+00 : f32
    %195 = vector.shape_cast %192 : vector<1x128xi1> to vector<1x128xi1>
    %196 = vector.broadcast %195 : vector<1x128xi1> to vector<16x128xi1>
    %197 = vector.broadcast %cst_75 : f32 to vector<16x128xf32>
    %198 = arith.select %196, %194, %197 : vector<16x128xi1>, vector<16x128xf32>
    %199 = arith.mulf %198, %198 : vector<16x128xf32>
    %cst_76 = arith.constant dense<0.000000e+00> : vector<16xf32>
    %200 = vector.multi_reduction <add>, %199, %cst_76 [1] : vector<16x128xf32> to vector<16xf32>
    %201 = vector.shape_cast %200 : vector<16xf32> to vector<16x1xf32>
    %cst_77 = arith.constant 3.125000e-02 : f32
    %202 = vector.broadcast %cst_77 : f32 to vector<16x1xf32>
    %203 = arith.mulf %201, %202 : vector<16x1xf32>
    %cst_78 = arith.constant 9.99999974E-6 : f32
    %204 = vector.broadcast %cst_78 : f32 to vector<16x1xf32>
    %205 = arith.addf %203, %204 : vector<16x1xf32>
    %206 = math.rsqrt %205 : vector<16x1xf32>
    %207 = vector.broadcast %206 : vector<16x1xf32> to vector<16x128xf32>
    %208 = arith.mulf %198, %207 : vector<16x128xf32>
    %209 = vector.broadcast %185 : vector<1x128xf32> to vector<16x128xf32>
    %210 = arith.mulf %208, %209 : vector<16x128xf32>
    %211 = vector.broadcast %186 : vector<1x128xf32> to vector<16x128xf32>
    %212 = arith.addf %210, %211 : vector<16x128xf32>
    %c1152 = arith.constant 1152 : index
    %c0_79 = arith.constant 0 : index
    %213 = vector.load %arg2[%c1152, %c0_79] : memref<3072x128xf32, #tpu.memory_space<vmem>>, vector<128x128xf32>
    %cst_80 = arith.constant dense<0.000000e+00> : vector<16x128xf32>
    %214 = tpu.matmul %212, %213, %cst_80 {dimension_numbers = #tpu.dot_dimension_numbers<[1], [0], [0], [1], [0, 0, 1, 1], [], []>} : vector<16x128xf32>, vector<128x128xf32>, vector<16x128xf32> -> vector<16x128xf32>
    %c11 = arith.constant 11 : index
    %c0_81 = arith.constant 0 : index
    %215 = vector.load %arg3[%c11, %c0_81] : memref<32x128xf32, #tpu.memory_space<vmem>>, vector<1x128xf32>
    %216 = vector.broadcast %215 : vector<1x128xf32> to vector<16x128xf32>
    %217 = arith.addf %214, %216 : vector<16x128xf32>
    %cst_82 = arith.constant 0.000000e+00 : f32
    %218 = vector.broadcast %cst_82 : f32 to vector<16x128xf32>
    %219 = arith.maximumf %217, %218 : vector<16x128xf32>
    %c1280 = arith.constant 1280 : index
    %c0_83 = arith.constant 0 : index
    %220 = vector.load %arg2[%c1280, %c0_83] : memref<3072x128xf32, #tpu.memory_space<vmem>>, vector<128x128xf32>
    %cst_84 = arith.constant dense<0.000000e+00> : vector<16x128xf32>
    %221 = tpu.matmul %219, %220, %cst_84 {dimension_numbers = #tpu.dot_dimension_numbers<[1], [0], [0], [1], [0, 0, 1, 1], [], []>} : vector<16x128xf32>, vector<128x128xf32>, vector<16x128xf32> -> vector<16x128xf32>
    %c12 = arith.constant 12 : index
    %c0_85 = arith.constant 0 : index
    %222 = vector.load %arg3[%c12, %c0_85] : memref<32x128xf32, #tpu.memory_space<vmem>>, vector<1x128xf32>
    %223 = vector.broadcast %222 : vector<1x128xf32> to vector<16x128xf32>
    %224 = arith.addf %221, %223 : vector<16x128xf32>
    %225 = arith.addf %212, %224 : vector<16x128xf32>
    %c13 = arith.constant 13 : index
    %c0_86 = arith.constant 0 : index
    %226 = vector.load %arg3[%c13, %c0_86] : memref<32x128xf32, #tpu.memory_space<vmem>>, vector<1x128xf32>
    %c14 = arith.constant 14 : index
    %c0_87 = arith.constant 0 : index
    %227 = vector.load %arg3[%c14, %c0_87] : memref<32x128xf32, #tpu.memory_space<vmem>>, vector<1x128xf32>
    %cst_88 = arith.constant dense<0.000000e+00> : vector<16xf32>
    %228 = vector.multi_reduction <add>, %225, %cst_88 [1] : vector<16x128xf32> to vector<16xf32>
    %229 = vector.shape_cast %228 : vector<16xf32> to vector<16x1xf32>
    %cst_89 = arith.constant 3.125000e-02 : f32
    %230 = vector.broadcast %cst_89 : f32 to vector<16x1xf32>
    %231 = arith.mulf %229, %230 : vector<16x1xf32>
    %c32_i32_90 = arith.constant 32 : i32
    %232 = vector.broadcast %c32_i32_90 : i32 to vector<1x128xi32>
    %233 = arith.cmpi slt, %0, %232 : vector<1x128xi32>
    %234 = vector.broadcast %231 : vector<16x1xf32> to vector<16x128xf32>
    %235 = arith.subf %225, %234 : vector<16x128xf32>
    %cst_91 = arith.constant 0.000000e+00 : f32
    %236 = vector.shape_cast %233 : vector<1x128xi1> to vector<1x128xi1>
    %237 = vector.broadcast %236 : vector<1x128xi1> to vector<16x128xi1>
    %238 = vector.broadcast %cst_91 : f32 to vector<16x128xf32>
    %239 = arith.select %237, %235, %238 : vector<16x128xi1>, vector<16x128xf32>
    %240 = arith.mulf %239, %239 : vector<16x128xf32>
    %cst_92 = arith.constant dense<0.000000e+00> : vector<16xf32>
    %241 = vector.multi_reduction <add>, %240, %cst_92 [1] : vector<16x128xf32> to vector<16xf32>
    %242 = vector.shape_cast %241 : vector<16xf32> to vector<16x1xf32>
    %cst_93 = arith.constant 3.125000e-02 : f32
    %243 = vector.broadcast %cst_93 : f32 to vector<16x1xf32>
    %244 = arith.mulf %242, %243 : vector<16x1xf32>
    %cst_94 = arith.constant 9.99999974E-6 : f32
    %245 = vector.broadcast %cst_94 : f32 to vector<16x1xf32>
    %246 = arith.addf %244, %245 : vector<16x1xf32>
    %247 = math.rsqrt %246 : vector<16x1xf32>
    %248 = vector.broadcast %247 : vector<16x1xf32> to vector<16x128xf32>
    %249 = arith.mulf %239, %248 : vector<16x128xf32>
    %250 = vector.broadcast %226 : vector<1x128xf32> to vector<16x128xf32>
    %251 = arith.mulf %249, %250 : vector<16x128xf32>
    %252 = vector.broadcast %227 : vector<1x128xf32> to vector<16x128xf32>
    %253 = arith.addf %251, %252 : vector<16x128xf32>
    %c1408 = arith.constant 1408 : index
    %c0_95 = arith.constant 0 : index
    %254 = vector.load %arg2[%c1408, %c0_95] : memref<3072x128xf32, #tpu.memory_space<vmem>>, vector<128x128xf32>
    %cst_96 = arith.constant dense<0.000000e+00> : vector<16x128xf32>
    %255 = tpu.matmul %253, %254, %cst_96 {dimension_numbers = #tpu.dot_dimension_numbers<[1], [0], [0], [1], [0, 0, 1, 1], [], []>} : vector<16x128xf32>, vector<128x128xf32>, vector<16x128xf32> -> vector<16x128xf32>
    %c15 = arith.constant 15 : index
    %c0_97 = arith.constant 0 : index
    %256 = vector.load %arg3[%c15, %c0_97] : memref<32x128xf32, #tpu.memory_space<vmem>>, vector<1x128xf32>
    %257 = vector.broadcast %256 : vector<1x128xf32> to vector<16x128xf32>
    %258 = arith.addf %255, %257 : vector<16x128xf32>
    %c16 = arith.constant 16 : index
    %c0_98 = arith.constant 0 : index
    %259 = vector.load %arg3[%c16, %c0_98] : memref<32x128xf32, #tpu.memory_space<vmem>>, vector<1x128xf32>
    %260 = vector.extract_strided_slice %258 {offsets = [0, 0], sizes = [16, 8], strides = [1, 1]} : vector<16x128xf32> to vector<16x8xf32>
    %261 = vector.shape_cast %260 : vector<16x8xf32> to vector<2x8x8xf32>
    %262 = vector.extract_strided_slice %258 {offsets = [0, 32], sizes = [16, 8], strides = [1, 1]} : vector<16x128xf32> to vector<16x8xf32>
    %263 = vector.shape_cast %262 : vector<16x8xf32> to vector<2x8x8xf32>
    %264 = vector.extract_strided_slice %258 {offsets = [0, 64], sizes = [16, 8], strides = [1, 1]} : vector<16x128xf32> to vector<16x8xf32>
    %265 = vector.shape_cast %264 : vector<16x8xf32> to vector<2x8x8xf32>
    "tpu.trace_start"() <{level = 10 : i32, message = "bqd,bkd->bqk"}> : () -> ()
    %cst_99 = arith.constant dense<0.000000e+00> : vector<2x8x8xf32>
    %266 = tpu.matmul %261, %263, %cst_99 {dimension_numbers = #tpu.dot_dimension_numbers<[2], [2], [1], [1], [0, 0, 0, 1, 1, 1], [0], [0]>} : vector<2x8x8xf32>, vector<2x8x8xf32>, vector<2x8x8xf32> -> vector<2x8x8xf32>
    "tpu.trace_stop"() : () -> ()
    %cst_100 = arith.constant 0.353553385 : f32
    %267 = vector.broadcast %cst_100 : f32 to vector<2x8x8xf32>
    %268 = arith.mulf %266, %267 : vector<2x8x8xf32>
    %cst_101 = arith.constant dense<0xFF800000> : vector<2x8xf32>
    %269 = vector.multi_reduction <maximumf>, %268, %cst_101 [2] : vector<2x8x8xf32> to vector<2x8xf32>
    %270 = vector.shape_cast %269 : vector<2x8xf32> to vector<2x8x1xf32>
    %271 = vector.broadcast %270 : vector<2x8x1xf32> to vector<2x8x8xf32>
    %272 = arith.subf %268, %271 : vector<2x8x8xf32>
    %273 = math.exp %272 : vector<2x8x8xf32>
    %cst_102 = arith.constant dense<0.000000e+00> : vector<2x8xf32>
    %274 = vector.multi_reduction <add>, %273, %cst_102 [2] : vector<2x8x8xf32> to vector<2x8xf32>
    %275 = vector.shape_cast %274 : vector<2x8xf32> to vector<2x8x1xf32>
    %276 = tpu.reciprocal %275 {approx = true} : vector<2x8x1xf32> -> vector<2x8x1xf32>
    %277 = vector.broadcast %276 : vector<2x8x1xf32> to vector<2x8x8xf32>
    %278 = arith.mulf %273, %277 : vector<2x8x8xf32>
    "tpu.trace_start"() <{level = 10 : i32, message = "bqk,bkd->bqd"}> : () -> ()
    %cst_103 = arith.constant dense<0.000000e+00> : vector<2x8x8xf32>
    %279 = tpu.matmul %278, %265, %cst_103 {dimension_numbers = #tpu.dot_dimension_numbers<[2], [1], [1], [2], [0, 0, 0, 1, 1, 2], [0], [0]>} : vector<2x8x8xf32>, vector<2x8x8xf32>, vector<2x8x8xf32> -> vector<2x8x8xf32>
    "tpu.trace_stop"() : () -> ()
    %280 = vector.shape_cast %279 : vector<2x8x8xf32> to vector<16x8xf32>
    %c1536 = arith.constant 1536 : index
    %c0_104 = arith.constant 0 : index
    %281 = vector.load %arg2[%c1536, %c0_104] : memref<3072x128xf32, #tpu.memory_space<vmem>>, vector<8x128xf32>
    %cst_105 = arith.constant dense<0.000000e+00> : vector<16x128xf32>
    %282 = tpu.matmul %280, %281, %cst_105 {dimension_numbers = #tpu.dot_dimension_numbers<[1], [0], [0], [1], [0, 0, 1, 1], [], []>} : vector<16x8xf32>, vector<8x128xf32>, vector<16x128xf32> -> vector<16x128xf32>
    %283 = vector.broadcast %259 : vector<1x128xf32> to vector<16x128xf32>
    %284 = arith.addf %283, %282 : vector<16x128xf32>
    %285 = vector.extract_strided_slice %258 {offsets = [0, 8], sizes = [16, 8], strides = [1, 1]} : vector<16x128xf32> to vector<16x8xf32>
    %286 = vector.shape_cast %285 : vector<16x8xf32> to vector<2x8x8xf32>
    %287 = vector.extract_strided_slice %258 {offsets = [0, 40], sizes = [16, 8], strides = [1, 1]} : vector<16x128xf32> to vector<16x8xf32>
    %288 = vector.shape_cast %287 : vector<16x8xf32> to vector<2x8x8xf32>
    %289 = vector.extract_strided_slice %258 {offsets = [0, 72], sizes = [16, 8], strides = [1, 1]} : vector<16x128xf32> to vector<16x8xf32>
    %290 = vector.shape_cast %289 : vector<16x8xf32> to vector<2x8x8xf32>
    "tpu.trace_start"() <{level = 10 : i32, message = "bqd,bkd->bqk"}> : () -> ()
    %cst_106 = arith.constant dense<0.000000e+00> : vector<2x8x8xf32>
    %291 = tpu.matmul %286, %288, %cst_106 {dimension_numbers = #tpu.dot_dimension_numbers<[2], [2], [1], [1], [0, 0, 0, 1, 1, 1], [0], [0]>} : vector<2x8x8xf32>, vector<2x8x8xf32>, vector<2x8x8xf32> -> vector<2x8x8xf32>
    "tpu.trace_stop"() : () -> ()
    %cst_107 = arith.constant 0.353553385 : f32
    %292 = vector.broadcast %cst_107 : f32 to vector<2x8x8xf32>
    %293 = arith.mulf %291, %292 : vector<2x8x8xf32>
    %cst_108 = arith.constant dense<0xFF800000> : vector<2x8xf32>
    %294 = vector.multi_reduction <maximumf>, %293, %cst_108 [2] : vector<2x8x8xf32> to vector<2x8xf32>
    %295 = vector.shape_cast %294 : vector<2x8xf32> to vector<2x8x1xf32>
    %296 = vector.broadcast %295 : vector<2x8x1xf32> to vector<2x8x8xf32>
    %297 = arith.subf %293, %296 : vector<2x8x8xf32>
    %298 = math.exp %297 : vector<2x8x8xf32>
    %cst_109 = arith.constant dense<0.000000e+00> : vector<2x8xf32>
    %299 = vector.multi_reduction <add>, %298, %cst_109 [2] : vector<2x8x8xf32> to vector<2x8xf32>
    %300 = vector.shape_cast %299 : vector<2x8xf32> to vector<2x8x1xf32>
    %301 = tpu.reciprocal %300 {approx = true} : vector<2x8x1xf32> -> vector<2x8x1xf32>
    %302 = vector.broadcast %301 : vector<2x8x1xf32> to vector<2x8x8xf32>
    %303 = arith.mulf %298, %302 : vector<2x8x8xf32>
    "tpu.trace_start"() <{level = 10 : i32, message = "bqk,bkd->bqd"}> : () -> ()
    %cst_110 = arith.constant dense<0.000000e+00> : vector<2x8x8xf32>
    %304 = tpu.matmul %303, %290, %cst_110 {dimension_numbers = #tpu.dot_dimension_numbers<[2], [1], [1], [2], [0, 0, 0, 1, 1, 2], [0], [0]>} : vector<2x8x8xf32>, vector<2x8x8xf32>, vector<2x8x8xf32> -> vector<2x8x8xf32>
    "tpu.trace_stop"() : () -> ()
    %305 = vector.shape_cast %304 : vector<2x8x8xf32> to vector<16x8xf32>
    %c1544 = arith.constant 1544 : index
    %c0_111 = arith.constant 0 : index
    %306 = vector.load %arg2[%c1544, %c0_111] : memref<3072x128xf32, #tpu.memory_space<vmem>>, vector<8x128xf32>
    %cst_112 = arith.constant dense<0.000000e+00> : vector<16x128xf32>
    %307 = tpu.matmul %305, %306, %cst_112 {dimension_numbers = #tpu.dot_dimension_numbers<[1], [0], [0], [1], [0, 0, 1, 1], [], []>} : vector<16x8xf32>, vector<8x128xf32>, vector<16x128xf32> -> vector<16x128xf32>
    %308 = arith.addf %284, %307 : vector<16x128xf32>
    %309 = vector.extract_strided_slice %258 {offsets = [0, 16], sizes = [16, 8], strides = [1, 1]} : vector<16x128xf32> to vector<16x8xf32>
    %310 = vector.shape_cast %309 : vector<16x8xf32> to vector<2x8x8xf32>
    %311 = vector.extract_strided_slice %258 {offsets = [0, 48], sizes = [16, 8], strides = [1, 1]} : vector<16x128xf32> to vector<16x8xf32>
    %312 = vector.shape_cast %311 : vector<16x8xf32> to vector<2x8x8xf32>
    %313 = vector.extract_strided_slice %258 {offsets = [0, 80], sizes = [16, 8], strides = [1, 1]} : vector<16x128xf32> to vector<16x8xf32>
    %314 = vector.shape_cast %313 : vector<16x8xf32> to vector<2x8x8xf32>
    "tpu.trace_start"() <{level = 10 : i32, message = "bqd,bkd->bqk"}> : () -> ()
    %cst_113 = arith.constant dense<0.000000e+00> : vector<2x8x8xf32>
    %315 = tpu.matmul %310, %312, %cst_113 {dimension_numbers = #tpu.dot_dimension_numbers<[2], [2], [1], [1], [0, 0, 0, 1, 1, 1], [0], [0]>} : vector<2x8x8xf32>, vector<2x8x8xf32>, vector<2x8x8xf32> -> vector<2x8x8xf32>
    "tpu.trace_stop"() : () -> ()
    %cst_114 = arith.constant 0.353553385 : f32
    %316 = vector.broadcast %cst_114 : f32 to vector<2x8x8xf32>
    %317 = arith.mulf %315, %316 : vector<2x8x8xf32>
    %cst_115 = arith.constant dense<0xFF800000> : vector<2x8xf32>
    %318 = vector.multi_reduction <maximumf>, %317, %cst_115 [2] : vector<2x8x8xf32> to vector<2x8xf32>
    %319 = vector.shape_cast %318 : vector<2x8xf32> to vector<2x8x1xf32>
    %320 = vector.broadcast %319 : vector<2x8x1xf32> to vector<2x8x8xf32>
    %321 = arith.subf %317, %320 : vector<2x8x8xf32>
    %322 = math.exp %321 : vector<2x8x8xf32>
    %cst_116 = arith.constant dense<0.000000e+00> : vector<2x8xf32>
    %323 = vector.multi_reduction <add>, %322, %cst_116 [2] : vector<2x8x8xf32> to vector<2x8xf32>
    %324 = vector.shape_cast %323 : vector<2x8xf32> to vector<2x8x1xf32>
    %325 = tpu.reciprocal %324 {approx = true} : vector<2x8x1xf32> -> vector<2x8x1xf32>
    %326 = vector.broadcast %325 : vector<2x8x1xf32> to vector<2x8x8xf32>
    %327 = arith.mulf %322, %326 : vector<2x8x8xf32>
    "tpu.trace_start"() <{level = 10 : i32, message = "bqk,bkd->bqd"}> : () -> ()
    %cst_117 = arith.constant dense<0.000000e+00> : vector<2x8x8xf32>
    %328 = tpu.matmul %327, %314, %cst_117 {dimension_numbers = #tpu.dot_dimension_numbers<[2], [1], [1], [2], [0, 0, 0, 1, 1, 2], [0], [0]>} : vector<2x8x8xf32>, vector<2x8x8xf32>, vector<2x8x8xf32> -> vector<2x8x8xf32>
    "tpu.trace_stop"() : () -> ()
    %329 = vector.shape_cast %328 : vector<2x8x8xf32> to vector<16x8xf32>
    %c1552 = arith.constant 1552 : index
    %c0_118 = arith.constant 0 : index
    %330 = vector.load %arg2[%c1552, %c0_118] : memref<3072x128xf32, #tpu.memory_space<vmem>>, vector<8x128xf32>
    %cst_119 = arith.constant dense<0.000000e+00> : vector<16x128xf32>
    %331 = tpu.matmul %329, %330, %cst_119 {dimension_numbers = #tpu.dot_dimension_numbers<[1], [0], [0], [1], [0, 0, 1, 1], [], []>} : vector<16x8xf32>, vector<8x128xf32>, vector<16x128xf32> -> vector<16x128xf32>
    %332 = arith.addf %308, %331 : vector<16x128xf32>
    %333 = vector.extract_strided_slice %258 {offsets = [0, 24], sizes = [16, 8], strides = [1, 1]} : vector<16x128xf32> to vector<16x8xf32>
    %334 = vector.shape_cast %333 : vector<16x8xf32> to vector<2x8x8xf32>
    %335 = vector.extract_strided_slice %258 {offsets = [0, 56], sizes = [16, 8], strides = [1, 1]} : vector<16x128xf32> to vector<16x8xf32>
    %336 = vector.shape_cast %335 : vector<16x8xf32> to vector<2x8x8xf32>
    %337 = vector.extract_strided_slice %258 {offsets = [0, 88], sizes = [16, 8], strides = [1, 1]} : vector<16x128xf32> to vector<16x8xf32>
    %338 = vector.shape_cast %337 : vector<16x8xf32> to vector<2x8x8xf32>
    "tpu.trace_start"() <{level = 10 : i32, message = "bqd,bkd->bqk"}> : () -> ()
    %cst_120 = arith.constant dense<0.000000e+00> : vector<2x8x8xf32>
    %339 = tpu.matmul %334, %336, %cst_120 {dimension_numbers = #tpu.dot_dimension_numbers<[2], [2], [1], [1], [0, 0, 0, 1, 1, 1], [0], [0]>} : vector<2x8x8xf32>, vector<2x8x8xf32>, vector<2x8x8xf32> -> vector<2x8x8xf32>
    "tpu.trace_stop"() : () -> ()
    %cst_121 = arith.constant 0.353553385 : f32
    %340 = vector.broadcast %cst_121 : f32 to vector<2x8x8xf32>
    %341 = arith.mulf %339, %340 : vector<2x8x8xf32>
    %cst_122 = arith.constant dense<0xFF800000> : vector<2x8xf32>
    %342 = vector.multi_reduction <maximumf>, %341, %cst_122 [2] : vector<2x8x8xf32> to vector<2x8xf32>
    %343 = vector.shape_cast %342 : vector<2x8xf32> to vector<2x8x1xf32>
    %344 = vector.broadcast %343 : vector<2x8x1xf32> to vector<2x8x8xf32>
    %345 = arith.subf %341, %344 : vector<2x8x8xf32>
    %346 = math.exp %345 : vector<2x8x8xf32>
    %cst_123 = arith.constant dense<0.000000e+00> : vector<2x8xf32>
    %347 = vector.multi_reduction <add>, %346, %cst_123 [2] : vector<2x8x8xf32> to vector<2x8xf32>
    %348 = vector.shape_cast %347 : vector<2x8xf32> to vector<2x8x1xf32>
    %349 = tpu.reciprocal %348 {approx = true} : vector<2x8x1xf32> -> vector<2x8x1xf32>
    %350 = vector.broadcast %349 : vector<2x8x1xf32> to vector<2x8x8xf32>
    %351 = arith.mulf %346, %350 : vector<2x8x8xf32>
    "tpu.trace_start"() <{level = 10 : i32, message = "bqk,bkd->bqd"}> : () -> ()
    %cst_124 = arith.constant dense<0.000000e+00> : vector<2x8x8xf32>
    %352 = tpu.matmul %351, %338, %cst_124 {dimension_numbers = #tpu.dot_dimension_numbers<[2], [1], [1], [2], [0, 0, 0, 1, 1, 2], [0], [0]>} : vector<2x8x8xf32>, vector<2x8x8xf32>, vector<2x8x8xf32> -> vector<2x8x8xf32>
    "tpu.trace_stop"() : () -> ()
    %353 = vector.shape_cast %352 : vector<2x8x8xf32> to vector<16x8xf32>
    %c1560 = arith.constant 1560 : index
    %c0_125 = arith.constant 0 : index
    %354 = vector.load %arg2[%c1560, %c0_125] : memref<3072x128xf32, #tpu.memory_space<vmem>>, vector<8x128xf32>
    %cst_126 = arith.constant dense<0.000000e+00> : vector<16x128xf32>
    %355 = tpu.matmul %353, %354, %cst_126 {dimension_numbers = #tpu.dot_dimension_numbers<[1], [0], [0], [1], [0, 0, 1, 1], [], []>} : vector<16x8xf32>, vector<8x128xf32>, vector<16x128xf32> -> vector<16x128xf32>
    %356 = arith.addf %332, %355 : vector<16x128xf32>
    %357 = arith.addf %253, %356 : vector<16x128xf32>
    %c17 = arith.constant 17 : index
    %c0_127 = arith.constant 0 : index
    %358 = vector.load %arg3[%c17, %c0_127] : memref<32x128xf32, #tpu.memory_space<vmem>>, vector<1x128xf32>
    %c18 = arith.constant 18 : index
    %c0_128 = arith.constant 0 : index
    %359 = vector.load %arg3[%c18, %c0_128] : memref<32x128xf32, #tpu.memory_space<vmem>>, vector<1x128xf32>
    %cst_129 = arith.constant dense<0.000000e+00> : vector<16xf32>
    %360 = vector.multi_reduction <add>, %357, %cst_129 [1] : vector<16x128xf32> to vector<16xf32>
    %361 = vector.shape_cast %360 : vector<16xf32> to vector<16x1xf32>
    %cst_130 = arith.constant 3.125000e-02 : f32
    %362 = vector.broadcast %cst_130 : f32 to vector<16x1xf32>
    %363 = arith.mulf %361, %362 : vector<16x1xf32>
    %c32_i32_131 = arith.constant 32 : i32
    %364 = vector.broadcast %c32_i32_131 : i32 to vector<1x128xi32>
    %365 = arith.cmpi slt, %0, %364 : vector<1x128xi32>
    %366 = vector.broadcast %363 : vector<16x1xf32> to vector<16x128xf32>
    %367 = arith.subf %357, %366 : vector<16x128xf32>
    %cst_132 = arith.constant 0.000000e+00 : f32
    %368 = vector.shape_cast %365 : vector<1x128xi1> to vector<1x128xi1>
    %369 = vector.broadcast %368 : vector<1x128xi1> to vector<16x128xi1>
    %370 = vector.broadcast %cst_132 : f32 to vector<16x128xf32>
    %371 = arith.select %369, %367, %370 : vector<16x128xi1>, vector<16x128xf32>
    %372 = arith.mulf %371, %371 : vector<16x128xf32>
    %cst_133 = arith.constant dense<0.000000e+00> : vector<16xf32>
    %373 = vector.multi_reduction <add>, %372, %cst_133 [1] : vector<16x128xf32> to vector<16xf32>
    %374 = vector.shape_cast %373 : vector<16xf32> to vector<16x1xf32>
    %cst_134 = arith.constant 3.125000e-02 : f32
    %375 = vector.broadcast %cst_134 : f32 to vector<16x1xf32>
    %376 = arith.mulf %374, %375 : vector<16x1xf32>
    %cst_135 = arith.constant 9.99999974E-6 : f32
    %377 = vector.broadcast %cst_135 : f32 to vector<16x1xf32>
    %378 = arith.addf %376, %377 : vector<16x1xf32>
    %379 = math.rsqrt %378 : vector<16x1xf32>
    %380 = vector.broadcast %379 : vector<16x1xf32> to vector<16x128xf32>
    %381 = arith.mulf %371, %380 : vector<16x128xf32>
    %382 = vector.broadcast %358 : vector<1x128xf32> to vector<16x128xf32>
    %383 = arith.mulf %381, %382 : vector<16x128xf32>
    %384 = vector.broadcast %359 : vector<1x128xf32> to vector<16x128xf32>
    %385 = arith.addf %383, %384 : vector<16x128xf32>
    %c1664 = arith.constant 1664 : index
    %c0_136 = arith.constant 0 : index
    %386 = vector.load %arg2[%c1664, %c0_136] : memref<3072x128xf32, #tpu.memory_space<vmem>>, vector<128x128xf32>
    %cst_137 = arith.constant dense<0.000000e+00> : vector<16x128xf32>
    %387 = tpu.matmul %385, %386, %cst_137 {dimension_numbers = #tpu.dot_dimension_numbers<[1], [0], [0], [1], [0, 0, 1, 1], [], []>} : vector<16x128xf32>, vector<128x128xf32>, vector<16x128xf32> -> vector<16x128xf32>
    %c19 = arith.constant 19 : index
    %c0_138 = arith.constant 0 : index
    %388 = vector.load %arg3[%c19, %c0_138] : memref<32x128xf32, #tpu.memory_space<vmem>>, vector<1x128xf32>
    %389 = vector.broadcast %388 : vector<1x128xf32> to vector<16x128xf32>
    %390 = arith.addf %387, %389 : vector<16x128xf32>
    %cst_139 = arith.constant 0.000000e+00 : f32
    %391 = vector.broadcast %cst_139 : f32 to vector<16x128xf32>
    %392 = arith.maximumf %390, %391 : vector<16x128xf32>
    %c1792 = arith.constant 1792 : index
    %c0_140 = arith.constant 0 : index
    %393 = vector.load %arg2[%c1792, %c0_140] : memref<3072x128xf32, #tpu.memory_space<vmem>>, vector<128x128xf32>
    %cst_141 = arith.constant dense<0.000000e+00> : vector<16x128xf32>
    %394 = tpu.matmul %392, %393, %cst_141 {dimension_numbers = #tpu.dot_dimension_numbers<[1], [0], [0], [1], [0, 0, 1, 1], [], []>} : vector<16x128xf32>, vector<128x128xf32>, vector<16x128xf32> -> vector<16x128xf32>
    %c20 = arith.constant 20 : index
    %c0_142 = arith.constant 0 : index
    %395 = vector.load %arg3[%c20, %c0_142] : memref<32x128xf32, #tpu.memory_space<vmem>>, vector<1x128xf32>
    %396 = vector.broadcast %395 : vector<1x128xf32> to vector<16x128xf32>
    %397 = arith.addf %394, %396 : vector<16x128xf32>
    %398 = arith.addf %385, %397 : vector<16x128xf32>
    %c21 = arith.constant 21 : index
    %c0_143 = arith.constant 0 : index
    %399 = vector.load %arg3[%c21, %c0_143] : memref<32x128xf32, #tpu.memory_space<vmem>>, vector<1x128xf32>
    %c22 = arith.constant 22 : index
    %c0_144 = arith.constant 0 : index
    %400 = vector.load %arg3[%c22, %c0_144] : memref<32x128xf32, #tpu.memory_space<vmem>>, vector<1x128xf32>
    %cst_145 = arith.constant dense<0.000000e+00> : vector<16xf32>
    %401 = vector.multi_reduction <add>, %398, %cst_145 [1] : vector<16x128xf32> to vector<16xf32>
    %402 = vector.shape_cast %401 : vector<16xf32> to vector<16x1xf32>
    %cst_146 = arith.constant 3.125000e-02 : f32
    %403 = vector.broadcast %cst_146 : f32 to vector<16x1xf32>
    %404 = arith.mulf %402, %403 : vector<16x1xf32>
    %c32_i32_147 = arith.constant 32 : i32
    %405 = vector.broadcast %c32_i32_147 : i32 to vector<1x128xi32>
    %406 = arith.cmpi slt, %0, %405 : vector<1x128xi32>
    %407 = vector.broadcast %404 : vector<16x1xf32> to vector<16x128xf32>
    %408 = arith.subf %398, %407 : vector<16x128xf32>
    %cst_148 = arith.constant 0.000000e+00 : f32
    %409 = vector.shape_cast %406 : vector<1x128xi1> to vector<1x128xi1>
    %410 = vector.broadcast %409 : vector<1x128xi1> to vector<16x128xi1>
    %411 = vector.broadcast %cst_148 : f32 to vector<16x128xf32>
    %412 = arith.select %410, %408, %411 : vector<16x128xi1>, vector<16x128xf32>
    %413 = arith.mulf %412, %412 : vector<16x128xf32>
    %cst_149 = arith.constant dense<0.000000e+00> : vector<16xf32>
    %414 = vector.multi_reduction <add>, %413, %cst_149 [1] : vector<16x128xf32> to vector<16xf32>
    %415 = vector.shape_cast %414 : vector<16xf32> to vector<16x1xf32>
    %cst_150 = arith.constant 3.125000e-02 : f32
    %416 = vector.broadcast %cst_150 : f32 to vector<16x1xf32>
    %417 = arith.mulf %415, %416 : vector<16x1xf32>
    %cst_151 = arith.constant 9.99999974E-6 : f32
    %418 = vector.broadcast %cst_151 : f32 to vector<16x1xf32>
    %419 = arith.addf %417, %418 : vector<16x1xf32>
    %420 = math.rsqrt %419 : vector<16x1xf32>
    %421 = vector.broadcast %420 : vector<16x1xf32> to vector<16x128xf32>
    %422 = arith.mulf %412, %421 : vector<16x128xf32>
    %423 = vector.broadcast %399 : vector<1x128xf32> to vector<16x128xf32>
    %424 = arith.mulf %422, %423 : vector<16x128xf32>
    %425 = vector.broadcast %400 : vector<1x128xf32> to vector<16x128xf32>
    %426 = arith.addf %424, %425 : vector<16x128xf32>
    %427 = vector.shape_cast %426 : vector<16x128xf32> to vector<2x8x128xf32>
    %cst_152 = arith.constant dense<0.000000e+00> : vector<2x128xf32>
    %428 = vector.multi_reduction <add>, %427, %cst_152 [1] : vector<2x8x128xf32> to vector<2x128xf32>
    %cst_153 = arith.constant 8.000000e+00 : f32
    %429 = vector.broadcast %cst_153 : f32 to vector<2x128xf32>
    %430 = arith.divf %428, %429 : vector<2x128xf32>
    %c1920 = arith.constant 1920 : index
    %c0_154 = arith.constant 0 : index
    %431 = vector.load %arg2[%c1920, %c0_154] : memref<3072x128xf32, #tpu.memory_space<vmem>>, vector<128x128xf32>
    %cst_155 = arith.constant dense<0.000000e+00> : vector<2x128xf32>
    %432 = tpu.matmul %430, %431, %cst_155 {dimension_numbers = #tpu.dot_dimension_numbers<[1], [0], [0], [1], [0, 0, 1, 1], [], []>} : vector<2x128xf32>, vector<128x128xf32>, vector<2x128xf32> -> vector<2x128xf32>
    %c23 = arith.constant 23 : index
    %c0_156 = arith.constant 0 : index
    %433 = vector.load %arg3[%c23, %c0_156] : memref<32x128xf32, #tpu.memory_space<vmem>>, vector<1x128xf32>
    %434 = vector.broadcast %433 : vector<1x128xf32> to vector<2x128xf32>
    %435 = arith.addf %432, %434 : vector<2x128xf32>
    %cst_157 = arith.constant 0.000000e+00 : f32
    %436 = vector.broadcast %cst_157 : f32 to vector<2x128xf32>
    %437 = arith.maximumf %435, %436 : vector<2x128xf32>
    %c2048 = arith.constant 2048 : index
    %c0_158 = arith.constant 0 : index
    %438 = vector.load %arg2[%c2048, %c0_158] : memref<3072x128xf32, #tpu.memory_space<vmem>>, vector<128x128xf32>
    %cst_159 = arith.constant dense<0.000000e+00> : vector<2x128xf32>
    %439 = tpu.matmul %437, %438, %cst_159 {dimension_numbers = #tpu.dot_dimension_numbers<[1], [0], [0], [1], [0, 0, 1, 1], [], []>} : vector<2x128xf32>, vector<128x128xf32>, vector<2x128xf32> -> vector<2x128xf32>
    %c24 = arith.constant 24 : index
    %c0_160 = arith.constant 0 : index
    %440 = vector.load %arg3[%c24, %c0_160] : memref<32x128xf32, #tpu.memory_space<vmem>>, vector<1x128xf32>
    %441 = vector.broadcast %440 : vector<1x128xf32> to vector<2x128xf32>
    %442 = arith.addf %439, %441 : vector<2x128xf32>
    %cst_161 = arith.constant 0.000000e+00 : f32
    %443 = vector.broadcast %cst_161 : f32 to vector<2x128xf32>
    %444 = arith.maximumf %442, %443 : vector<2x128xf32>
    %c2176 = arith.constant 2176 : index
    %c0_162 = arith.constant 0 : index
    %445 = vector.load %arg2[%c2176, %c0_162] : memref<3072x128xf32, #tpu.memory_space<vmem>>, vector<128x128xf32>
    %cst_163 = arith.constant dense<0.000000e+00> : vector<2x128xf32>
    %446 = tpu.matmul %444, %445, %cst_163 {dimension_numbers = #tpu.dot_dimension_numbers<[1], [0], [0], [1], [0, 0, 1, 1], [], []>} : vector<2x128xf32>, vector<128x128xf32>, vector<2x128xf32> -> vector<2x128xf32>
    %c25 = arith.constant 25 : index
    %c0_164 = arith.constant 0 : index
    %447 = vector.load %arg3[%c25, %c0_164] : memref<32x128xf32, #tpu.memory_space<vmem>>, vector<1x128xf32>
    %448 = vector.broadcast %447 : vector<1x128xf32> to vector<2x128xf32>
    %449 = arith.addf %446, %448 : vector<2x128xf32>
    %c7_i32 = arith.constant 7 : i32
    %450 = vector.broadcast %c7_i32 : i32 to vector<1x128xi32>
    %451 = arith.cmpi sge, %0, %450 : vector<1x128xi32>
    %c11_i32 = arith.constant 11 : i32
    %452 = vector.broadcast %c11_i32 : i32 to vector<1x128xi32>
    %453 = arith.cmpi slt, %0, %452 : vector<1x128xi32>
    %454 = arith.andi %451, %453 : vector<1x128xi1>
    %cst_165 = arith.constant -1.000000e+30 : f32
    %455 = vector.shape_cast %454 : vector<1x128xi1> to vector<1x128xi1>
    %456 = vector.broadcast %455 : vector<1x128xi1> to vector<2x128xi1>
    %457 = vector.broadcast %cst_165 : f32 to vector<2x128xf32>
    %458 = arith.select %456, %449, %457 : vector<2x128xi1>, vector<2x128xf32>
    %cst_166 = arith.constant dense<0xFF800000> : vector<2xf32>
    %459 = vector.multi_reduction <maximumf>, %458, %cst_166 [1] : vector<2x128xf32> to vector<2xf32>
    %460 = vector.shape_cast %459 : vector<2xf32> to vector<2x1xf32>
    %461 = vector.broadcast %460 : vector<2x1xf32> to vector<2x128xf32>
    %462 = arith.subf %458, %461 : vector<2x128xf32>
    %463 = math.exp %462 : vector<2x128xf32>
    %cst_167 = arith.constant dense<0.000000e+00> : vector<2xf32>
    %464 = vector.multi_reduction <add>, %463, %cst_167 [1] : vector<2x128xf32> to vector<2xf32>
    %465 = vector.shape_cast %464 : vector<2xf32> to vector<2x1xf32>
    %466 = vector.broadcast %465 : vector<2x1xf32> to vector<2x128xf32>
    %467 = arith.divf %463, %466 : vector<2x128xf32>
    %c2304 = arith.constant 2304 : index
    %c0_168 = arith.constant 0 : index
    %468 = vector.load %arg2[%c2304, %c0_168] : memref<3072x128xf32, #tpu.memory_space<vmem>>, vector<128x128xf32>
    %cst_169 = arith.constant dense<0.000000e+00> : vector<2x128xf32>
    %469 = tpu.matmul %430, %468, %cst_169 {dimension_numbers = #tpu.dot_dimension_numbers<[1], [0], [0], [1], [0, 0, 1, 1], [], []>} : vector<2x128xf32>, vector<128x128xf32>, vector<2x128xf32> -> vector<2x128xf32>
    %c2432 = arith.constant 2432 : index
    %c0_170 = arith.constant 0 : index
    %470 = vector.load %arg2[%c2432, %c0_170] : memref<3072x128xf32, #tpu.memory_space<vmem>>, vector<128x128xf32>
    %cst_171 = arith.constant dense<0.000000e+00> : vector<2x128xf32>
    %471 = tpu.matmul %467, %470, %cst_171 {dimension_numbers = #tpu.dot_dimension_numbers<[1], [0], [0], [1], [0, 0, 1, 1], [], []>} : vector<2x128xf32>, vector<128x128xf32>, vector<2x128xf32> -> vector<2x128xf32>
    %472 = arith.addf %469, %471 : vector<2x128xf32>
    %c26 = arith.constant 26 : index
    %c0_172 = arith.constant 0 : index
    %473 = vector.load %arg3[%c26, %c0_172] : memref<32x128xf32, #tpu.memory_space<vmem>>, vector<1x128xf32>
    %474 = vector.broadcast %473 : vector<1x128xf32> to vector<2x128xf32>
    %475 = arith.addf %472, %474 : vector<2x128xf32>
    %cst_173 = arith.constant 0.000000e+00 : f32
    %476 = vector.broadcast %cst_173 : f32 to vector<2x128xf32>
    %477 = arith.maximumf %475, %476 : vector<2x128xf32>
    %c2560 = arith.constant 2560 : index
    %c0_174 = arith.constant 0 : index
    %478 = vector.load %arg2[%c2560, %c0_174] : memref<3072x128xf32, #tpu.memory_space<vmem>>, vector<128x128xf32>
    %cst_175 = arith.constant dense<0.000000e+00> : vector<2x128xf32>
    %479 = tpu.matmul %477, %478, %cst_175 {dimension_numbers = #tpu.dot_dimension_numbers<[1], [0], [0], [1], [0, 0, 1, 1], [], []>} : vector<2x128xf32>, vector<128x128xf32>, vector<2x128xf32> -> vector<2x128xf32>
    %c27 = arith.constant 27 : index
    %c0_176 = arith.constant 0 : index
    %480 = vector.load %arg3[%c27, %c0_176] : memref<32x128xf32, #tpu.memory_space<vmem>>, vector<1x128xf32>
    %481 = vector.broadcast %480 : vector<1x128xf32> to vector<2x128xf32>
    %482 = arith.addf %479, %481 : vector<2x128xf32>
    %c2688 = arith.constant 2688 : index
    %c0_177 = arith.constant 0 : index
    %483 = vector.load %arg2[%c2688, %c0_177] : memref<3072x128xf32, #tpu.memory_space<vmem>>, vector<128x128xf32>
    %cst_178 = arith.constant dense<0.000000e+00> : vector<2x128xf32>
    %484 = tpu.matmul %482, %483, %cst_178 {dimension_numbers = #tpu.dot_dimension_numbers<[1], [0], [0], [1], [0, 0, 1, 1], [], []>} : vector<2x128xf32>, vector<128x128xf32>, vector<2x128xf32> -> vector<2x128xf32>
    %c28 = arith.constant 28 : index
    %c0_179 = arith.constant 0 : index
    %485 = vector.load %arg3[%c28, %c0_179] : memref<32x128xf32, #tpu.memory_space<vmem>>, vector<1x128xf32>
    %486 = vector.broadcast %485 : vector<1x128xf32> to vector<2x128xf32>
    %487 = arith.addf %484, %486 : vector<2x128xf32>
    %cst_180 = arith.constant 0.000000e+00 : f32
    %488 = vector.broadcast %cst_180 : f32 to vector<2x128xf32>
    %489 = arith.maximumf %487, %488 : vector<2x128xf32>
    %c2816 = arith.constant 2816 : index
    %c0_181 = arith.constant 0 : index
    %490 = vector.load %arg2[%c2816, %c0_181] : memref<3072x128xf32, #tpu.memory_space<vmem>>, vector<128x128xf32>
    %cst_182 = arith.constant dense<0.000000e+00> : vector<2x128xf32>
    %491 = tpu.matmul %489, %490, %cst_182 {dimension_numbers = #tpu.dot_dimension_numbers<[1], [0], [0], [1], [0, 0, 1, 1], [], []>} : vector<2x128xf32>, vector<128x128xf32>, vector<2x128xf32> -> vector<2x128xf32>
    %c29 = arith.constant 29 : index
    %c0_183 = arith.constant 0 : index
    %492 = vector.load %arg3[%c29, %c0_183] : memref<32x128xf32, #tpu.memory_space<vmem>>, vector<1x128xf32>
    %493 = vector.broadcast %492 : vector<1x128xf32> to vector<2x128xf32>
    %494 = arith.addf %491, %493 : vector<2x128xf32>
    %cst_184 = arith.constant 0.000000e+00 : f32
    %495 = vector.broadcast %cst_184 : f32 to vector<2x128xf32>
    %496 = arith.maximumf %494, %495 : vector<2x128xf32>
    %c2944 = arith.constant 2944 : index
    %c0_185 = arith.constant 0 : index
    %497 = vector.load %arg2[%c2944, %c0_185] : memref<3072x128xf32, #tpu.memory_space<vmem>>, vector<128x128xf32>
    %cst_186 = arith.constant dense<0.000000e+00> : vector<2x128xf32>
    %498 = tpu.matmul %496, %497, %cst_186 {dimension_numbers = #tpu.dot_dimension_numbers<[1], [0], [0], [1], [0, 0, 1, 1], [], []>} : vector<2x128xf32>, vector<128x128xf32>, vector<2x128xf32> -> vector<2x128xf32>
    %c30 = arith.constant 30 : index
    %c0_187 = arith.constant 0 : index
    %499 = vector.load %arg3[%c30, %c0_187] : memref<32x128xf32, #tpu.memory_space<vmem>>, vector<1x128xf32>
    %500 = vector.broadcast %499 : vector<1x128xf32> to vector<2x128xf32>
    %501 = arith.addf %498, %500 : vector<2x128xf32>
    %cst_188 = arith.constant -1.000000e+01 : f32
    %cst_189 = arith.constant 1.000000e+01 : f32
    %502 = vector.broadcast %cst_188 : f32 to vector<2x128xf32>
    %503 = arith.maximumf %502, %501 : vector<2x128xf32>
    %504 = vector.broadcast %cst_189 : f32 to vector<2x128xf32>
    %505 = arith.minimumf %504, %503 : vector<2x128xf32>
    %c0_i32 = arith.constant 0 : i32
    %506 = vector.broadcast %c0_i32 : i32 to vector<1x128xi32>
    %507 = arith.cmpi sge, %0, %506 : vector<1x128xi32>
    %c3_i32 = arith.constant 3 : i32
    %508 = vector.broadcast %c3_i32 : i32 to vector<1x128xi32>
    %509 = arith.cmpi slt, %0, %508 : vector<1x128xi32>
    %510 = arith.andi %507, %509 : vector<1x128xi1>
    %cst_190 = arith.constant -1.000000e+30 : f32
    %511 = vector.shape_cast %510 : vector<1x128xi1> to vector<1x128xi1>
    %512 = vector.broadcast %511 : vector<1x128xi1> to vector<2x128xi1>
    %513 = vector.broadcast %cst_190 : f32 to vector<2x128xf32>
    %514 = arith.select %512, %505, %513 : vector<2x128xi1>, vector<2x128xf32>
    %cst_191 = arith.constant dense<0xFF800000> : vector<2xf32>
    %515 = vector.multi_reduction <maximumf>, %514, %cst_191 [1] : vector<2x128xf32> to vector<2xf32>
    %516 = vector.shape_cast %515 : vector<2xf32> to vector<2x1xf32>
    %517 = vector.broadcast %516 : vector<2x1xf32> to vector<2x128xf32>
    %518 = arith.subf %514, %517 : vector<2x128xf32>
    %519 = math.exp %518 : vector<2x128xf32>
    %cst_192 = arith.constant dense<0.000000e+00> : vector<2xf32>
    %520 = vector.multi_reduction <add>, %519, %cst_192 [1] : vector<2x128xf32> to vector<2xf32>
    %521 = vector.shape_cast %520 : vector<2xf32> to vector<2x1xf32>
    %522 = vector.broadcast %521 : vector<2x1xf32> to vector<2x128xf32>
    %523 = arith.divf %519, %522 : vector<2x128xf32>
    %c3_i32_193 = arith.constant 3 : i32
    %524 = vector.broadcast %c3_i32_193 : i32 to vector<1x128xi32>
    %525 = arith.cmpi eq, %0, %524 : vector<1x128xi32>
    %cst_194 = arith.constant -1.000000e+02 : f32
    %cst_195 = arith.constant 1.000000e+02 : f32
    %526 = vector.broadcast %cst_194 : f32 to vector<2x128xf32>
    %527 = arith.maximumf %526, %501 : vector<2x128xf32>
    %528 = vector.broadcast %cst_195 : f32 to vector<2x128xf32>
    %529 = arith.minimumf %528, %527 : vector<2x128xf32>
    %cst_196 = arith.constant 0.000000e+00 : f32
    %530 = vector.shape_cast %525 : vector<1x128xi1> to vector<1x128xi1>
    %531 = vector.broadcast %530 : vector<1x128xi1> to vector<2x128xi1>
    %532 = vector.broadcast %cst_196 : f32 to vector<2x128xf32>
    %533 = arith.select %531, %529, %532 : vector<2x128xi1>, vector<2x128xf32>
    %534 = arith.addf %523, %533 : vector<2x128xf32>
    %c4_i32 = arith.constant 4 : i32
    %535 = vector.broadcast %c4_i32 : i32 to vector<1x128xi32>
    %536 = arith.cmpi sge, %0, %535 : vector<1x128xi32>
    %c7_i32_197 = arith.constant 7 : i32
    %537 = vector.broadcast %c7_i32_197 : i32 to vector<1x128xi32>
    %538 = arith.cmpi slt, %0, %537 : vector<1x128xi32>
    %539 = arith.andi %536, %538 : vector<1x128xi1>
    %cst_198 = arith.constant 0.000000e+00 : f32
    %540 = vector.shape_cast %539 : vector<1x128xi1> to vector<1x128xi1>
    %541 = vector.broadcast %540 : vector<1x128xi1> to vector<2x128xi1>
    %542 = vector.broadcast %cst_198 : f32 to vector<2x128xf32>
    %543 = arith.select %541, %501, %542 : vector<2x128xi1>, vector<2x128xf32>
    %544 = arith.addf %534, %543 : vector<2x128xf32>
    %545 = arith.addf %544, %467 : vector<2x128xf32>
    %c0_199 = arith.constant 0 : index
    %c0_200 = arith.constant 0 : index
    %546 = vector.load %arg4[%c0_199, %c0_200] : memref<2x128xf32, #tpu.memory_space<vmem>>, vector<2x128xf32>
    tpu.vector_store %arg4[%c0_199, %c0_200], %545 {strides = array<i32>} : memref<2x128xf32, #tpu.memory_space<vmem>>, vector<2x128xf32>,
    return
  }
  func.func @transform_0(%arg0: i32) -> (i32, i32, i32) {
    %c0_i32 = arith.constant 0 : i32
    %c0_i32_0 = arith.constant 0 : i32
    %c0_i32_1 = arith.constant 0 : i32
    return %arg0, %c0_i32, %c0_i32_0 : i32, i32, i32
  }
  func.func @transform_1(%arg0: i32) -> (i32, i32) {
    %c0_i32 = arith.constant 0 : i32
    %c0_i32_0 = arith.constant 0 : i32
    %c0_i32_1 = arith.constant 0 : i32
    return %c0_i32, %c0_i32_0 : i32, i32
  }
  func.func @transform_2(%arg0: i32) -> (i32, i32) {
    %c0_i32 = arith.constant 0 : i32
    %c0_i32_0 = arith.constant 0 : i32
    %c0_i32_1 = arith.constant 0 : i32
    return %c0_i32, %c0_i32_0 : i32, i32
  }
  func.func @transform_3(%arg0: i32) -> (i32, i32) {
    %c0_i32 = arith.constant 0 : i32
    %c0_i32_0 = arith.constant 0 : i32
    return %arg0, %c0_i32 : i32, i32
  }
}

</mosaic_0001>

<bundles_post_ra>
// kernel: tpu_custom_call.1
= control target key start
LH: loop header
LB: loop body
LE: loop exit
PB: predicated region body
PF: predicated region fallthrough
CT: control target
= control target key end

     0   :  { %8 = vsyncpa [#allocation3], 0  ;;  %s8153_s0 = inlined_call_operand.hbm [shape: f32[2,8,128], index: 0, kind: input, shape index: {}]   ;;  %s8154_s1 = inlined_call_operand.hbm [shape: f32[3072,128], index: 1, kind: input, shape index: {}]   ;;  %s8155_s2 = inlined_call_operand.hbm [shape: f32[32,128], index: 2, kind: input, shape index: {}]   ;;  %s8156_s3 = inlined_call_operand.hbm [shape: f32[2,128], index: 3, kind: output, shape index: {}]  }
   0x1   :  { %9 = vsyncpa [#allocation6], 0 }
   0x2   :  { %10 = vsyncpa [#allocation4], 0  ;;  %s7517_s12 = smov [#allocation5]   ;;  %s7518_s14 = smov [#allocation2]  }
   0x3   :  { %s28_s13 = sshll.u32 %s7517_s12, 4  ;;  %s16_s15 = sshll.u32 %s7518_s14, 4  ;;  %s29_s13 = int_to_ptr.vmem [resolvable:$true] %s28_s13  ;;  %s17_s15 = int_to_ptr.vmem [resolvable:$true] %s16_s15 }
   0x4   :  { %s7439_s16 = scalar_lea.vmem %s29_s13, 49152  ;;  %p7444_p1 = scmp.lt.s32.totalorder %s29_s13, %s29_s13 }
   0x5   :  { %p7440_p0 = scmp.ne.s32.totalorder %s29_s13, %s7439_s16  ;;  %p7445_p2 = scmp.lt.s32.totalorder %s7439_s16, %s7439_s16 }
   0x7   :  { %p7446_p3 = por %p7445_p2, %p7444_p1 }
   0x9   :  { %p7447_p4 = pnand %p7446_p3, %p7440_p0 }
   0xb   :  { %7450 = shalt.err (!%p7447_p4)
}
   0xc   :  { %s7519_s17 = smov 128   ;;  %s7520_s18 = smov 8  }
   0xd   :  { %34 = dma.hbm_to_vmem [thread:$0]  %s8154_s1, 49152, %s29_s13, [#allocation6], %s7519_s17, %s7519_s17, %s7520_s18  }
   0xe   :  { %s7459_s21 = scalar_lea.vmem %s17_s15, 256  ;;  %p7464_p6 = scmp.lt.s32.totalorder %s17_s15, %s17_s15 }
   0xf   :  { %p7460_p5 = scmp.ne.s32.totalorder %s17_s15, %s7459_s21  ;;  %p7465_p7 = scmp.lt.s32.totalorder %s7459_s21, %s7459_s21 }
  0x11   :  { %p7466_p8 = por %p7465_p7, %p7464_p6 }
  0x13   :  { %p7467_p9 = pnand %p7466_p8, %p7460_p5 }
  0x15   :  { %7470 = shalt.err (!%p7467_p9)
}
  0x16   :  { %22 = dma.hbm_to_vmem [thread:$0]  %s8153_s0, 256, %s17_s15, [#allocation3], %s7519_s17, %s7519_s17, %s7520_s18  }
  0x17   :  { %s7521_s24 = smov [#allocation7]  }
  0x18   :  { %s40_s25 = sshll.u32 %s7521_s24, 4  ;;  %s41_s25 = int_to_ptr.vmem [resolvable:$true] %s40_s25 }
  0x19   :  { %s7479_s26 = scalar_lea.vmem %s41_s25, 512  ;;  %p7484_p11 = scmp.lt.s32.totalorder %s41_s25, %s41_s25 }
  0x1a   :  { %p7480_p10 = scmp.ne.s32.totalorder %s41_s25, %s7479_s26  ;;  %p7485_p12 = scmp.lt.s32.totalorder %s7479_s26, %s7479_s26 }
  0x1c   :  { %p7486_p13 = por %p7485_p12, %p7484_p11 }
  0x1e   :  { %p7487_p0 = pnand %p7486_p13, %p7480_p10 }
  0x20   :  { %7490 = shalt.err (!%p7487_p0)
}
  0x21   :  { %46 = dma.hbm_to_vmem [thread:$0]  %s8155_s2, 512, %s41_s25, [#allocation6], %s7519_s17, %s7519_s17, %s7520_s18  }
  0x22   :  { %7511 = dma.done.wait [#allocation3], 256  }
  0x23   :  { %7512 = vsyncadd [#allocation3], 4294967040 }
  0x24   :  { %7513 = dma.done.wait [#allocation6], 49664  }
  0x25   :  { %7514 = vsyncadd [#allocation6], 4294917632  ;;  %v58_v0 = vld [vmem:[#allocation2] sm:$0xff]  ;;  %v59_v1 = vld [vmem:[#allocation2 + $0x8] sm:$0xff]  ;;  %v56_v7 = vlaneseq  ;;  %vm7523_vm3 = vmmov 0   ;;  %s7524_s0 = smov 96  }
  0x26   :  { %vm60_vm0 = vcmp.ne.f32.partialorder %v58_v0, %v58_v0  ;;  %vm61_vm1 = vcmp.ne.f32.partialorder %v59_v1, %v59_v1  ;;  %v128_v6 = vld [vmem:[#allocation5 + $0x78] sm:$0xff]  ;;  %v127_v19 = vld [vmem:[#allocation5 + $0x70] sm:$0xff]  ;;  %v126_v20 = vld [vmem:[#allocation5 + $0x68] sm:$0xff]  ;;  %vm887_vm4 = vcmask 64512   ;;  %s7525_s2 = smov 64   ;;  %s7526_s28 = smov 88  }
  0x27   :  { %v62_v2 = vsel %vm60_vm0, 0.0, %v58_v0  ;;  %v63_v3 = vsel %vm61_vm1, 0.0, %v59_v1  ;;  %6350 = vmatprep.subr.mxu0 %v128_v6  ;;  %v7565_v8 = vand.u32 127, %v56_v7  ;;  %v125_v21 = vld [vmem:[#allocation5 + $0x60] sm:$0xff]  ;;  %v124_v22 = vld [vmem:[#allocation5 + $0x58] sm:$0xff]  ;;  %v123_v23 = vld [vmem:[#allocation5 + $0x50] sm:$0xff] }
  0x28   :  { %v5774_v4 = vclamps-f32 %v62_v2, 3.4028235e+38  ;;  %v5775_v5 = vclamps-f32 %v63_v3, 3.4028235e+38  ;;  %6351 = vmatpush3.msra.mxu0 %v128_v6  ;;  %v122_v24 = vld [vmem:[#allocation5 + $0x48] sm:$0xff]  ;;  %v121_v25 = vld [vmem:[#allocation5 + $0x40] sm:$0xff] }
  0x29   :  { %vm76_vm2 = vcmp.lt.s32.totalorder %v7565_v8, 16  ;;  %6352 = vmatprep.subr.mxu0 %v127_v19  ;;  %v120_v26 = vld [vmem:[#allocation5 + $0x38] sm:$0xff]  ;;  %v119_v27 = vld [vmem:[#allocation5 + $0x30] sm:$0xff]  ;;  %v118_v28 = vld [vmem:[#allocation5 + $0x28] sm:$0xff]  ;;  %s7527_s29 = smov 120   ;;  %s7528_s30 = smov 56  }
  0x2a   :  { %70 = vadd.xlane.f32.xlu0 %v5774_v4  ;;  %6353 = vmatpush3.msra.mxu0 %v127_v19  ;;  %v117_v29 = vld [vmem:[#allocation5 + $0x20] sm:$0xff]  ;;  %v116_v30 = vld [vmem:[#allocation5 + $0x18] sm:$0xff]  ;;  %v115_v31 = vld [vmem:[#allocation5 + $0x10] sm:$0xff]  ;;  %s7529_s4 = smov 80   ;;  %s7530_s5 = smov 112   ;;  %vm2561_vm5 = vcmp.lt.s32.totalorder %v7565_v8, 32 }
  0x2b   :  { %6354 = vmatprep.subr.mxu0 %v126_v20  ;;  %v114_v32 = vld [vmem:[#allocation5 + $0x8] sm:$0xff]  ;;  %v113_v33 = vld [vmem:[#allocation5] sm:$0xff]  ;;  %v226_v34 = vld [vmem:[#allocation5 + $0xf8] sm:$0xff]  ;;  %s7531_s6 = smov 48   ;;  %s7532_s7 = smov 72   ;;  %vm4903_vm6 = vcmask 1041409  }
  0x2c   :  { %6355 = vmatpush3.msra.mxu0 %v126_v20  ;;  %v324_v35 = vld [vmem:[#allocation5 + $0x178] sm:$0xff]  ;;  %6385 = vmatprep.subr.mxu1 %v226_v34  ;;  %v225_v36 = vld [vmem:[#allocation5 + $0xf0] sm:$0xff]  ;;  %v224_v37 = vld [vmem:[#allocation5 + $0xe8] sm:$0xff]  ;;  %s7533_s8 = smov 104   ;;  %s7534_s9 = smov 40   ;;  %vm5160_vm7 = vcmp.ge.s32.totalorder %v7565_v8, 7 }
  0x2d   :  { %6356 = vmatprep.subr.mxu0 %v125_v21  ;;  %6386 = vmatpush3.msra.mxu1 %v226_v34  ;;  %v223_v38 = vld [vmem:[#allocation5 + $0xe0] sm:$0xff]  ;;  %v222_v39 = vld [vmem:[#allocation5 + $0xd8] sm:$0xff]  ;;  %v221_v40 = vld [vmem:[#allocation5 + $0xd0] sm:$0xff]  ;;  %vm5161_vm8 = vcmp.lt.s32.totalorder %v7565_v8, 11  ;;  %vm5166_vm10 = vcmask 1041408   ;;  %vm5726_vm11 = vcmp.lt.s32.totalorder %v7565_v8, 3 }
  0x2e   :  { %72 = vadd.xlane.f32.xlu0 %v5775_v5  ;;  %6357 = vmatpush3.msra.mxu0 %v125_v21  ;;  %v220_v41 = vld [vmem:[#allocation5 + $0xc8] sm:$0xff]  ;;  %v219_v42 = vld [vmem:[#allocation5 + $0xc0] sm:$0xff]  ;;  %v218_v43 = vld [vmem:[#allocation5 + $0xb8] sm:$0xff]  ;;  %vm5749_vm12 = vcmp.ge.s32.totalorder %v7565_v8, 4  ;;  %vm5750_vm13 = vcmp.lt.s32.totalorder %v7565_v8, 7  ;;  %vm5742_vm14 = vcmp.eq.s32.totalorder %v7565_v8, 3 }
  0x2f   :  { %6358 = vmatprep.subr.mxu0 %v124_v22  ;;  %6387 = vmatprep.subr.mxu1 %v225_v36  ;;  %v217_v44 = vld [vmem:[#allocation5 + $0xb0] sm:$0xff]  ;;  %v216_v45 = vld [vmem:[#allocation5 + $0xa8] sm:$0xff]  ;;  %v215_v46 = vld [vmem:[#allocation5 + $0xa0] sm:$0xff]  ;;  %s7535_s10 = smov [#allocation8]  }
  0x30   :  { %6359 = vmatpush3.msra.mxu0 %v124_v22  ;;  %6388 = vmatpush3.msra.mxu1 %v225_v36  ;;  %v5776_v54 = vld [vmem:[#allocation7] ss:$0 sm:$0xff]  ;;  %v5777_v56 = vld [vmem:[#allocation7 + $0x1] ss:$0 sm:$0xff]  ;;  %v323_v1 = vld [vmem:[#allocation5 + $0x170] sm:$0xff]  ;;  %s5764_s11 = sshll.u32 %s7535_s10, 4  ;;  %s5765_s11 = int_to_ptr.vmem [resolvable:$true] %s5764_s11 }
  0x31   :  { %6360 = vmatprep.subr.mxu0 %v123_v23  ;;  %6389 = vmatprep.subr.mxu1 %v224_v37  ;;  %v322_v2 = vld [vmem:[#allocation5 + $0x168] sm:$0xff]  ;;  %v321_v3 = vld [vmem:[#allocation5 + $0x160] sm:$0xff]  ;;  %v422_v21 = vld [vmem:[#allocation5 + $0x1f8] sm:$0xff]  ;;  %s7491_s12 = scalar_lea.vmem %s5765_s11, 32  ;;  %p7496_p2 = scmp.lt.s32.totalorder %s5765_s11, %s5765_s11 }
  0x32   :  { %6361 = vmatpush3.msra.mxu0 %v123_v23  ;;  %6390 = vmatpush3.msra.mxu1 %v224_v37  ;;  %v318_v6 = vld [vmem:[#allocation5 + $0x148] sm:$0xff]  ;;  %v317_v7 = vld [vmem:[#allocation5 + $0x140] sm:$0xff]  ;;  %v536_v22 = vld [vmem:[#allocation5 + $0x2f8] sm:$0xff]  ;;  %p7492_p1 = scmp.ne.s32.totalorder %s5765_s11, %s7491_s12  ;;  %p7497_p3 = scmp.lt.s32.totalorder %s7491_s12, %s7491_s12 }
  0x33   :  { %6362 = vmatprep.subr.mxu0 %v122_v24  ;;  %6391 = vmatprep.subr.mxu1 %v223_v38  ;;  %v211_v19 = vld [vmem:[#allocation5 + $0x80] sm:$0xff]  ;;  %v418_v36 = vld [vmem:[#allocation5 + $0x1d8] sm:$0xff]  ;;  %vm5162_vm9 = vmand %vm5160_vm7, %vm5161_vm8 }
  0x34   :  { %6363 = vmatpush3.msra.mxu0 %v122_v24  ;;  %6392 = vmatpush3.msra.mxu1 %v223_v38  ;;  %v309_v20 = vld [vmem:[#allocation5 + $0x100] sm:$0xff]  ;;  %v532_v37 = vld [vmem:[#allocation5 + $0x2d8] sm:$0xff]  ;;  %v417_v38 = vld [vmem:[#allocation5 + $0x1d0] sm:$0xff]  ;;  %p7498_p4 = por %p7497_p3, %p7496_p2 }
  0x35   :  { %6364 = vmatprep.subr.mxu0 %v121_v25  ;;  %6393 = vmatprep.subr.mxu1 %v222_v39  ;;  %v5780_v23 = vld [vmem:[#allocation7 + $0x2] ss:$0 sm:$0xff]  ;;  %vm5751_vm15 = vmand %vm5749_vm12, %vm5750_vm13 }
  0x36   :  { %6365 = vmatpush3.msra.mxu0 %v121_v25  ;;  %6394 = vmatpush3.msra.mxu1 %v222_v39  ;;  %v419_v34 = vld [vmem:[#allocation5 + $0x1e0] sm:$0xff]  ;;  %v531_v39 = vld [vmem:[#allocation5 + $0x2d0] sm:$0xff]  ;;  %p7499_p5 = pnand %p7498_p4, %p7492_p1 }
  0x37   :  { %6366 = vmatprep.subr.mxu0 %v120_v26  ;;  %6395 = vmatprep.subr.mxu1 %v221_v40 }
  0x38   :  { %6367 = vmatpush3.msra.mxu0 %v120_v26  ;;  %6396 = vmatpush3.msra.mxu1 %v221_v40  ;;  %v416_v40 = vld [vmem:[#allocation5 + $0x1c8] sm:$0xff] }
  0x39   :  { %6368 = vmatprep.subr.mxu0 %v119_v27  ;;  %6397 = vmatprep.subr.mxu1 %v220_v41 }
  0x3a   :  { %6369 = vmatpush3.msra.mxu0 %v119_v27  ;;  %6398 = vmatpush3.msra.mxu1 %v220_v41  ;;  %v530_v41 = vld [vmem:[#allocation5 + $0x2c8] sm:$0xff] }
  0x3b   :  { %6370 = vmatprep.subr.mxu0 %v118_v28  ;;  %6399 = vmatprep.subr.mxu1 %v219_v42 }
  0x3c   :  { %6371 = vmatpush3.msra.mxu0 %v118_v28  ;;  %6400 = vmatpush3.msra.mxu1 %v219_v42  ;;  %v415_v42 = vld [vmem:[#allocation5 + $0x1c0] sm:$0xff] }
  0x3d   :  { %6372 = vmatprep.subr.mxu0 %v117_v29  ;;  %6401 = vmatprep.subr.mxu1 %v218_v43 }
  0x3e   :  { %6373 = vmatpush3.msra.mxu0 %v117_v29  ;;  %6402 = vmatpush3.msra.mxu1 %v218_v43  ;;  %v529_v43 = vld [vmem:[#allocation5 + $0x2c0] sm:$0xff] }
  0x3f   :  { %6374 = vmatprep.subr.mxu0 %v116_v30  ;;  %6403 = vmatprep.subr.mxu1 %v217_v44 }
  0x40   :  { %6375 = vmatpush3.msra.mxu0 %v116_v30  ;;  %6404 = vmatpush3.msra.mxu1 %v217_v44  ;;  %v421_v30 = vld [vmem:[#allocation5 + $0x1f0] sm:$0xff]  ;;  %v414_v44 = vld [vmem:[#allocation5 + $0x1b8] sm:$0xff] }
  0x41   :  { %6376 = vmatprep.subr.mxu0 %v115_v31  ;;  %6405 = vmatprep.subr.mxu1 %v216_v45 }
  0x42   :  { %6377 = vmatpush3.msra.mxu0 %v115_v31  ;;  %6406 = vmatpush3.msra.mxu1 %v216_v45  ;;  %v535_v31 = vld [vmem:[#allocation5 + $0x2f0] sm:$0xff]  ;;  %v528_v45 = vld [vmem:[#allocation5 + $0x2b8] sm:$0xff] }
  0x43   :  { %6378 = vmatprep.subr.mxu0 %v114_v32  ;;  %6407 = vmatprep.subr.mxu1 %v215_v46 }
  0x44   :  { %6379 = vmatpush3.msra.mxu0 %v114_v32  ;;  %6408 = vmatpush3.msra.mxu1 %v215_v46  ;;  %v420_v32 = vld [vmem:[#allocation5 + $0x1e8] sm:$0xff]  ;;  %v413_v46 = vld [vmem:[#allocation5 + $0x1b0] sm:$0xff] }
  0x45   :  { %6380 = vmatprep.subr.mxu0 %v113_v33 }
  0x46   :  { %6381 = vmatpush3.msra.mxu0 %v113_v33  ;;  %v534_v33 = vld [vmem:[#allocation5 + $0x2e8] sm:$0xff] }
  0x47   :  { %6420 = vmatprep.subr.mxu0 %v324_v35 }
  0xb3   :  { %v71_v9 = vpop.xlane.xlu0 %70 }
  0xb4   :  { %v74_v10 = vmul.f32 0.0625, %v71_v9  ;;  %v316_v9 = vld [vmem:[#allocation5 + $0x138] sm:$0xff] }
  0xb6   :  { %v77_v11 = vsub.f32 %v5774_v4, %v74_v10  ;;  %v320_v4 = vld [vmem:[#allocation5 + $0x158] sm:$0xff]  ;;  %v315_v10 = vld [vmem:[#allocation5 + $0x130] sm:$0xff] }
  0xb7   :  { %v73_v12 = vpop.xlane.xlu0 %72 }
  0xb8   :  { %v75_v13 = vmul.f32 0.0625, %v73_v12  ;;  %v7568_v14 = vsel %vm76_vm2, %v77_v11, 0.0  ;;  %v314_v11 = vld [vmem:[#allocation5 + $0x128] sm:$0xff]  ;;  %v313_v12 = vld [vmem:[#allocation5 + $0x120] sm:$0xff] }
  0xb9   :  { %v83_v15 = vmul.f32 %v7568_v14, %v7568_v14 }
  0xba   :  { %v78_v16 = vsub.f32 %v5775_v5, %v75_v13  ;;  %v319_v5 = vld [vmem:[#allocation5 + $0x150] sm:$0xff]  ;;  %v214_v13 = vld [vmem:[#allocation5 + $0x98] sm:$0xff] }
  0xbb   :  { %85 = vadd.xlane.f32.xlu1 %v83_v15  ;;  %6409 = vmatprep.subr.mxu1 %v214_v13  ;;  %v213_v15 = vld [vmem:[#allocation5 + $0x90] sm:$0xff] }
  0xbc   :  { %v7572_v17 = vsel %vm76_vm2, %v78_v16, 0.0  ;;  %6410 = vmatpush3.msra.mxu1 %v214_v13  ;;  %v311_v16 = vld [vmem:[#allocation5 + $0x110] sm:$0xff] }
  0xbd   :  { %v84_v18 = vmul.f32 %v7572_v17, %v7572_v17  ;;  %6411 = vmatprep.subr.mxu1 %v213_v15  ;;  %v519_v13 = vld [vmem:[#allocation5 + $0x270] sm:$0xff] }
  0xbe   :  { %6412 = vmatpush3.msra.mxu1 %v213_v15  ;;  %v518_v15 = vld [vmem:[#allocation5 + $0x268] sm:$0xff] }
  0xbf   :  { %87 = vadd.xlane.f32.xlu1 %v84_v18  ;;  %v310_v18 = vld [vmem:[#allocation5 + $0x108] sm:$0xff] }
 0x144   :  { %v86_v47 = vpop.xlane.xlu1 %85 }
 0x145   :  { %v89_v48 = vmul.f32 0.0625, %v86_v47  ;;  %v527_v47 = vld [vmem:[#allocation5 + $0x2b0] sm:$0xff] }
 0x147   :  { %v91_v49 = vadd.f32 1e-05, %v89_v48  ;;  %v412_v48 = vld [vmem:[#allocation5 + $0x1a8] sm:$0xff] }
 0x148   :  { %v88_v50 = vpop.xlane.xlu1 %87 }
 0x149   :  { %7339 = vrsqrt.f32 %v91_v49  ;;  %v90_v51 = vmul.f32 0.0625, %v88_v50  ;;  %v526_v49 = vld [vmem:[#allocation5 + $0x2a8] sm:$0xff]  ;;  %v411_v50 = vld [vmem:[#allocation5 + $0x1a0] sm:$0xff] }
 0x14b   :  { %v92_v52 = vadd.f32 1e-05, %v90_v51  ;;  %v525_v51 = vld [vmem:[#allocation5 + $0x2a0] sm:$0xff] }
 0x14d   :  { %7341 = vrsqrt.f32 %v92_v52  ;;  %v410_v52 = vld [vmem:[#allocation5 + $0x198] sm:$0xff] }
 0x156   :  { %v7340_v53 = vpop.eup %7339 }
 0x157   :  { %v95_v55 = vmul.f32 %v7340_v53, %v7568_v14  ;;  %v312_v14 = vld [vmem:[#allocation5 + $0x118] sm:$0xff] }
 0x158   :  { %v524_v53 = vld [vmem:[#allocation5 + $0x298] sm:$0xff] }
 0x159   :  { %v101_v57 = vmul.f32 %v5776_v54, %v95_v55  ;;  %v523_v55 = vld [vmem:[#allocation5 + $0x290] sm:$0xff] }
 0x15a   :  { %v7342_v58 = vpop.eup %7341 }
 0x15b   :  { %v96_v59 = vmul.f32 %v7342_v58, %v7572_v17  ;;  %v107_v60 = vadd.f32 %v5777_v56, %v101_v57  ;;  %v212_v17 = vld [vmem:[#allocation5 + $0x88] sm:$0xff]  ;;  %v407_v58 = vld [vmem:[#allocation5 + $0x180] sm:$0xff] }
 0x15c   :  { %6413 = vmatprep.subr.mxu1 %v212_v17  ;;  %v522_v57 = vld [vmem:[#allocation5 + $0x288] sm:$0xff] }
 0x15d   :  { %v102_v61 = vmul.f32 %v5776_v54, %v96_v59  ;;  %v5778_v62 = vclamps-f32 %v107_v60, 10.0  ;;  %6414 = vmatpush3.msra.mxu1 %v212_v17  ;;  %v409_v54 = vld [vmem:[#allocation5 + $0x190] sm:$0xff]  ;;  %v521_v59 = vld [vmem:[#allocation5 + $0x280] sm:$0xff]  ;;  %v520_v60 = vld [vmem:[#allocation5 + $0x278] sm:$0xff] }
 0x15e   :  { %6415 = vmatprep.subr.mxu1 %v211_v19  ;;  %v517_v17 = vld [vmem:[#allocation5 + $0x260] sm:$0xff] }
 0x15f   :  { %v108_v63 = vadd.f32 %v5777_v56, %v102_v61  ;;  %6382 = vmatprep.mubr.f32.mxu0 %v5778_v62  ;;  %6416 = vmatpush3.msra.mxu1 %v211_v19  ;;  %v408_v56 = vld [vmem:[#allocation5 + $0x188] sm:$0xff]  ;;  %v702_v61 = vld [vmem:[#allocation5 + $0x378] sm:$0xff]  ;;  %v5781_v62 = vld [vmem:[#allocation7 + $0x3] ss:$0 sm:$0xff] }
 0x160   :  { %6455 = vmatprep.subr.mxu1 %v422_v21  ;;  %v516_v19 = vld [vmem:[#allocation5 + $0x258] sm:$0xff] }
 0x161   :  { %v5779_v0 = vclamps-f32 %v108_v63, 10.0  ;;  %v5782_v63 = vld [vmem:[#allocation7 + $0x4] ss:$0 sm:$0xff] }
 0x163   :  { %6383 = vmatmul.mubr.f32.vlgmr.msra.gmra.mxu0 %v5779_v0 }
 0x164   :  { %6421 = vmatpush3.msra.mxu0 %v324_v35  ;;  %v533_v35 = vld [vmem:[#allocation5 + $0x2e0] sm:$0xff] }
 0x165   :  { %6422 = vmatprep.subr.mxu0 %v323_v1 }
 0x166   :  { %6423 = vmatpush3.msra.mxu0 %v323_v1 }
 0x167   :  { %6424 = vmatprep.subr.mxu0 %v322_v2 }
 0x168   :  { %6425 = vmatpush3.msra.mxu0 %v322_v2 }
 0x169   :  { %6426 = vmatprep.subr.mxu0 %v321_v3 }
 0x16a   :  { %6427 = vmatpush3.msra.mxu0 %v321_v3 }
 0x16b   :  { %6428 = vmatprep.subr.mxu0 %v320_v4 }
 0x16c   :  { %6429 = vmatpush3.msra.mxu0 %v320_v4 }
 0x16d   :  { %6430 = vmatprep.subr.mxu0 %v319_v5 }
 0x16e   :  { %6431 = vmatpush3.msra.mxu0 %v319_v5 }
 0x16f   :  { %6432 = vmatprep.subr.mxu0 %v318_v6 }
 0x170   :  { %6433 = vmatpush3.msra.mxu0 %v318_v6 }
 0x171   :  { %6434 = vmatprep.subr.mxu0 %v317_v7 }
 0x172   :  { %6435 = vmatpush3.msra.mxu0 %v317_v7 }
 0x173   :  { %6436 = vmatprep.subr.mxu0 %v316_v9 }
 0x174   :  { %6437 = vmatpush3.msra.mxu0 %v316_v9 }
 0x175   :  { %6438 = vmatprep.subr.mxu0 %v315_v10 }
 0x176   :  { %6439 = vmatpush3.msra.mxu0 %v315_v10 }
 0x177   :  { %6440 = vmatprep.subr.mxu0 %v314_v11 }
 0x178   :  { %6441 = vmatpush3.msra.mxu0 %v314_v11 }
 0x179   :  { %6442 = vmatprep.subr.mxu0 %v313_v12 }
 0x17a   :  { %6443 = vmatpush3.msra.mxu0 %v313_v12 }
 0x17b   :  { %6444 = vmatprep.subr.mxu0 %v312_v14 }
 0x17c   :  { %6445 = vmatpush3.msra.mxu0 %v312_v14  ;;  %v701_v14 = vld [vmem:[#allocation5 + $0x370] sm:$0xff] }
 0x17d   :  { %6446 = vmatprep.subr.mxu0 %v311_v16 }
 0x17e   :  { %6447 = vmatpush3.msra.mxu0 %v311_v16  ;;  %v700_v16 = vld [vmem:[#allocation5 + $0x368] sm:$0xff] }
 0x17f   :  { %6448 = vmatprep.subr.mxu0 %v310_v18 }
 0x180   :  { %6449 = vmatpush3.msra.mxu0 %v310_v18  ;;  %v699_v18 = vld [vmem:[#allocation5 + $0x360] sm:$0xff] }
 0x181   :  { %6450 = vmatprep.subr.mxu0 %v309_v20 }
 0x182   :  { %6451 = vmatpush3.msra.mxu0 %v309_v20  ;;  %v698_v20 = vld [vmem:[#allocation5 + $0x358] sm:$0xff] }
 0x183   :  { %6490 = vmatprep.subr.mxu0 %v536_v22 }
 0x223   :  { %v6384_v24 = vpop.f32.mrf.mxu0 }
 0x224   :  { %v206_v25 = vadd.f32 %v6384_v24, %v5780_v23  ;;  %v696_v24 = vld [vmem:[#allocation5 + $0x348] sm:$0xff] }
 0x225   :  { %v200_v26 = vpop.f32.mrf.mxu0 }
 0x226   :  { %v201_v27 = vadd.f32 %v5780_v23, %v200_v26  ;;  %v7580_v29 = vmax.f32 %v206_v25, 0.0  ;;  %v514_v23 = vld [vmem:[#allocation5 + $0x248] sm:$0xff]  ;;  %v513_v25 = vld [vmem:[#allocation5 + $0x240] sm:$0xff] }
 0x227   :  { %v695_v26 = vld [vmem:[#allocation5 + $0x340] sm:$0xff] }
 0x228   :  { %v7578_v28 = vmax.f32 %v201_v27, 0.0  ;;  %v512_v27 = vld [vmem:[#allocation5 + $0x238] sm:$0xff] }
 0x22a   :  { %6417 = vmatprep.mubr.f32.mxu1 %v7578_v28  ;;  %6452 = vmatprep.mubr.f32.mxu0 %v7578_v28 }
 0x22b   :  { %6418 = vmatmul.mubr.f32.vlgmr.msra.gmra.mxu1 %v7580_v29  ;;  %6453 = vmatmul.mubr.f32.vlgmr.msra.gmra.mxu0 %v7580_v29 }
 0x22c   :  { %6456 = vmatpush3.msra.mxu1 %v422_v21  ;;  %6491 = vmatpush3.msra.mxu0 %v536_v22  ;;  %v515_v21 = vld [vmem:[#allocation5 + $0x250] sm:$0xff] }
 0x22d   :  { %6457 = vmatprep.subr.mxu1 %v421_v30  ;;  %6492 = vmatprep.subr.mxu0 %v535_v31  ;;  %v697_v22 = vld [vmem:[#allocation5 + $0x350] sm:$0xff] }
 0x22e   :  { %6458 = vmatpush3.msra.mxu1 %v421_v30  ;;  %6493 = vmatpush3.msra.mxu0 %v535_v31  ;;  %v511_v30 = vld [vmem:[#allocation5 + $0x230] sm:$0xff] }
 0x22f   :  { %6459 = vmatprep.subr.mxu1 %v420_v32  ;;  %6494 = vmatprep.subr.mxu0 %v534_v33  ;;  %v693_v31 = vld [vmem:[#allocation5 + $0x330] sm:$0xff] }
 0x230   :  { %6460 = vmatpush3.msra.mxu1 %v420_v32  ;;  %6495 = vmatpush3.msra.mxu0 %v534_v33  ;;  %v510_v32 = vld [vmem:[#allocation5 + $0x228] sm:$0xff] }
 0x231   :  { %6461 = vmatprep.subr.mxu1 %v419_v34  ;;  %6496 = vmatprep.subr.mxu0 %v533_v35  ;;  %v692_v33 = vld [vmem:[#allocation5 + $0x328] sm:$0xff] }
 0x232   :  { %6462 = vmatpush3.msra.mxu1 %v419_v34  ;;  %6497 = vmatpush3.msra.mxu0 %v533_v35  ;;  %v509_v34 = vld [vmem:[#allocation5 + $0x220] sm:$0xff] }
 0x233   :  { %6463 = vmatprep.subr.mxu1 %v418_v36  ;;  %6498 = vmatprep.subr.mxu0 %v532_v37  ;;  %v691_v35 = vld [vmem:[#allocation5 + $0x320] sm:$0xff] }
 0x234   :  { %6464 = vmatpush3.msra.mxu1 %v418_v36  ;;  %6499 = vmatpush3.msra.mxu0 %v532_v37  ;;  %v508_v36 = vld [vmem:[#allocation5 + $0x218] sm:$0xff]  ;;  %v507_v37 = vld [vmem:[#allocation5 + $0x210] sm:$0xff] }
 0x235   :  { %6465 = vmatprep.subr.mxu1 %v417_v38  ;;  %6500 = vmatprep.subr.mxu0 %v531_v39 }
 0x236   :  { %6466 = vmatpush3.msra.mxu1 %v417_v38  ;;  %6501 = vmatpush3.msra.mxu0 %v531_v39  ;;  %v506_v38 = vld [vmem:[#allocation5 + $0x208] sm:$0xff]  ;;  %v505_v39 = vld [vmem:[#allocation5 + $0x200] sm:$0xff] }
 0x237   :  { %6467 = vmatprep.subr.mxu1 %v416_v40  ;;  %6502 = vmatprep.subr.mxu0 %v530_v41 }
 0x238   :  { %6468 = vmatpush3.msra.mxu1 %v416_v40  ;;  %6503 = vmatpush3.msra.mxu0 %v530_v41  ;;  %v690_v40 = vld [vmem:[#allocation5 + $0x318] sm:$0xff]  ;;  %v689_v41 = vld [vmem:[#allocation5 + $0x310] sm:$0xff] }
 0x239   :  { %6469 = vmatprep.subr.mxu1 %v415_v42  ;;  %6504 = vmatprep.subr.mxu0 %v529_v43 }
 0x23a   :  { %6470 = vmatpush3.msra.mxu1 %v415_v42  ;;  %6505 = vmatpush3.msra.mxu0 %v529_v43  ;;  %v688_v42 = vld [vmem:[#allocation5 + $0x308] sm:$0xff]  ;;  %v687_v43 = vld [vmem:[#allocation5 + $0x300] sm:$0xff] }
 0x23b   :  { %6471 = vmatprep.subr.mxu1 %v414_v44  ;;  %6506 = vmatprep.subr.mxu0 %v528_v45 }
 0x23c   :  { %6472 = vmatpush3.msra.mxu1 %v414_v44  ;;  %6507 = vmatpush3.msra.mxu0 %v528_v45  ;;  %v802_v44 = vld [vmem:[#allocation5 + $0x3f8] sm:$0xff]  ;;  %v801_v45 = vld [vmem:[#allocation5 + $0x3f0] sm:$0xff] }
 0x23d   :  { %6473 = vmatprep.subr.mxu1 %v413_v46  ;;  %6508 = vmatprep.subr.mxu0 %v527_v47 }
 0x23e   :  { %6474 = vmatpush3.msra.mxu1 %v413_v46  ;;  %6509 = vmatpush3.msra.mxu0 %v527_v47  ;;  %v800_v46 = vld [vmem:[#allocation5 + $0x3e8] sm:$0xff]  ;;  %v798_v47 = vld [vmem:[#allocation5 + $0x3d8] sm:$0xff] }
 0x23f   :  { %6475 = vmatprep.subr.mxu1 %v412_v48  ;;  %6510 = vmatprep.subr.mxu0 %v526_v49 }
 0x240   :  { %6476 = vmatpush3.msra.mxu1 %v412_v48  ;;  %6511 = vmatpush3.msra.mxu0 %v526_v49  ;;  %v797_v48 = vld [vmem:[#allocation5 + $0x3d0] sm:$0xff]  ;;  %v796_v49 = vld [vmem:[#allocation5 + $0x3c8] sm:$0xff] }
 0x241   :  { %6477 = vmatprep.subr.mxu1 %v411_v50  ;;  %6512 = vmatprep.subr.mxu0 %v525_v51 }
 0x242   :  { %6478 = vmatpush3.msra.mxu1 %v411_v50  ;;  %6513 = vmatpush3.msra.mxu0 %v525_v51  ;;  %v795_v50 = vld [vmem:[#allocation5 + $0x3c0] sm:$0xff]  ;;  %v794_v51 = vld [vmem:[#allocation5 + $0x3b8] sm:$0xff] }
 0x243   :  { %6479 = vmatprep.subr.mxu1 %v410_v52  ;;  %6514 = vmatprep.subr.mxu0 %v524_v53 }
 0x244   :  { %6480 = vmatpush3.msra.mxu1 %v410_v52  ;;  %6515 = vmatpush3.msra.mxu0 %v524_v53  ;;  %v793_v52 = vld [vmem:[#allocation5 + $0x3b0] sm:$0xff]  ;;  %v792_v53 = vld [vmem:[#allocation5 + $0x3a8] sm:$0xff] }
 0x245   :  { %6481 = vmatprep.subr.mxu1 %v409_v54  ;;  %6516 = vmatprep.subr.mxu0 %v523_v55 }
 0x246   :  { %6482 = vmatpush3.msra.mxu1 %v409_v54  ;;  %6517 = vmatpush3.msra.mxu0 %v523_v55  ;;  %v791_v54 = vld [vmem:[#allocation5 + $0x3a0] sm:$0xff] }
 0x247   :  { %6483 = vmatprep.subr.mxu1 %v408_v56  ;;  %6518 = vmatprep.subr.mxu0 %v522_v57  ;;  %v5783_v55 = vld [vmem:[#allocation7 + $0x5] ss:$0 sm:$0xff] }
 0x248   :  { %6484 = vmatpush3.msra.mxu1 %v408_v56  ;;  %6519 = vmatpush3.msra.mxu0 %v522_v57 }
 0x249   :  { %6485 = vmatprep.subr.mxu1 %v407_v58  ;;  %6520 = vmatprep.subr.mxu0 %v521_v59 }
 0x24a   :  { %6486 = vmatpush3.msra.mxu1 %v407_v58  ;;  %6521 = vmatpush3.msra.mxu0 %v521_v59 }
 0x24b   :  { %6525 = vmatprep.subr.mxu1 %v520_v60  ;;  %6560 = vmatprep.subr.mxu0 %v702_v61 }
 0x2eb   :  { %v6419_v0 = vpop.f32.mrf.mxu1  ;;  %v6454_v1 = vpop.f32.mrf.mxu0 }
 0x2ec   :  { %v304_v2 = vadd.f32 %v6419_v0, %v5781_v62  ;;  %v402_v3 = vadd.f32 %v6454_v1, %v5782_v63  ;;  %v788_v0 = vld [vmem:[#allocation5 + $0x388] sm:$0xff]  ;;  %v787_v1 = vld [vmem:[#allocation5 + $0x380] sm:$0xff] }
 0x2ed   :  { %v298_v4 = vpop.f32.mrf.mxu1  ;;  %v396_v5 = vpop.f32.mrf.mxu0 }
 0x2ee   :  { %v299_v6 = vadd.f32 %v5781_v62, %v298_v4  ;;  %v397_v7 = vadd.f32 %v5782_v63, %v396_v5  ;;  %v308_v11 = vmax.f32 %v304_v2, 0.0  ;;  %v406_v12 = vmax.f32 %v402_v3, 0.0  ;;  %v790_v62 = vld [vmem:[#allocation5 + $0x398] sm:$0xff]  ;;  %v789_v63 = vld [vmem:[#allocation5 + $0x390] sm:$0xff] }
 0x2f0   :  { %v307_v9 = vmax.f32 %v299_v6, 0.0  ;;  %v405_v10 = vmax.f32 %v397_v7, 0.0 }
 0x2f2   :  { %6487 = vmatprep.mubr.f32.mxu1 %v405_v10  ;;  %6522 = vmatprep.mubr.f32.mxu0 %v307_v9 }
 0x2f3   :  { %6488 = vmatmul.mubr.f32.vlgmr.msra.gmra.mxu1 %v406_v12  ;;  %6523 = vmatmul.mubr.f32.vlgmr.msra.gmra.mxu0 %v308_v11  ;;  %v5784_v12 = vld [vmem:[#allocation7 + $0x6] ss:$0 sm:$0xff] }
 0x2f4   :  { %6526 = vmatpush3.msra.mxu1 %v520_v60  ;;  %6557 = vmatprep.mubr.f32.mxu1 %v7578_v28  ;;  %v694_v28 = vld [vmem:[#allocation5 + $0x338] sm:$0xff] }
 0x2f5   :  { %6527 = vmatprep.subr.mxu1 %v519_v13  ;;  %6561 = vmatpush3.msra.mxu0 %v702_v61 }
 0x2f6   :  { %6528 = vmatpush3.msra.mxu1 %v519_v13  ;;  %6562 = vmatprep.subr.mxu0 %v701_v14 }
 0x2f7   :  { %6529 = vmatprep.subr.mxu1 %v518_v15  ;;  %6563 = vmatpush3.msra.mxu0 %v701_v14 }
 0x2f8   :  { %6530 = vmatpush3.msra.mxu1 %v518_v15  ;;  %6564 = vmatprep.subr.mxu0 %v700_v16 }
 0x2f9   :  { %6531 = vmatprep.subr.mxu1 %v517_v17  ;;  %6565 = vmatpush3.msra.mxu0 %v700_v16  ;;  %v7522_v16 = vmov 0.0  }
 0x2fa   :  { %6532 = vmatpush3.msra.mxu1 %v517_v17  ;;  %6566 = vmatprep.subr.mxu0 %v699_v18  ;;  %v5785_v17 = vld [vmem:[#allocation7 + $0x7] ss:$0 sm:$0xff] }
 0x2fb   :  { %6533 = vmatprep.subr.mxu1 %v516_v19  ;;  %6567 = vmatpush3.msra.mxu0 %v699_v18 }
 0x2fc   :  { %6534 = vmatpush3.msra.mxu1 %v516_v19  ;;  %6568 = vmatprep.subr.mxu0 %v698_v20 }
 0x2fd   :  { %6535 = vmatprep.subr.mxu1 %v515_v21  ;;  %6569 = vmatpush3.msra.mxu0 %v698_v20 }
 0x2fe   :  { %6536 = vmatpush3.msra.mxu1 %v515_v21  ;;  %6570 = vmatprep.subr.mxu0 %v697_v22 }
 0x2ff   :  { %6537 = vmatprep.subr.mxu1 %v514_v23  ;;  %6571 = vmatpush3.msra.mxu0 %v697_v22 }
 0x300   :  { %6538 = vmatpush3.msra.mxu1 %v514_v23  ;;  %6572 = vmatprep.subr.mxu0 %v696_v24 }
 0x301   :  { %6539 = vmatprep.subr.mxu1 %v513_v25  ;;  %6573 = vmatpush3.msra.mxu0 %v696_v24 }
 0x302   :  { %6540 = vmatpush3.msra.mxu1 %v513_v25  ;;  %6574 = vmatprep.subr.mxu0 %v695_v26 }
 0x303   :  { %6541 = vmatprep.subr.mxu1 %v512_v27  ;;  %6575 = vmatpush3.msra.mxu0 %v695_v26 }
 0x304   :  { %6542 = vmatpush3.msra.mxu1 %v512_v27  ;;  %6576 = vmatprep.subr.mxu0 %v694_v28 }
 0x305   :  { %6543 = vmatprep.subr.mxu1 %v511_v30  ;;  %6577 = vmatpush3.msra.mxu0 %v694_v28 }
 0x306   :  { %6544 = vmatpush3.msra.mxu1 %v511_v30  ;;  %6578 = vmatprep.subr.mxu0 %v693_v31 }
 0x307   :  { %6545 = vmatprep.subr.mxu1 %v510_v32  ;;  %6579 = vmatpush3.msra.mxu0 %v693_v31 }
 0x308   :  { %6546 = vmatpush3.msra.mxu1 %v510_v32  ;;  %6580 = vmatprep.subr.mxu0 %v692_v33 }
 0x309   :  { %6547 = vmatprep.subr.mxu1 %v509_v34  ;;  %6581 = vmatpush3.msra.mxu0 %v692_v33 }
 0x30a   :  { %6548 = vmatpush3.msra.mxu1 %v509_v34  ;;  %6582 = vmatprep.subr.mxu0 %v691_v35 }
 0x30b   :  { %6549 = vmatprep.subr.mxu1 %v508_v36  ;;  %6583 = vmatpush3.msra.mxu0 %v691_v35 }
 0x30c   :  { %6550 = vmatpush3.msra.mxu1 %v508_v36  ;;  %6584 = vmatprep.subr.mxu0 %v690_v40 }
 0x30d   :  { %6551 = vmatprep.subr.mxu1 %v507_v37  ;;  %6585 = vmatpush3.msra.mxu0 %v690_v40 }
 0x30e   :  { %6552 = vmatpush3.msra.mxu1 %v507_v37  ;;  %6586 = vmatprep.subr.mxu0 %v689_v41 }
 0x30f   :  { %6553 = vmatprep.subr.mxu1 %v506_v38  ;;  %6587 = vmatpush3.msra.mxu0 %v689_v41 }
 0x310   :  { %6554 = vmatpush3.msra.mxu1 %v506_v38  ;;  %6588 = vmatprep.subr.mxu0 %v688_v42 }
 0x311   :  { %6555 = vmatprep.subr.mxu1 %v505_v39  ;;  %6589 = vmatpush3.msra.mxu0 %v688_v42 }
 0x312   :  { %6556 = vmatpush3.msra.mxu1 %v505_v39  ;;  %6590 = vmatprep.subr.mxu0 %v687_v43 }
 0x313   :  { %6558 = vmatmul.mubr.f32.vlgmr.msra.gmra.mxu1 %v7580_v29  ;;  %6591 = vmatpush3.msra.mxu0 %v687_v43  ;;  %v799_v29 = vld [vmem:[#allocation5 + $0x3e0] sm:$0xff] }
 0x314   :  { %6595 = vmatprep.subr.mxu1 %v802_v44  ;;  %6670 = vmatprep.subr.mxu0 %v7522_v16 }
 0x315   :  { %6596 = vmatpush3.msra.mxu1 %v802_v44 }
 0x316   :  { %6597 = vmatprep.subr.mxu1 %v801_v45 }
 0x317   :  { %6598 = vmatpush3.msra.mxu1 %v801_v45 }
 0x318   :  { %6599 = vmatprep.subr.mxu1 %v800_v46 }
 0x319   :  { %6600 = vmatpush3.msra.mxu1 %v800_v46 }
 0x31a   :  { %6601 = vmatprep.subr.mxu1 %v799_v29 }
 0x31b   :  { %6602 = vmatpush3.msra.mxu1 %v799_v29 }
 0x31c   :  { %6603 = vmatprep.subr.mxu1 %v798_v47 }
 0x31d   :  { %6604 = vmatpush3.msra.mxu1 %v798_v47 }
 0x31e   :  { %6605 = vmatprep.subr.mxu1 %v797_v48 }
 0x31f   :  { %6606 = vmatpush3.msra.mxu1 %v797_v48 }
 0x320   :  { %6607 = vmatprep.subr.mxu1 %v796_v49 }
 0x321   :  { %6608 = vmatpush3.msra.mxu1 %v796_v49 }
 0x322   :  { %6609 = vmatprep.subr.mxu1 %v795_v50 }
 0x323   :  { %6610 = vmatpush3.msra.mxu1 %v795_v50  ;;  %v1215_v50 = vld [vmem:[#allocation5 + $0x400] sm:$0xff] }
 0x324   :  { %6611 = vmatprep.subr.mxu1 %v794_v51 }
 0x325   :  { %6612 = vmatpush3.msra.mxu1 %v794_v51 }
 0x326   :  { %6613 = vmatprep.subr.mxu1 %v793_v52 }
 0x327   :  { %6614 = vmatpush3.msra.mxu1 %v793_v52 }
 0x328   :  { %6615 = vmatprep.subr.mxu1 %v792_v53 }
 0x329   :  { %6616 = vmatpush3.msra.mxu1 %v792_v53 }
 0x32a   :  { %6617 = vmatprep.subr.mxu1 %v791_v54 }
 0x32b   :  { %6618 = vmatpush3.msra.mxu1 %v791_v54 }
 0x32c   :  { %6619 = vmatprep.subr.mxu1 %v790_v62 }
 0x32d   :  { %6620 = vmatpush3.msra.mxu1 %v790_v62 }
 0x32e   :  { %6621 = vmatprep.subr.mxu1 %v789_v63 }
 0x32f   :  { %6622 = vmatpush3.msra.mxu1 %v789_v63 }
 0x330   :  { %6623 = vmatprep.subr.mxu1 %v788_v0 }
 0x331   :  { %6624 = vmatpush3.msra.mxu1 %v788_v0 }
 0x332   :  { %6625 = vmatprep.subr.mxu1 %v787_v1 }
 0x333   :  { %6626 = vmatpush3.msra.mxu1 %v787_v1 }
 0x334   :  { %6630 = vmatprep.subr.mxu1 %v7522_v16 }
 0x3b3   :  { %v6489_v56 = vpop.f32.mrf.mxu1  ;;  %v6524_v2 = vpop.f32.mrf.mxu0 }
 0x3b4   :  { %v500_v57 = vadd.f32 %v6489_v56, %v5783_v55 }
 0x3b5   :  { %v494_v58 = vpop.f32.mrf.mxu1  ;;  %v603_v4 = vpop.f32.mrf.mxu0 }
 0x3b6   :  { %v495_v59 = vadd.f32 %v5783_v55, %v494_v58  ;;  %v504_v61 = vmax.f32 %v500_v57, 0.0 }
 0x3b8   :  { %v503_v60 = vmax.f32 %v495_v59, 0.0 }
 0x3ba   :  { %6592 = vmatprep.mubr.f32.mxu0 %v503_v60 }
 0x3bb   :  { %6593 = vmatmul.mubr.f32.vlgmr.msra.gmra.mxu0 %v504_v61 }
 0x3bc   :  { %6672 = vmatprep.mubr.msk.f32.mxu0 %vm7523_vm3, %v7522_v16 }
 0x3d3   :  { %v6559_v3 = vpop.f32.mrf.mxu1 }
 0x3d4   :  { %v684_v6 = vadd.f32 %v6559_v3, %v6524_v2 }
 0x3d5   :  { %v678_v5 = vpop.f32.mrf.mxu1 }
 0x3d6   :  { %v679_v9 = vadd.f32 %v678_v5, %v603_v4 }
 0x47b   :  { %v6594_v7 = vpop.f32.mrf.mxu0 }
 0x47c   :  { %v779_v10 = vadd.f32 %v6594_v7, %v684_v6 }
 0x47d   :  { %v769_v11 = vpop.f32.mrf.mxu0 }
 0x47e   :  { %v778_v13 = vadd.f32 %v769_v11, %v679_v9  ;;  %v7590_v15 = vadd.f32 %v5784_v12, %v779_v10 }
 0x480   :  { %v7588_v14 = vadd.f32 %v5784_v12, %v778_v13 }
 0x482   :  { %6627 = vmatprep.mubr.f32.mxu1 %v7588_v14 }
 0x483   :  { %6628 = vmatmul.mubr.f32.vlgmr.msra.gmra.mxu1 %v7590_v15 }
 0x484   :  { %6632 = vmatprep.mubr.msk.f32.mxu1 %vm7523_vm3, %v7522_v16 }
 0x543   :  { %v6629_v18 = vpop.f32.mrf.mxu1 }
 0x544   :  { %v7600_v19 = vadd.f32 %v6629_v18, %v5785_v17 }
 0x545   :  { %v874_v20 = vpop.f32.mrf.mxu1 }
 0x546   :  { %v7602_v21 = vadd.f32 %v5785_v17, %v874_v20  ;;  %963 = vrot.lane.b32.xlu1 %v7600_v19, %s7524_s0 }
 0x548   :  { %885 = vrot.lane.b32.xlu0 %v7602_v21, %s7524_s0 }
 0x5b8   :  { %v964_v23 = vpop.permute.xlu1 %963 }
 0x5ba   :  { %v886_v22 = vpop.permute.xlu0 %885 }
 0x5bb   :  { %6631 = vmatpush3.xpose.msk.msra.mxu1 %vm887_vm4, %v886_v22 }
 0x5bc   :  { %6635 = vmatprep.subr.mxu1 %v7522_v16 }
 0x5be   :  { %6633 = vmatmul.mubr.msk.f32.vlgmr.msra.gmra.mxu1 %vm887_vm4, %v7602_v21 }
 0x5bf   :  { %6636 = vmatpush3.xpose.msk.msra.mxu1 %vm887_vm4, %v964_v23  ;;  %6637 = vmatprep.mubr.msk.f32.mxu1 %vm7523_vm3, %v7522_v16 }
 0x5c0   :  { %6640 = vmatprep.subr.mxu1 %v7522_v16 }
 0x5c2   :  { %6638 = vmatmul.mubr.msk.f32.vlgmr.msra.gmra.mxu1 %vm887_vm4, %v7600_v19 }
 0x5c3   :  { %6642 = vmatprep.mubr.msk.f32.mxu1 %vm7523_vm3, %v7522_v16 }
 0x67e   :  { %v958_v24 = vpop.f32.mrf.mxu1 }
 0x67f   :  { %v1039_v25 = vmul.f32 0.35355338, %v958_v24 }
 0x680   :  { %v6634_v26 = vpop.f32.mrf.mxu1 }
 0x681   :  { %v1041_v27 = vsel %vm887_vm4, %v1039_v25, -inf }
 0x682   :  { %1042 = vmax.xlane.f32.xlu1 %v1041_v27  ;;  %v1035_v28 = vpop.f32.mrf.mxu1 }
 0x683   :  { %v1040_v30 = vmul.f32 0.35355338, %v1035_v28 }
 0x684   :  { %v6639_v31 = vpop.f32.mrf.mxu1 }
 0x685   :  { %v1044_v32 = vsel %vm887_vm4, %v1040_v30, -inf }
 0x686   :  { %1045 = vmax.xlane.f32.xlu0 %v1044_v32  ;;  %v1635_v32 = vld [vmem:[#allocation5 + $0x408] sm:$0xff] }
 0x70b   :  { %v1043_v33 = vpop.xlane.xlu1 %1042 }
 0x70c   :  { %v1047_v34 = vsub.f32 %v1039_v25, %v1043_v33 }
 0x70e   :  { %v1049_v35 = vmul.f32 1.442695, %v1047_v34 }
 0x70f   :  { %v1046_v36 = vpop.xlane.xlu0 %1045 }
 0x710   :  { %7343 = vpow2.f32 %v1049_v35  ;;  %v1048_v37 = vsub.f32 %v1040_v30, %v1046_v36 }
 0x712   :  { %v1051_v38 = vmul.f32 1.442695, %v1048_v37 }
 0x714   :  { %7345 = vpow2.f32 %v1051_v38 }
 0x71d   :  { %v7344_v39 = vpop.eup %7343 }
 0x71e   :  { %v1053_v40 = vsel %vm887_vm4, %v7344_v39, 0.0 }
 0x71f   :  { %1054 = vadd.xlane.f32.xlu0 %v1053_v40 }
 0x721   :  { %v7346_v41 = vpop.eup %7345 }
 0x722   :  { %v1056_v42 = vsel %vm887_vm4, %v7346_v41, 0.0 }
 0x723   :  { %1057 = vadd.xlane.f32.xlu1 %v1056_v42 }
 0x734   :  { %1139 = vrot.lane.b32.xlu1 %v7600_v19, %s7525_s2 }
 0x735   :  { %1063 = vrot.lane.b32.xlu0 %v7602_v21, %s7525_s2 }
 0x738   :  { %1305 = vrot.lane.b32.xlu1 %v7602_v21, %s7526_s28 }
 0x739   :  { %1383 = vrot.lane.b32.xlu0 %v7600_v19, %s7526_s28 }
 0x73c   :  { %1303 = vrot.lane.b32.xlu1 %v7602_v21, %s7527_s29 }
 0x740   :  { %1381 = vrot.lane.b32.xlu1 %v7600_v19, %s7527_s29 }
 0x7a8   :  { %v1055_v43 = vpop.xlane.xlu0 %1054 }
 0x7a9   :  { %7347 = vrcp.f32 %v1055_v43 }
 0x7ac   :  { %v1058_v44 = vpop.xlane.xlu1 %1057  ;;  %v1064_v45 = vpop.permute.xlu0 %1063 }
 0x7ad   :  { %7349 = vrcp.f32 %v1058_v44  ;;  %6641 = vmatpush3.msra.mxu1 %v1064_v45 }
 0x7ae   :  { %6645 = vmatprep.subr.mxu1 %v7522_v16 }
 0x7b0   :  { %v1140_v47 = vpop.permute.xlu1 %1139  ;;  %v1384_v57 = vpop.permute.xlu0 %1383 }
 0x7b4   :  { %v1306_v51 = vpop.permute.xlu1 %1305 }
 0x7b6   :  { %v7348_v46 = vpop.eup %7347 }
 0x7b7   :  { %v1061_v29 = vmul.f32 %v7348_v46, %v7344_v39 }
 0x7b8   :  { %v1304_v55 = vpop.permute.xlu1 %1303 }
 0x7b9   :  { %6643 = vmatmul.mubr.msk.f32.vlgmr.msra.gmra.mxu1 %vm887_vm4, %v1061_v29 }
 0x7ba   :  { %v7350_v48 = vpop.eup %7349  ;;  %6646 = vmatpush3.msra.mxu1 %v1140_v47  ;;  %6647 = vmatprep.mubr.msk.f32.mxu1 %vm7523_vm3, %v7522_v16  ;;  %v5794_v47 = vld [vmem:[#allocation7 + $0x8] ss:$0 sm:$0xff] }
 0x7bb   :  { %v1062_v49 = vmul.f32 %v7350_v48, %v7346_v41  ;;  %6650 = vmatprep.subr.mxu1 %v1215_v50 }
 0x7bc   :  { %v1382_v58 = vpop.permute.xlu1 %1381 }
 0x7bd   :  { %6648 = vmatmul.mubr.msk.f32.vlgmr.msra.gmra.mxu1 %vm887_vm4, %v1062_v49 }
 0x7be   :  { %6651 = vmatpush3.msra.mxu1 %v1215_v50 }
 0x7bf   :  { %6655 = vmatprep.subr.mxu1 %v7522_v16 }
 0x879   :  { %v1135_v52 = vpop.f32.mrf.mxu1 }
 0x87a   :  { %6652 = vmatprep.mubr.msk.f32.mxu1 %vm887_vm4, %v1135_v52 }
 0x87b   :  { %v6644_v53 = vpop.f32.mrf.mxu1 }
 0x87d   :  { %v1211_v54 = vpop.f32.mrf.mxu1 }
 0x87e   :  { %6653 = vmatmul.mubr.msk.f32.vlgmr.msra.gmra.mxu1 %vm887_vm4, %v1211_v54 }
 0x87f   :  { %6656 = vmatpush3.xpose.msk.msra.mxu1 %vm887_vm4, %v1306_v51  ;;  %v6649_v56 = vpop.f32.mrf.mxu1  ;;  %6657 = vmatprep.mubr.msk.f32.mxu1 %vm7523_vm3, %v7522_v16 }
 0x880   :  { %6660 = vmatprep.subr.mxu1 %v7522_v16 }
 0x882   :  { %6658 = vmatmul.mubr.msk.f32.vlgmr.msra.gmra.mxu1 %vm887_vm4, %v1304_v55 }
 0x883   :  { %6661 = vmatpush3.xpose.msk.msra.mxu1 %vm887_vm4, %v1384_v57  ;;  %6662 = vmatprep.mubr.msk.f32.mxu1 %vm7523_vm3, %v7522_v16 }
 0x884   :  { %6665 = vmatprep.subr.mxu1 %v7522_v16 }
 0x886   :  { %6663 = vmatmul.mubr.msk.f32.vlgmr.msra.gmra.mxu1 %vm887_vm4, %v1382_v58 }
 0x887   :  { %6667 = vmatprep.mubr.msk.f32.mxu1 %vm7523_vm3, %v7522_v16 }
 0x93e   :  { %v7656_v59 = vpop.f32.mrf.mxu1 }
 0x93f   :  { %v1302_v48 = vadd.f32 %v7656_v59, %v5794_v47 }
 0x940   :  { %v7658_v60 = vpop.f32.mrf.mxu1 }
 0x941   :  { %v1301_v50 = vadd.f32 %v5794_v47, %v7658_v60 }
 0x942   :  { %v1377_v61 = vpop.f32.mrf.mxu1 }
 0x943   :  { %v1459_v62 = vmul.f32 0.35355338, %v1377_v61 }
 0x944   :  { %v6659_v63 = vpop.f32.mrf.mxu1 }
 0x945   :  { %v1461_v0 = vsel %vm887_vm4, %v1459_v62, -inf }
 0x946   :  { %1462 = vmax.xlane.f32.xlu0 %v1461_v0  ;;  %v1455_v1 = vpop.f32.mrf.mxu1 }
 0x947   :  { %v1460_v2 = vmul.f32 0.35355338, %v1455_v1 }
 0x948   :  { %v6664_v3 = vpop.f32.mrf.mxu1 }
 0x949   :  { %v1464_v4 = vsel %vm887_vm4, %v1460_v2, -inf }
 0x94a   :  { %1465 = vmax.xlane.f32.xlu1 %v1464_v4 }
 0x95b   :  { %1559 = vrot.lane.b32.xlu1 %v7600_v19, %s7528_s30 }
 0x95f   :  { %1721 = vrot.lane.b32.xlu1 %v7602_v21, %s7529_s4 }
 0x963   :  { %1799 = vrot.lane.b32.xlu1 %v7600_v19, %s7529_s4 }
 0x967   :  { %1797 = vrot.lane.b32.xlu1 %v7600_v19, %s7530_s5 }
 0x9cf   :  { %v1463_v5 = vpop.xlane.xlu0 %1462 }
 0x9d0   :  { %v1467_v6 = vsub.f32 %v1459_v62, %v1463_v5 }
 0x9d2   :  { %v1469_v7 = vmul.f32 1.442695, %v1467_v6 }
 0x9d3   :  { %v1466_v9 = vpop.xlane.xlu1 %1465 }
 0x9d4   :  { %7351 = vpow2.f32 %v1469_v7  ;;  %v1468_v10 = vsub.f32 %v1460_v2, %v1466_v9 }
 0x9d6   :  { %v1471_v11 = vmul.f32 1.442695, %v1468_v10  ;;  %v2051_v10 = vld [vmem:[#allocation5 + $0x410] sm:$0xff] }
 0x9d7   :  { %v1560_v12 = vpop.permute.xlu1 %1559 }
 0x9d8   :  { %7353 = vpow2.f32 %v1471_v11  ;;  %6671 = vmatpush3.msra.mxu0 %v1560_v12 }
 0x9d9   :  { %6680 = vmatprep.subr.mxu0 %v7522_v16 }
 0x9db   :  { %v1722_v30 = vpop.permute.xlu1 %1721 }
 0x9df   :  { %v1800_v34 = vpop.permute.xlu1 %1799 }
 0x9e1   :  { %v7352_v13 = vpop.eup %7351 }
 0x9e2   :  { %v1473_v17 = vsel %vm887_vm4, %v7352_v13, 0.0 }
 0x9e3   :  { %1474 = vadd.xlane.f32.xlu0 %v1473_v17  ;;  %v1798_v38 = vpop.permute.xlu1 %1797 }
 0x9e5   :  { %v7354_v18 = vpop.eup %7353 }
 0x9e6   :  { %v1476_v20 = vsel %vm887_vm4, %v7354_v18, 0.0 }
 0x9e7   :  { %1477 = vadd.xlane.f32.xlu0 %v1476_v20 }
 0x9fd   :  { %1483 = vrot.lane.b32.xlu0 %v7602_v21, %s7528_s30 }
 0xa01   :  { %1719 = vrot.lane.b32.xlu0 %v7602_v21, %s7530_s5 }
 0xa6c   :  { %v1475_v22 = vpop.xlane.xlu0 %1474 }
 0xa6d   :  { %7355 = vrcp.f32 %v1475_v22 }
 0xa70   :  { %v1478_v23 = vpop.xlane.xlu0 %1477 }
 0xa71   :  { %7357 = vrcp.f32 %v1478_v23 }
 0xa74   :  { %v1484_v24 = vpop.permute.xlu0 %1483 }
 0xa75   :  { %6666 = vmatpush3.msra.mxu1 %v1484_v24 }
 0xa76   :  { %6675 = vmatprep.subr.mxu1 %v1635_v32 }
 0xa78   :  { %v1720_v31 = vpop.permute.xlu0 %1719 }
 0xa7a   :  { %v7356_v25 = vpop.eup %7355 }
 0xa7b   :  { %v1481_v26 = vmul.f32 %v7356_v25, %v7352_v13 }
 0xa7d   :  { %6668 = vmatmul.mubr.msk.f32.vlgmr.msra.gmra.mxu1 %vm887_vm4, %v1481_v26 }
 0xa7e   :  { %v7358_v27 = vpop.eup %7357  ;;  %6676 = vmatpush3.msra.mxu1 %v1635_v32 }
 0xa7f   :  { %v1482_v28 = vmul.f32 %v7358_v27, %v7354_v18  ;;  %6685 = vmatprep.subr.mxu1 %v7522_v16 }
 0xa81   :  { %6673 = vmatmul.mubr.msk.f32.vlgmr.msra.gmra.mxu0 %vm887_vm4, %v1482_v28 }
 0xa82   :  { %6681 = vmatpush3.xpose.msk.msra.mxu0 %vm887_vm4, %v1722_v30  ;;  %6682 = vmatprep.mubr.msk.f32.mxu0 %vm7523_vm3, %v7522_v16 }
 0xa83   :  { %6690 = vmatprep.subr.mxu0 %v7522_v16 }
 0xa85   :  { %6683 = vmatmul.mubr.msk.f32.vlgmr.msra.gmra.mxu0 %vm887_vm4, %v1720_v31 }
 0xa86   :  { %6692 = vmatprep.mubr.msk.f32.mxu0 %vm7523_vm3, %v7522_v16 }
 0xb3d   :  { %v1555_v33 = vpop.f32.mrf.mxu1 }
 0xb3e   :  { %6677 = vmatprep.mubr.msk.f32.mxu1 %vm887_vm4, %v1555_v33 }
 0xb3f   :  { %v6669_v35 = vpop.f32.mrf.mxu1 }
 0xb41   :  { %v1631_v36 = vpop.f32.mrf.mxu0 }
 0xb42   :  { %6678 = vmatmul.mubr.msk.f32.vlgmr.msra.gmra.mxu1 %vm887_vm4, %v1631_v36 }
 0xb43   :  { %6686 = vmatpush3.xpose.msk.msra.mxu1 %vm887_vm4, %v1800_v34  ;;  %v6674_v37 = vpop.f32.mrf.mxu0  ;;  %6687 = vmatprep.mubr.msk.f32.mxu1 %vm7523_vm3, %v7522_v16 }
 0xb44   :  { %6695 = vmatprep.subr.mxu1 %v7522_v16 }
 0xb45   :  { %v1793_v39 = vpop.f32.mrf.mxu0 }
 0xb46   :  { %v1875_v40 = vmul.f32 0.35355338, %v1793_v39  ;;  %6688 = vmatmul.mubr.msk.f32.vlgmr.msra.gmra.mxu1 %vm887_vm4, %v1798_v38 }
 0xb47   :  { %v6684_v41 = vpop.f32.mrf.mxu0  ;;  %6697 = vmatprep.mubr.msk.f32.mxu1 %vm7523_vm3, %v7522_v16 }
 0xb48   :  { %v1877_v42 = vsel %vm887_vm4, %v1875_v40, -inf }
 0xb49   :  { %1878 = vmax.xlane.f32.xlu0 %v1877_v42 }
 0xbd2   :  { %v1879_v43 = vpop.xlane.xlu0 %1878 }
 0xbd3   :  { %v1883_v44 = vsub.f32 %v1875_v40, %v1879_v43 }
 0xbd5   :  { %v1885_v45 = vmul.f32 1.442695, %v1883_v44 }
 0xbd7   :  { %7359 = vpow2.f32 %v1885_v45 }
 0xbe4   :  { %v7360_v46 = vpop.eup %7359 }
 0xbe5   :  { %v1889_v29 = vsel %vm887_vm4, %v7360_v46, 0.0 }
 0xbe6   :  { %1890 = vadd.xlane.f32.xlu0 %v1889_v29 }
 0xc02   :  { %v6679_v49 = vpop.f32.mrf.mxu1 }
 0xc03   :  { %v7700_v51 = vadd.f32 %v6679_v49, %v1302_v48 }
 0xc04   :  { %v1708_v52 = vpop.f32.mrf.mxu1 }
 0xc05   :  { %v7702_v53 = vadd.f32 %v1708_v52, %v1301_v50 }
 0xc06   :  { %v1871_v54 = vpop.f32.mrf.mxu1 }
 0xc07   :  { %v1876_v55 = vmul.f32 0.35355338, %v1871_v54 }
 0xc08   :  { %v6689_v56 = vpop.f32.mrf.mxu1 }
 0xc09   :  { %v1880_v57 = vsel %vm887_vm4, %v1876_v55, -inf }
 0xc0a   :  { %1881 = vmax.xlane.f32.xlu1 %v1880_v57 }
 0xc1b   :  { %1975 = vrot.lane.b32.xlu1 %v7600_v19, %s7531_s6 }
 0xc1f   :  { %2137 = vrot.lane.b32.xlu1 %v7602_v21, %s7532_s7 }
 0xc23   :  { %2215 = vrot.lane.b32.xlu1 %v7600_v19, %s7532_s7 }
 0xc27   :  { %2213 = vrot.lane.b32.xlu1 %v7600_v19, %s7533_s8 }
 0xc6f   :  { %v1891_v0 = vpop.xlane.xlu0 %1890 }
 0xc93   :  { %v1882_v58 = vpop.xlane.xlu1 %1881 }
 0xc94   :  { %v1884_v59 = vsub.f32 %v1876_v55, %v1882_v58 }
 0xc96   :  { %v1887_v60 = vmul.f32 1.442695, %v1884_v59 }
 0xc97   :  { %v1976_v61 = vpop.permute.xlu1 %1975 }
 0xc98   :  { %7361 = vpow2.f32 %v1887_v60  ;;  %6696 = vmatpush3.msra.mxu1 %v1976_v61  ;;  %v2609_v61 = vld [vmem:[#allocation5 + $0x4f8] sm:$0xff] }
 0xc99   :  { %6705 = vmatprep.subr.mxu1 %v7522_v16  ;;  %7363 = vrcp.f32 %v1891_v0 }
 0xc9b   :  { %v2138_v7 = vpop.permute.xlu1 %2137 }
 0xc9f   :  { %v2216_v13 = vpop.permute.xlu1 %2215 }
 0xca3   :  { %v2214_v20 = vpop.permute.xlu1 %2213 }
 0xca5   :  { %v7362_v62 = vpop.eup %7361 }
 0xca6   :  { %v1892_v63 = vsel %vm887_vm4, %v7362_v62, 0.0  ;;  %v7364_v2 = vpop.eup %7363 }
 0xca7   :  { %1893 = vadd.xlane.f32.xlu0 %v1892_v63  ;;  %v1897_v4 = vmul.f32 %v7364_v2, %v7360_v46  ;;  %v2607_v63 = vld [vmem:[#allocation5 + $0x4e8] sm:$0xff] }
 0xcbd   :  { %1899 = vrot.lane.b32.xlu0 %v7602_v21, %s7531_s6 }
 0xcc1   :  { %2135 = vrot.lane.b32.xlu0 %v7602_v21, %s7533_s8 }
 0xd30   :  { %v1894_v1 = vpop.xlane.xlu0 %1893 }
 0xd31   :  { %7365 = vrcp.f32 %v1894_v1 }
 0xd34   :  { %v1900_v3 = vpop.permute.xlu0 %1899 }
 0xd35   :  { %6691 = vmatpush3.msra.mxu0 %v1900_v3 }
 0xd36   :  { %6693 = vmatmul.mubr.msk.f32.vlgmr.msra.gmra.mxu0 %vm887_vm4, %v1897_v4  ;;  %6700 = vmatprep.subr.mxu0 %v2051_v10 }
 0xd37   :  { %6701 = vmatpush3.msra.mxu0 %v2051_v10  ;;  %v2605_v10 = vld [vmem:[#allocation5 + $0x4d8] sm:$0xff] }
 0xd38   :  { %v2136_v9 = vpop.permute.xlu0 %2135  ;;  %6710 = vmatprep.subr.mxu0 %v7522_v16 }
 0xd3e   :  { %v7366_v5 = vpop.eup %7365 }
 0xd3f   :  { %v1898_v6 = vmul.f32 %v7366_v5, %v7362_v62  ;;  %v2608_v62 = vld [vmem:[#allocation5 + $0x4f0] sm:$0xff] }
 0xd41   :  { %6698 = vmatmul.mubr.msk.f32.vlgmr.msra.gmra.mxu1 %vm887_vm4, %v1898_v6 }
 0xd42   :  { %6706 = vmatpush3.xpose.msk.msra.mxu1 %vm887_vm4, %v2138_v7  ;;  %6707 = vmatprep.mubr.msk.f32.mxu1 %vm7523_vm3, %v7522_v16 }
 0xd43   :  { %6715 = vmatprep.subr.mxu1 %v7522_v16 }
 0xd45   :  { %6708 = vmatmul.mubr.msk.f32.vlgmr.msra.gmra.mxu1 %vm887_vm4, %v2136_v9  ;;  %v2606_v9 = vld [vmem:[#allocation5 + $0x4e0] sm:$0xff] }
 0xd46   :  { %6717 = vmatprep.mubr.msk.f32.mxu1 %vm7523_vm3, %v7522_v16 }
 0xdf6   :  { %v1971_v11 = vpop.f32.mrf.mxu0 }
 0xdf7   :  { %6702 = vmatprep.mubr.msk.f32.mxu0 %vm887_vm4, %v1971_v11  ;;  %v2604_v11 = vld [vmem:[#allocation5 + $0x4d0] sm:$0xff] }
 0xdf8   :  { %v6694_v12 = vpop.f32.mrf.mxu0 }
 0xdf9   :  { %v2603_v12 = vld [vmem:[#allocation5 + $0x4c8] sm:$0xff] }
 0xe01   :  { %v2047_v17 = vpop.f32.mrf.mxu1 }
 0xe02   :  { %6703 = vmatmul.mubr.msk.f32.vlgmr.msra.gmra.mxu0 %vm887_vm4, %v2047_v17  ;;  %v2601_v17 = vld [vmem:[#allocation5 + $0x4b8] sm:$0xff] }
 0xe03   :  { %6711 = vmatpush3.xpose.msk.msra.mxu0 %vm887_vm4, %v2216_v13  ;;  %v6699_v18 = vpop.f32.mrf.mxu1  ;;  %6712 = vmatprep.mubr.msk.f32.mxu0 %vm7523_vm3, %v7522_v16  ;;  %v2602_v13 = vld [vmem:[#allocation5 + $0x4c0] sm:$0xff] }
 0xe04   :  { %6720 = vmatprep.subr.mxu0 %v7522_v16  ;;  %v2600_v18 = vld [vmem:[#allocation5 + $0x4b0] sm:$0xff] }
 0xe05   :  { %v2209_v22 = vpop.f32.mrf.mxu1 }
 0xe06   :  { %v2291_v23 = vmul.f32 0.35355338, %v2209_v22  ;;  %6713 = vmatmul.mubr.msk.f32.vlgmr.msra.gmra.mxu0 %vm887_vm4, %v2214_v20  ;;  %v2599_v20 = vld [vmem:[#allocation5 + $0x4a8] sm:$0xff]  ;;  %v2598_v22 = vld [vmem:[#allocation5 + $0x4a0] sm:$0xff] }
 0xe07   :  { %v6709_v24 = vpop.f32.mrf.mxu1  ;;  %6722 = vmatprep.mubr.msk.f32.mxu0 %vm7523_vm3, %v7522_v16 }
 0xe08   :  { %v2293_v25 = vsel %vm887_vm4, %v2291_v23, -inf  ;;  %v2596_v24 = vld [vmem:[#allocation5 + $0x490] sm:$0xff] }
 0xe09   :  { %2294 = vmax.xlane.f32.xlu0 %v2293_v25  ;;  %v2595_v25 = vld [vmem:[#allocation5 + $0x488] sm:$0xff] }
 0xe92   :  { %v2295_v26 = vpop.xlane.xlu0 %2294 }
 0xe93   :  { %v2299_v27 = vsub.f32 %v2291_v23, %v2295_v26  ;;  %v2597_v23 = vld [vmem:[#allocation5 + $0x498] sm:$0xff]  ;;  %v2594_v26 = vld [vmem:[#allocation5 + $0x480] sm:$0xff] }
 0xe95   :  { %v2301_v28 = vmul.f32 1.442695, %v2299_v27  ;;  %v2707_v27 = vld [vmem:[#allocation5 + $0x578] sm:$0xff] }
 0xe97   :  { %7367 = vpow2.f32 %v2301_v28  ;;  %v2706_v28 = vld [vmem:[#allocation5 + $0x570] sm:$0xff] }
 0xea4   :  { %v7368_v30 = vpop.eup %7367 }
 0xea5   :  { %v2305_v31 = vsel %vm887_vm4, %v7368_v30, 0.0 }
 0xea6   :  { %2306 = vadd.xlane.f32.xlu0 %v2305_v31  ;;  %v2704_v31 = vld [vmem:[#allocation5 + $0x560] sm:$0xff] }
 0xec2   :  { %v6704_v32 = vpop.f32.mrf.mxu0 }
 0xec3   :  { %v2134_v33 = vadd.f32 %v6704_v32, %v7700_v51  ;;  %v2467_v51 = vld [vmem:[#allocation5 + $0x418] sm:$0xff] }
 0xec4   :  { %v2124_v34 = vpop.f32.mrf.mxu0  ;;  %v2703_v32 = vld [vmem:[#allocation5 + $0x558] sm:$0xff] }
 0xec5   :  { %v2133_v35 = vadd.f32 %v2124_v34, %v7702_v53  ;;  %v2701_v34 = vld [vmem:[#allocation5 + $0x548] sm:$0xff] }
 0xec6   :  { %v2287_v36 = vpop.f32.mrf.mxu0 }
 0xec7   :  { %v2292_v37 = vmul.f32 0.35355338, %v2287_v36  ;;  %v2699_v36 = vld [vmem:[#allocation5 + $0x538] sm:$0xff] }
 0xec8   :  { %v6714_v38 = vpop.f32.mrf.mxu0 }
 0xec9   :  { %v2296_v39 = vsel %vm887_vm4, %v2292_v37, -inf  ;;  %v2697_v38 = vld [vmem:[#allocation5 + $0x528] sm:$0xff] }
 0xeca   :  { %2297 = vmax.xlane.f32.xlu1 %v2296_v39  ;;  %v2696_v39 = vld [vmem:[#allocation5 + $0x520] sm:$0xff] }
 0xedb   :  { %2391 = vrot.lane.b32.xlu1 %v7600_v19, %s7534_s9 }
 0xf2f   :  { %v2307_v46 = vpop.xlane.xlu0 %2306 }
 0xf53   :  { %v2298_v40 = vpop.xlane.xlu1 %2297 }
 0xf54   :  { %v2300_v41 = vsub.f32 %v2292_v37, %v2298_v40  ;;  %v2698_v37 = vld [vmem:[#allocation5 + $0x530] sm:$0xff] }
 0xf56   :  { %v2303_v42 = vmul.f32 1.442695, %v2300_v41 }
 0xf57   :  { %v2392_v43 = vpop.permute.xlu1 %2391 }
 0xf58   :  { %7369 = vpow2.f32 %v2303_v42  ;;  %6721 = vmatpush3.msra.mxu0 %v2392_v43 }
 0xf59   :  { %7371 = vrcp.f32 %v2307_v46  ;;  %6730 = vmatprep.subr.mxu0 %v2609_v61 }
 0xf65   :  { %v7370_v44 = vpop.eup %7369 }
 0xf66   :  { %v2308_v45 = vsel %vm887_vm4, %v7370_v44, 0.0  ;;  %v7372_v47 = vpop.eup %7371 }
 0xf67   :  { %2309 = vadd.xlane.f32.xlu0 %v2308_v45  ;;  %v2313_v19 = vmul.f32 %v7372_v47, %v7368_v30  ;;  %v2705_v30 = vld [vmem:[#allocation5 + $0x568] sm:$0xff] }
 0xf7d   :  { %2315 = vrot.lane.b32.xlu0 %v7602_v21, %s7534_s9 }
 0xff0   :  { %v2310_v29 = vpop.xlane.xlu0 %2309 }
 0xff1   :  { %7373 = vrcp.f32 %v2310_v29  ;;  %v5819_v29 = vld [vmem:[#allocation7 + $0x9] ss:$0 sm:$0xff] }
 0xff4   :  { %v2316_v48 = vpop.permute.xlu0 %2315 }
 0xff5   :  { %6716 = vmatpush3.msra.mxu1 %v2316_v48 }
 0xff6   :  { %6718 = vmatmul.mubr.msk.f32.vlgmr.msra.gmra.mxu1 %vm887_vm4, %v2313_v19  ;;  %6725 = vmatprep.subr.mxu1 %v2467_v51 }
 0xff7   :  { %6726 = vmatpush3.msra.mxu1 %v2467_v51 }
 0xff8   :  { %6765 = vmatprep.subr.mxu1 %v2707_v27 }
 0xffe   :  { %v7374_v49 = vpop.eup %7373 }
 0xfff   :  { %v2314_v50 = vmul.f32 %v7374_v49, %v7370_v44 }
0x1001   :  { %6723 = vmatmul.mubr.msk.f32.vlgmr.msra.gmra.mxu0 %vm887_vm4, %v2314_v50  ;;  %v5820_v50 = vld [vmem:[#allocation7 + $0xa] ss:$0 sm:$0xff] }
0x1002   :  { %6731 = vmatpush3.msra.mxu0 %v2609_v61 }
0x1003   :  { %6732 = vmatprep.subr.mxu0 %v2608_v62 }
0x1004   :  { %6733 = vmatpush3.msra.mxu0 %v2608_v62 }
0x1005   :  { %6734 = vmatprep.subr.mxu0 %v2607_v63 }
0x1006   :  { %6735 = vmatpush3.msra.mxu0 %v2607_v63 }
0x1007   :  { %6736 = vmatprep.subr.mxu0 %v2606_v9 }
0x1008   :  { %6737 = vmatpush3.msra.mxu0 %v2606_v9 }
0x1009   :  { %6738 = vmatprep.subr.mxu0 %v2605_v10 }
0x100a   :  { %6739 = vmatpush3.msra.mxu0 %v2605_v10 }
0x100b   :  { %6740 = vmatprep.subr.mxu0 %v2604_v11 }
0x100c   :  { %6741 = vmatpush3.msra.mxu0 %v2604_v11 }
0x100d   :  { %6742 = vmatprep.subr.mxu0 %v2603_v12 }
0x100e   :  { %6743 = vmatpush3.msra.mxu0 %v2603_v12 }
0x100f   :  { %6744 = vmatprep.subr.mxu0 %v2602_v13 }
0x1010   :  { %6745 = vmatpush3.msra.mxu0 %v2602_v13 }
0x1011   :  { %6746 = vmatprep.subr.mxu0 %v2601_v17 }
0x1012   :  { %6747 = vmatpush3.msra.mxu0 %v2601_v17 }
0x1013   :  { %6748 = vmatprep.subr.mxu0 %v2600_v18 }
0x1014   :  { %6749 = vmatpush3.msra.mxu0 %v2600_v18 }
0x1015   :  { %6750 = vmatprep.subr.mxu0 %v2599_v20 }
0x1016   :  { %6751 = vmatpush3.msra.mxu0 %v2599_v20 }
0x1017   :  { %6752 = vmatprep.subr.mxu0 %v2598_v22 }
0x1018   :  { %6753 = vmatpush3.msra.mxu0 %v2598_v22 }
0x1019   :  { %6754 = vmatprep.subr.mxu0 %v2597_v23 }
0x101a   :  { %6755 = vmatpush3.msra.mxu0 %v2597_v23 }
0x101b   :  { %6756 = vmatprep.subr.mxu0 %v2596_v24 }
0x101c   :  { %6757 = vmatpush3.msra.mxu0 %v2596_v24  ;;  %v2840_v24 = vld [vmem:[#allocation5 + $0x5e0] sm:$0xff] }
0x101d   :  { %6758 = vmatprep.subr.mxu0 %v2595_v25 }
0x101e   :  { %6759 = vmatpush3.msra.mxu0 %v2595_v25  ;;  %v2839_v25 = vld [vmem:[#allocation5 + $0x5d8] sm:$0xff] }
0x101f   :  { %6760 = vmatprep.subr.mxu0 %v2594_v26 }
0x1020   :  { %6761 = vmatpush3.msra.mxu0 %v2594_v26  ;;  %v2838_v26 = vld [vmem:[#allocation5 + $0x5d0] sm:$0xff] }
0x10b6   :  { %v2387_v52 = vpop.f32.mrf.mxu1 }
0x10b7   :  { %6727 = vmatprep.mubr.msk.f32.mxu1 %vm887_vm4, %v2387_v52 }
0x10b8   :  { %v6719_v21 = vpop.f32.mrf.mxu1 }
0x10c1   :  { %v2463_v53 = vpop.f32.mrf.mxu0 }
0x10c2   :  { %6728 = vmatmul.mubr.msk.f32.vlgmr.msra.gmra.mxu1 %vm887_vm4, %v2463_v53  ;;  %v2695_v53 = vld [vmem:[#allocation5 + $0x518] sm:$0xff] }
0x10c3   :  { %v6724_v54 = vpop.f32.mrf.mxu0  ;;  %6766 = vmatpush3.msra.mxu1 %v2707_v27  ;;  %v2837_v27 = vld [vmem:[#allocation5 + $0x5c8] sm:$0xff] }
0x10c4   :  { %6767 = vmatprep.subr.mxu1 %v2706_v28  ;;  %v2694_v54 = vld [vmem:[#allocation5 + $0x510] sm:$0xff] }
0x10c5   :  { %6768 = vmatpush3.msra.mxu1 %v2706_v28  ;;  %v2836_v28 = vld [vmem:[#allocation5 + $0x5c0] sm:$0xff] }
0x10c6   :  { %6769 = vmatprep.subr.mxu1 %v2705_v30 }
0x10c7   :  { %6770 = vmatpush3.msra.mxu1 %v2705_v30  ;;  %v2835_v30 = vld [vmem:[#allocation5 + $0x5b8] sm:$0xff] }
0x10c8   :  { %6771 = vmatprep.subr.mxu1 %v2704_v31 }
0x10c9   :  { %6772 = vmatpush3.msra.mxu1 %v2704_v31  ;;  %v2834_v31 = vld [vmem:[#allocation5 + $0x5b0] sm:$0xff] }
0x10ca   :  { %6773 = vmatprep.subr.mxu1 %v2703_v32 }
0x10cb   :  { %6774 = vmatpush3.msra.mxu1 %v2703_v32  ;;  %v2833_v32 = vld [vmem:[#allocation5 + $0x5a8] sm:$0xff] }
0x1182   :  { %v6729_v55 = vpop.f32.mrf.mxu1 }
0x1183   :  { %v2550_v56 = vadd.f32 %v6729_v55, %v2134_v33  ;;  %v2702_v33 = vld [vmem:[#allocation5 + $0x550] sm:$0xff]  ;;  %v2693_v55 = vld [vmem:[#allocation5 + $0x508] sm:$0xff] }
0x1184   :  { %v2540_v57 = vpop.f32.mrf.mxu1  ;;  %6775 = vmatprep.subr.mxu1 %v2702_v33 }
0x1185   :  { %v2549_v58 = vadd.f32 %v2540_v57, %v2133_v35  ;;  %v2552_v59 = vadd.f32 %v2550_v56, %v7590_v15  ;;  %6776 = vmatpush3.msra.mxu1 %v2702_v33  ;;  %v2700_v35 = vld [vmem:[#allocation5 + $0x540] sm:$0xff]  ;;  %v5821_v57 = vld [vmem:[#allocation7 + $0xb] ss:$0 sm:$0xff] }
0x1186   :  { %6777 = vmatprep.subr.mxu1 %v2701_v34  ;;  %v2692_v56 = vld [vmem:[#allocation5 + $0x500] sm:$0xff] }
0x1187   :  { %2557 = vadd.xlane.f32.xlu0 %v2552_v59  ;;  %v2551_v60 = vadd.f32 %v2549_v58, %v7588_v14  ;;  %6778 = vmatpush3.msra.mxu1 %v2701_v34  ;;  %v2832_v33 = vld [vmem:[#allocation5 + $0x5a0] sm:$0xff]  ;;  %v2831_v34 = vld [vmem:[#allocation5 + $0x598] sm:$0xff] }
0x1188   :  { %6779 = vmatprep.subr.mxu1 %v2700_v35 }
0x1189   :  { %2555 = vadd.xlane.f32.xlu1 %v2551_v60  ;;  %6780 = vmatpush3.msra.mxu1 %v2700_v35  ;;  %v2830_v35 = vld [vmem:[#allocation5 + $0x590] sm:$0xff] }
0x118a   :  { %6781 = vmatprep.subr.mxu1 %v2699_v36 }
0x118b   :  { %6782 = vmatpush3.msra.mxu1 %v2699_v36  ;;  %v2829_v36 = vld [vmem:[#allocation5 + $0x588] sm:$0xff] }
0x118c   :  { %6783 = vmatprep.subr.mxu1 %v2698_v37 }
0x118d   :  { %6784 = vmatpush3.msra.mxu1 %v2698_v37  ;;  %v2828_v37 = vld [vmem:[#allocation5 + $0x580] sm:$0xff] }
0x118e   :  { %6785 = vmatprep.subr.mxu1 %v2697_v38 }
0x118f   :  { %6786 = vmatpush3.msra.mxu1 %v2697_v38 }
0x1190   :  { %6787 = vmatprep.subr.mxu1 %v2696_v39 }
0x1191   :  { %6788 = vmatpush3.msra.mxu1 %v2696_v39 }
0x1192   :  { %6789 = vmatprep.subr.mxu1 %v2695_v53 }
0x1193   :  { %6790 = vmatpush3.msra.mxu1 %v2695_v53 }
0x1194   :  { %6791 = vmatprep.subr.mxu1 %v2694_v54 }
0x1195   :  { %6792 = vmatpush3.msra.mxu1 %v2694_v54 }
0x1196   :  { %6793 = vmatprep.subr.mxu1 %v2693_v55 }
0x1197   :  { %6794 = vmatpush3.msra.mxu1 %v2693_v55 }
0x1198   :  { %6795 = vmatprep.subr.mxu1 %v2692_v56 }
0x1199   :  { %6796 = vmatpush3.msra.mxu1 %v2692_v56 }
0x119a   :  { %6835 = vmatprep.subr.mxu1 %v7522_v16 }
0x1210   :  { %v2558_v0 = vpop.xlane.xlu0 %2557 }
0x1211   :  { %v2560_v1 = vmul.f32 0.03125, %v2558_v0  ;;  %v5822_v0 = vld [vmem:[#allocation7 + $0xc] ss:$0 sm:$0xff] }
0x1212   :  { %v2556_v2 = vpop.xlane.xlu1 %2555 }
0x1213   :  { %v2563_v3 = vsub.f32 %v2552_v59, %v2560_v1  ;;  %v2559_v15 = vmul.f32 0.03125, %v2556_v2 }
0x1215   :  { %v2562_v4 = vsub.f32 %v2551_v60, %v2559_v15  ;;  %v7757_v14 = vsel %vm2561_vm5, %v2563_v3, 0.0 }
0x1216   :  { %v2569_v5 = vmul.f32 %v7757_v14, %v7757_v14 }
0x1217   :  { %v7763_v6 = vsel %vm2561_vm5, %v2562_v4, 0.0 }
0x1218   :  { %2572 = vadd.xlane.f32.xlu1 %v2569_v5  ;;  %v2568_v7 = vmul.f32 %v7763_v6, %v7763_v6  ;;  %v2843_v5 = vld [vmem:[#allocation5 + $0x5f8] sm:$0xff] }
0x1219   :  { %6800 = vmatprep.subr.mxu0 %v2843_v5 }
0x121a   :  { %2570 = vadd.xlane.f32.xlu0 %v2568_v7  ;;  %v2841_v7 = vld [vmem:[#allocation5 + $0x5e8] sm:$0xff] }
0x12a1   :  { %v2573_v40 = vpop.xlane.xlu1 %2572 }
0x12a2   :  { %v2575_v41 = vmul.f32 0.03125, %v2573_v40 }
0x12a3   :  { %v2571_v42 = vpop.xlane.xlu0 %2570 }
0x12a4   :  { %v2577_v43 = vadd.f32 1e-05, %v2575_v41  ;;  %v2574_v44 = vmul.f32 0.03125, %v2571_v42 }
0x12a6   :  { %7375 = vrsqrt.f32 %v2577_v43  ;;  %v2576_v45 = vadd.f32 1e-05, %v2574_v44 }
0x12a8   :  { %7377 = vrsqrt.f32 %v2576_v45  ;;  %v5823_v45 = vld [vmem:[#allocation7 + $0xd] ss:$0 sm:$0xff] }
0x12b3   :  { %v7376_v46 = vpop.eup %7375 }
0x12b4   :  { %v2581_v47 = vmul.f32 %v7376_v46, %v7757_v14 }
0x12b5   :  { %v7378_v48 = vpop.eup %7377 }
0x12b6   :  { %v2580_v19 = vmul.f32 %v7378_v48, %v7763_v6  ;;  %v2587_v49 = vmul.f32 %v5819_v29, %v2581_v47  ;;  %v2842_v6 = vld [vmem:[#allocation5 + $0x5f0] sm:$0xff] }
0x12b8   :  { %v2586_v51 = vmul.f32 %v5819_v29, %v2580_v19  ;;  %v2593_v21 = vadd.f32 %v5820_v50, %v2587_v49  ;;  %v5824_v19 = vld [vmem:[#allocation7 + $0xe] ss:$0 sm:$0xff] }
0x12ba   :  { %v2592_v52 = vadd.f32 %v5820_v50, %v2586_v51 }
0x12bc   :  { %6762 = vmatprep.mubr.f32.mxu0 %v2592_v52 }
0x12bd   :  { %6763 = vmatmul.mubr.f32.vlgmr.msra.gmra.mxu0 %v2593_v21 }
0x12be   :  { %6801 = vmatpush3.msra.mxu0 %v2843_v5 }
0x12bf   :  { %6802 = vmatprep.subr.mxu0 %v2842_v6 }
0x12c0   :  { %6803 = vmatpush3.msra.mxu0 %v2842_v6 }
0x12c1   :  { %6804 = vmatprep.subr.mxu0 %v2841_v7 }
0x12c2   :  { %6805 = vmatpush3.msra.mxu0 %v2841_v7 }
0x12c3   :  { %6806 = vmatprep.subr.mxu0 %v2840_v24 }
0x12c4   :  { %6807 = vmatpush3.msra.mxu0 %v2840_v24  ;;  %v3255_v24 = vld [vmem:[#allocation5 + $0x600] sm:$0xff] }
0x12c5   :  { %6808 = vmatprep.subr.mxu0 %v2839_v25 }
0x12c6   :  { %6809 = vmatpush3.msra.mxu0 %v2839_v25 }
0x12c7   :  { %6810 = vmatprep.subr.mxu0 %v2838_v26 }
0x12c8   :  { %6811 = vmatpush3.msra.mxu0 %v2838_v26 }
0x12c9   :  { %6812 = vmatprep.subr.mxu0 %v2837_v27 }
0x12ca   :  { %6813 = vmatpush3.msra.mxu0 %v2837_v27 }
0x12cb   :  { %6814 = vmatprep.subr.mxu0 %v2836_v28 }
0x12cc   :  { %6815 = vmatpush3.msra.mxu0 %v2836_v28 }
0x12cd   :  { %6816 = vmatprep.subr.mxu0 %v2835_v30 }
0x12ce   :  { %6817 = vmatpush3.msra.mxu0 %v2835_v30 }
0x12cf   :  { %6818 = vmatprep.subr.mxu0 %v2834_v31 }
0x12d0   :  { %6819 = vmatpush3.msra.mxu0 %v2834_v31 }
0x12d1   :  { %6820 = vmatprep.subr.mxu0 %v2833_v32 }
0x12d2   :  { %6821 = vmatpush3.msra.mxu0 %v2833_v32 }
0x12d3   :  { %6822 = vmatprep.subr.mxu0 %v2832_v33 }
0x12d4   :  { %6823 = vmatpush3.msra.mxu0 %v2832_v33 }
0x12d5   :  { %6824 = vmatprep.subr.mxu0 %v2831_v34 }
0x12d6   :  { %6825 = vmatpush3.msra.mxu0 %v2831_v34 }
0x12d7   :  { %6826 = vmatprep.subr.mxu0 %v2830_v35 }
0x12d8   :  { %6827 = vmatpush3.msra.mxu0 %v2830_v35 }
0x12d9   :  { %6828 = vmatprep.subr.mxu0 %v2829_v36 }
0x12da   :  { %6829 = vmatpush3.msra.mxu0 %v2829_v36 }
0x12db   :  { %6830 = vmatprep.subr.mxu0 %v2828_v37 }
0x12dc   :  { %6831 = vmatpush3.msra.mxu0 %v2828_v37 }
0x12dd   :  { %6875 = vmatprep.subr.mxu0 %v7522_v16 }
0x137d   :  { %v6764_v58 = vpop.f32.mrf.mxu0 }
0x137e   :  { %v2687_v59 = vadd.f32 %v6764_v58, %v5821_v57 }
0x137f   :  { %v2681_v60 = vpop.f32.mrf.mxu0 }
0x1380   :  { %v2682_v61 = vadd.f32 %v5821_v57, %v2681_v60  ;;  %v2691_v63 = vmax.f32 %v2687_v59, 0.0 }
0x1382   :  { %v2690_v62 = vmax.f32 %v2682_v61, 0.0 }
0x1384   :  { %6797 = vmatprep.mubr.f32.mxu1 %v2690_v62 }
0x1385   :  { %6798 = vmatmul.mubr.f32.vlgmr.msra.gmra.mxu1 %v2691_v63 }
0x1386   :  { %6837 = vmatprep.mubr.msk.f32.mxu1 %vm7523_vm3, %v7522_v16 }
0x1445   :  { %v6799_v1 = vpop.f32.mrf.mxu1 }
0x1446   :  { %v2785_v2 = vadd.f32 %v6799_v1, %v5822_v0 }
0x1447   :  { %v2779_v3 = vpop.f32.mrf.mxu1 }
0x1448   :  { %v2780_v15 = vadd.f32 %v5822_v0, %v2779_v3  ;;  %v2789_v4 = vadd.f32 %v2785_v2, %v2593_v21 }
0x144a   :  { %2794 = vadd.xlane.f32.xlu1 %v2789_v4  ;;  %v2788_v14 = vadd.f32 %v2780_v15, %v2592_v52  ;;  %v5825_v52 = vld [vmem:[#allocation7 + $0xf] ss:$0 sm:$0xff] }
0x144c   :  { %2792 = vadd.xlane.f32.xlu0 %v2788_v14 }
0x14d3   :  { %v2795_v9 = vpop.xlane.xlu1 %2794 }
0x14d4   :  { %v2797_v10 = vmul.f32 0.03125, %v2795_v9 }
0x14d5   :  { %v2793_v11 = vpop.xlane.xlu0 %2792 }
0x14d6   :  { %v2799_v12 = vsub.f32 %v2789_v4, %v2797_v10  ;;  %v2796_v13 = vmul.f32 0.03125, %v2793_v11 }
0x14d8   :  { %v2798_v17 = vsub.f32 %v2788_v14, %v2796_v13  ;;  %v2801_v18 = vsel %vm2561_vm5, %v2799_v12, 0.0 }
0x14d9   :  { %v2803_v20 = vmul.f32 %v2801_v18, %v2801_v18 }
0x14da   :  { %v2800_v22 = vsel %vm2561_vm5, %v2798_v17, 0.0 }
0x14db   :  { %2806 = vadd.xlane.f32.xlu1 %v2803_v20  ;;  %v2802_v23 = vmul.f32 %v2800_v22, %v2800_v22 }
0x14dd   :  { %2804 = vadd.xlane.f32.xlu0 %v2802_v23 }
0x1564   :  { %v2807_v38 = vpop.xlane.xlu1 %2806 }
0x1565   :  { %v2809_v39 = vmul.f32 0.03125, %v2807_v38 }
0x1566   :  { %v2805_v40 = vpop.xlane.xlu0 %2804 }
0x1567   :  { %v2811_v41 = vadd.f32 1e-05, %v2809_v39  ;;  %v2808_v42 = vmul.f32 0.03125, %v2805_v40 }
0x1569   :  { %7379 = vrsqrt.f32 %v2811_v41  ;;  %v2810_v43 = vadd.f32 1e-05, %v2808_v42 }
0x156b   :  { %7381 = vrsqrt.f32 %v2810_v43 }
0x1576   :  { %v7380_v44 = vpop.eup %7379 }
0x1577   :  { %v2815_v46 = vmul.f32 %v7380_v44, %v2801_v18 }
0x1578   :  { %v7382_v29 = vpop.eup %7381 }
0x1579   :  { %v2814_v47 = vmul.f32 %v7382_v29, %v2800_v22  ;;  %v2821_v48 = vmul.f32 %v5823_v45, %v2815_v46 }
0x157b   :  { %v2820_v49 = vmul.f32 %v5823_v45, %v2814_v47  ;;  %v7779_v51 = vadd.f32 %v5824_v19, %v2821_v48 }
0x157d   :  { %v7777_v50 = vadd.f32 %v5824_v19, %v2820_v49 }
0x157f   :  { %6832 = vmatprep.mubr.f32.mxu0 %v7777_v50 }
0x1580   :  { %6833 = vmatmul.mubr.f32.vlgmr.msra.gmra.mxu0 %v7779_v51 }
0x1581   :  { %6877 = vmatprep.mubr.msk.f32.mxu0 %vm7523_vm3, %v7522_v16 }
0x1640   :  { %v6834_v21 = vpop.f32.mrf.mxu0 }
0x1641   :  { %v7785_v53 = vadd.f32 %v6834_v21, %v5825_v52 }
0x1642   :  { %v2915_v54 = vpop.f32.mrf.mxu0 }
0x1643   :  { %v7787_v55 = vadd.f32 %v5825_v52, %v2915_v54  ;;  %3003 = vrot.lane.b32.xlu1 %v7785_v53, %s7524_s0 }
0x1645   :  { %2926 = vrot.lane.b32.xlu0 %v7787_v55, %s7524_s0 }
0x16b5   :  { %v3004_v57 = vpop.permute.xlu1 %3003 }
0x16b7   :  { %v2927_v56 = vpop.permute.xlu0 %2926 }
0x16b8   :  { %6836 = vmatpush3.xpose.msk.msra.mxu1 %vm887_vm4, %v2927_v56 }
0x16b9   :  { %6840 = vmatprep.subr.mxu1 %v7522_v16 }
0x16bb   :  { %6838 = vmatmul.mubr.msk.f32.vlgmr.msra.gmra.mxu1 %vm887_vm4, %v7787_v55 }
0x16bc   :  { %6841 = vmatpush3.xpose.msk.msra.mxu1 %vm887_vm4, %v3004_v57  ;;  %6842 = vmatprep.mubr.msk.f32.mxu1 %vm7523_vm3, %v7522_v16 }
0x16bd   :  { %6845 = vmatprep.subr.mxu1 %v7522_v16 }
0x16bf   :  { %6843 = vmatmul.mubr.msk.f32.vlgmr.msra.gmra.mxu1 %vm887_vm4, %v7785_v53 }
0x16c0   :  { %6847 = vmatprep.mubr.msk.f32.mxu1 %vm7523_vm3, %v7522_v16 }
0x177b   :  { %v2998_v58 = vpop.f32.mrf.mxu1 }
0x177c   :  { %v3079_v59 = vmul.f32 0.35355338, %v2998_v58 }
0x177d   :  { %v6839_v60 = vpop.f32.mrf.mxu1 }
0x177e   :  { %v3081_v61 = vsel %vm887_vm4, %v3079_v59, -inf }
0x177f   :  { %3082 = vmax.xlane.f32.xlu1 %v3081_v61  ;;  %v3075_v62 = vpop.f32.mrf.mxu1 }
0x1780   :  { %v3080_v63 = vmul.f32 0.35355338, %v3075_v62 }
0x1781   :  { %v6844_v0 = vpop.f32.mrf.mxu1 }
0x1782   :  { %v3084_v1 = vsel %vm887_vm4, %v3080_v63, -inf }
0x1783   :  { %3085 = vmax.xlane.f32.xlu0 %v3084_v1  ;;  %v3675_v1 = vld [vmem:[#allocation5 + $0x608] sm:$0xff] }
0x1808   :  { %v3083_v2 = vpop.xlane.xlu1 %3082 }
0x1809   :  { %v3087_v3 = vsub.f32 %v3079_v59, %v3083_v2 }
0x180b   :  { %v3089_v15 = vmul.f32 1.442695, %v3087_v3 }
0x180c   :  { %v3086_v4 = vpop.xlane.xlu0 %3085 }
0x180d   :  { %7383 = vpow2.f32 %v3089_v15  ;;  %v3088_v14 = vsub.f32 %v3080_v63, %v3086_v4 }
0x180f   :  { %v3091_v5 = vmul.f32 1.442695, %v3088_v14 }
0x1811   :  { %7385 = vpow2.f32 %v3091_v5 }
0x181a   :  { %v7384_v6 = vpop.eup %7383 }
0x181b   :  { %v3093_v7 = vsel %vm887_vm4, %v7384_v6, 0.0 }
0x181c   :  { %3094 = vadd.xlane.f32.xlu0 %v3093_v7 }
0x181e   :  { %v7386_v9 = vpop.eup %7385 }
0x181f   :  { %v3096_v10 = vsel %vm887_vm4, %v7386_v9, 0.0 }
0x1820   :  { %3097 = vadd.xlane.f32.xlu1 %v3096_v10 }
0x1831   :  { %3179 = vrot.lane.b32.xlu1 %v7785_v53, %s7525_s2 }
0x1832   :  { %3103 = vrot.lane.b32.xlu0 %v7787_v55, %s7525_s2 }
0x1835   :  { %3345 = vrot.lane.b32.xlu1 %v7787_v55, %s7526_s28 }
0x1836   :  { %3423 = vrot.lane.b32.xlu0 %v7785_v53, %s7526_s28 }
0x1839   :  { %3343 = vrot.lane.b32.xlu1 %v7787_v55, %s7527_s29 }
0x183d   :  { %3421 = vrot.lane.b32.xlu1 %v7785_v53, %s7527_s29 }
0x18a5   :  { %v3095_v11 = vpop.xlane.xlu0 %3094 }
0x18a6   :  { %7387 = vrcp.f32 %v3095_v11 }
0x18a9   :  { %v3098_v12 = vpop.xlane.xlu1 %3097  ;;  %v3104_v13 = vpop.permute.xlu0 %3103 }
0x18aa   :  { %7389 = vrcp.f32 %v3098_v12  ;;  %6846 = vmatpush3.msra.mxu1 %v3104_v13 }
0x18ab   :  { %6850 = vmatprep.subr.mxu1 %v7522_v16 }
0x18ad   :  { %v3180_v20 = vpop.permute.xlu1 %3179  ;;  %v3424_v32 = vpop.permute.xlu0 %3423 }
0x18b1   :  { %v3346_v25 = vpop.permute.xlu1 %3345 }
0x18b3   :  { %v7388_v17 = vpop.eup %7387 }
0x18b4   :  { %v3101_v18 = vmul.f32 %v7388_v17, %v7384_v6 }
0x18b5   :  { %v3344_v30 = vpop.permute.xlu1 %3343 }
0x18b6   :  { %6848 = vmatmul.mubr.msk.f32.vlgmr.msra.gmra.mxu1 %vm887_vm4, %v3101_v18 }
0x18b7   :  { %v7390_v22 = vpop.eup %7389  ;;  %6851 = vmatpush3.msra.mxu1 %v3180_v20  ;;  %6852 = vmatprep.mubr.msk.f32.mxu1 %vm7523_vm3, %v7522_v16  ;;  %v5834_v20 = vld [vmem:[#allocation7 + $0x10] ss:$0 sm:$0xff] }
0x18b8   :  { %v3102_v23 = vmul.f32 %v7390_v22, %v7386_v9  ;;  %6855 = vmatprep.subr.mxu1 %v3255_v24 }
0x18b9   :  { %v3422_v33 = vpop.permute.xlu1 %3421 }
0x18ba   :  { %6853 = vmatmul.mubr.msk.f32.vlgmr.msra.gmra.mxu1 %vm887_vm4, %v3102_v23 }
0x18bb   :  { %6856 = vmatpush3.msra.mxu1 %v3255_v24 }
0x18bc   :  { %6860 = vmatprep.subr.mxu1 %v7522_v16 }
0x1976   :  { %v3175_v26 = vpop.f32.mrf.mxu1 }
0x1977   :  { %6857 = vmatprep.mubr.msk.f32.mxu1 %vm887_vm4, %v3175_v26 }
0x1978   :  { %v6849_v27 = vpop.f32.mrf.mxu1 }
0x197a   :  { %v3251_v28 = vpop.f32.mrf.mxu1 }
0x197b   :  { %6858 = vmatmul.mubr.msk.f32.vlgmr.msra.gmra.mxu1 %vm887_vm4, %v3251_v28 }
0x197c   :  { %6861 = vmatpush3.xpose.msk.msra.mxu1 %vm887_vm4, %v3346_v25  ;;  %v6854_v31 = vpop.f32.mrf.mxu1  ;;  %6862 = vmatprep.mubr.msk.f32.mxu1 %vm7523_vm3, %v7522_v16 }
0x197d   :  { %6865 = vmatprep.subr.mxu1 %v7522_v16 }
0x197f   :  { %6863 = vmatmul.mubr.msk.f32.vlgmr.msra.gmra.mxu1 %vm887_vm4, %v3344_v30 }
0x1980   :  { %6866 = vmatpush3.xpose.msk.msra.mxu1 %vm887_vm4, %v3424_v32  ;;  %6867 = vmatprep.mubr.msk.f32.mxu1 %vm7523_vm3, %v7522_v16 }
0x1981   :  { %6870 = vmatprep.subr.mxu1 %v7522_v16 }
0x1983   :  { %6868 = vmatmul.mubr.msk.f32.vlgmr.msra.gmra.mxu1 %vm887_vm4, %v3422_v33 }
0x1984   :  { %6872 = vmatprep.mubr.msk.f32.mxu1 %vm7523_vm3, %v7522_v16 }
0x1a3b   :  { %v7841_v34 = vpop.f32.mrf.mxu1 }
0x1a3c   :  { %v3342_v22 = vadd.f32 %v7841_v34, %v5834_v20 }
0x1a3d   :  { %v7843_v35 = vpop.f32.mrf.mxu1 }
0x1a3e   :  { %v3341_v24 = vadd.f32 %v5834_v20, %v7843_v35 }
0x1a3f   :  { %v3417_v36 = vpop.f32.mrf.mxu1 }
0x1a40   :  { %v3499_v37 = vmul.f32 0.35355338, %v3417_v36 }
0x1a41   :  { %v6864_v38 = vpop.f32.mrf.mxu1 }
0x1a42   :  { %v3501_v39 = vsel %vm887_vm4, %v3499_v37, -inf }
0x1a43   :  { %3502 = vmax.xlane.f32.xlu0 %v3501_v39  ;;  %v3495_v40 = vpop.f32.mrf.mxu1 }
0x1a44   :  { %v3500_v41 = vmul.f32 0.35355338, %v3495_v40 }
0x1a45   :  { %v6869_v42 = vpop.f32.mrf.mxu1 }
0x1a46   :  { %v3504_v43 = vsel %vm887_vm4, %v3500_v41, -inf }
0x1a47   :  { %3505 = vmax.xlane.f32.xlu1 %v3504_v43 }
0x1a58   :  { %3599 = vrot.lane.b32.xlu1 %v7785_v53, %s7528_s30 }
0x1a5c   :  { %3761 = vrot.lane.b32.xlu1 %v7787_v55, %s7529_s4 }
0x1a60   :  { %3839 = vrot.lane.b32.xlu1 %v7785_v53, %s7529_s4 }
0x1a64   :  { %3837 = vrot.lane.b32.xlu1 %v7785_v53, %s7530_s5 }
0x1acc   :  { %v3503_v44 = vpop.xlane.xlu0 %3502 }
0x1acd   :  { %v3507_v45 = vsub.f32 %v3499_v37, %v3503_v44 }
0x1acf   :  { %v3509_v46 = vmul.f32 1.442695, %v3507_v45 }
0x1ad0   :  { %v3506_v29 = vpop.xlane.xlu1 %3505 }
0x1ad1   :  { %7391 = vpow2.f32 %v3509_v46  ;;  %v3508_v47 = vsub.f32 %v3500_v41, %v3506_v29 }
0x1ad3   :  { %v3511_v48 = vmul.f32 1.442695, %v3508_v47  ;;  %v4091_v47 = vld [vmem:[#allocation5 + $0x610] sm:$0xff] }
0x1ad4   :  { %v3600_v19 = vpop.permute.xlu1 %3599 }
0x1ad5   :  { %7393 = vpow2.f32 %v3511_v48  ;;  %6876 = vmatpush3.msra.mxu0 %v3600_v19 }
0x1ad6   :  { %6885 = vmatprep.subr.mxu0 %v7522_v16 }
0x1ad8   :  { %v3762_v63 = vpop.permute.xlu1 %3761 }
0x1adc   :  { %v3840_v3 = vpop.permute.xlu1 %3839 }
0x1ade   :  { %v7392_v49 = vpop.eup %7391 }
0x1adf   :  { %v3513_v52 = vsel %vm887_vm4, %v7392_v49, 0.0 }
0x1ae0   :  { %3514 = vadd.xlane.f32.xlu0 %v3513_v52  ;;  %v3838_v5 = vpop.permute.xlu1 %3837 }
0x1ae2   :  { %v7394_v21 = vpop.eup %7393 }
0x1ae3   :  { %v3516_v54 = vsel %vm887_vm4, %v7394_v21, 0.0 }
0x1ae4   :  { %3517 = vadd.xlane.f32.xlu0 %v3516_v54 }
0x1afa   :  { %3523 = vrot.lane.b32.xlu0 %v7787_v55, %s7528_s30 }
0x1afe   :  { %3759 = vrot.lane.b32.xlu0 %v7787_v55, %s7530_s5 }
0x1b69   :  { %v3515_v56 = vpop.xlane.xlu0 %3514 }
0x1b6a   :  { %7395 = vrcp.f32 %v3515_v56 }
0x1b6d   :  { %v3518_v57 = vpop.xlane.xlu0 %3517 }
0x1b6e   :  { %7397 = vrcp.f32 %v3518_v57 }
0x1b71   :  { %v3524_v58 = vpop.permute.xlu0 %3523 }
0x1b72   :  { %6871 = vmatpush3.msra.mxu1 %v3524_v58 }
0x1b73   :  { %6880 = vmatprep.subr.mxu1 %v3675_v1 }
0x1b75   :  { %v3760_v0 = vpop.permute.xlu0 %3759 }
0x1b77   :  { %v7396_v59 = vpop.eup %7395 }
0x1b78   :  { %v3521_v60 = vmul.f32 %v7396_v59, %v7392_v49 }
0x1b7a   :  { %6873 = vmatmul.mubr.msk.f32.vlgmr.msra.gmra.mxu1 %vm887_vm4, %v3521_v60 }
0x1b7b   :  { %v7398_v61 = vpop.eup %7397  ;;  %6881 = vmatpush3.msra.mxu1 %v3675_v1 }
0x1b7c   :  { %v3522_v62 = vmul.f32 %v7398_v61, %v7394_v21  ;;  %6890 = vmatprep.subr.mxu1 %v7522_v16 }
0x1b7e   :  { %6878 = vmatmul.mubr.msk.f32.vlgmr.msra.gmra.mxu0 %vm887_vm4, %v3522_v62 }
0x1b7f   :  { %6886 = vmatpush3.xpose.msk.msra.mxu0 %vm887_vm4, %v3762_v63  ;;  %6887 = vmatprep.mubr.msk.f32.mxu0 %vm7523_vm3, %v7522_v16 }
0x1b80   :  { %6895 = vmatprep.subr.mxu0 %v7522_v16 }
0x1b82   :  { %6888 = vmatmul.mubr.msk.f32.vlgmr.msra.gmra.mxu0 %vm887_vm4, %v3760_v0 }
0x1b83   :  { %6897 = vmatprep.mubr.msk.f32.mxu0 %vm7523_vm3, %v7522_v16 }
0x1c3a   :  { %v3595_v2 = vpop.f32.mrf.mxu1 }
0x1c3b   :  { %6882 = vmatprep.mubr.msk.f32.mxu1 %vm887_vm4, %v3595_v2 }
0x1c3c   :  { %v6874_v15 = vpop.f32.mrf.mxu1 }
0x1c3e   :  { %v3671_v4 = vpop.f32.mrf.mxu0 }
0x1c3f   :  { %6883 = vmatmul.mubr.msk.f32.vlgmr.msra.gmra.mxu1 %vm887_vm4, %v3671_v4 }
0x1c40   :  { %6891 = vmatpush3.xpose.msk.msra.mxu1 %vm887_vm4, %v3840_v3  ;;  %v6879_v14 = vpop.f32.mrf.mxu0  ;;  %6892 = vmatprep.mubr.msk.f32.mxu1 %vm7523_vm3, %v7522_v16 }
0x1c41   :  { %6900 = vmatprep.subr.mxu1 %v7522_v16 }
0x1c42   :  { %v3833_v6 = vpop.f32.mrf.mxu0 }
0x1c43   :  { %v3915_v7 = vmul.f32 0.35355338, %v3833_v6  ;;  %6893 = vmatmul.mubr.msk.f32.vlgmr.msra.gmra.mxu1 %vm887_vm4, %v3838_v5 }
0x1c44   :  { %v6889_v9 = vpop.f32.mrf.mxu0  ;;  %6902 = vmatprep.mubr.msk.f32.mxu1 %vm7523_vm3, %v7522_v16 }
0x1c45   :  { %v3917_v10 = vsel %vm887_vm4, %v3915_v7, -inf }
0x1c46   :  { %3918 = vmax.xlane.f32.xlu0 %v3917_v10 }
0x1ccf   :  { %v3919_v11 = vpop.xlane.xlu0 %3918 }
0x1cd0   :  { %v3923_v12 = vsub.f32 %v3915_v7, %v3919_v11 }
0x1cd2   :  { %v3925_v13 = vmul.f32 1.442695, %v3923_v12 }
0x1cd4   :  { %7399 = vpow2.f32 %v3925_v13 }
0x1ce1   :  { %v7400_v17 = vpop.eup %7399 }
0x1ce2   :  { %v3929_v18 = vsel %vm887_vm4, %v7400_v17, 0.0 }
0x1ce3   :  { %3930 = vadd.xlane.f32.xlu0 %v3929_v18 }
0x1cff   :  { %v6884_v23 = vpop.f32.mrf.mxu1 }
0x1d00   :  { %v7885_v25 = vadd.f32 %v6884_v23, %v3342_v22 }
0x1d01   :  { %v3748_v26 = vpop.f32.mrf.mxu1 }
0x1d02   :  { %v7887_v27 = vadd.f32 %v3748_v26, %v3341_v24 }
0x1d03   :  { %v3911_v28 = vpop.f32.mrf.mxu1 }
0x1d04   :  { %v3916_v30 = vmul.f32 0.35355338, %v3911_v28 }
0x1d05   :  { %v6894_v31 = vpop.f32.mrf.mxu1 }
0x1d06   :  { %v3920_v32 = vsel %vm887_vm4, %v3916_v30, -inf }
0x1d07   :  { %3921 = vmax.xlane.f32.xlu1 %v3920_v32 }
0x1d18   :  { %4015 = vrot.lane.b32.xlu1 %v7785_v53, %s7531_s6 }
0x1d1c   :  { %4177 = vrot.lane.b32.xlu1 %v7787_v55, %s7532_s7 }
0x1d20   :  { %4255 = vrot.lane.b32.xlu1 %v7785_v53, %s7532_s7 }
0x1d24   :  { %4253 = vrot.lane.b32.xlu1 %v7785_v53, %s7533_s8 }
0x1d6c   :  { %v3931_v39 = vpop.xlane.xlu0 %3930 }
0x1d90   :  { %v3922_v33 = vpop.xlane.xlu1 %3921 }
0x1d91   :  { %v3924_v34 = vsub.f32 %v3916_v30, %v3922_v33 }
0x1d93   :  { %v3927_v35 = vmul.f32 1.442695, %v3924_v34 }
0x1d94   :  { %v4016_v36 = vpop.permute.xlu1 %4015 }
0x1d95   :  { %7401 = vpow2.f32 %v3927_v35  ;;  %6901 = vmatpush3.msra.mxu1 %v4016_v36  ;;  %v4646_v36 = vld [vmem:[#allocation5 + $0x6f8] sm:$0xff] }
0x1d96   :  { %6910 = vmatprep.subr.mxu1 %v7522_v16  ;;  %7403 = vrcp.f32 %v3931_v39 }
0x1d98   :  { %v4178_v46 = vpop.permute.xlu1 %4177 }
0x1d9c   :  { %v4256_v49 = vpop.permute.xlu1 %4255 }
0x1da0   :  { %v4254_v54 = vpop.permute.xlu1 %4253 }
0x1da2   :  { %v7402_v37 = vpop.eup %7401 }
0x1da3   :  { %v3932_v38 = vsel %vm887_vm4, %v7402_v37, 0.0  ;;  %v7404_v41 = vpop.eup %7403 }
0x1da4   :  { %3933 = vadd.xlane.f32.xlu0 %v3932_v38  ;;  %v3937_v43 = vmul.f32 %v7404_v41, %v7400_v17  ;;  %v4644_v38 = vld [vmem:[#allocation5 + $0x6e8] sm:$0xff] }
0x1dba   :  { %3939 = vrot.lane.b32.xlu0 %v7787_v55, %s7531_s6 }
0x1dbe   :  { %4175 = vrot.lane.b32.xlu0 %v7787_v55, %s7533_s8 }
0x1e2d   :  { %v3934_v40 = vpop.xlane.xlu0 %3933 }
0x1e2e   :  { %7405 = vrcp.f32 %v3934_v40 }
0x1e31   :  { %v3940_v42 = vpop.permute.xlu0 %3939 }
0x1e32   :  { %6896 = vmatpush3.msra.mxu0 %v3940_v42 }
0x1e33   :  { %6898 = vmatmul.mubr.msk.f32.vlgmr.msra.gmra.mxu0 %vm887_vm4, %v3937_v43  ;;  %6905 = vmatprep.subr.mxu0 %v4091_v47 }
0x1e34   :  { %6906 = vmatpush3.msra.mxu0 %v4091_v47  ;;  %v4642_v47 = vld [vmem:[#allocation5 + $0x6d8] sm:$0xff] }
0x1e35   :  { %v4176_v29 = vpop.permute.xlu0 %4175  ;;  %6915 = vmatprep.subr.mxu0 %v7522_v16 }
0x1e3b   :  { %v7406_v44 = vpop.eup %7405 }
0x1e3c   :  { %v3938_v45 = vmul.f32 %v7406_v44, %v7402_v37  ;;  %v4645_v37 = vld [vmem:[#allocation5 + $0x6f0] sm:$0xff] }
0x1e3e   :  { %6903 = vmatmul.mubr.msk.f32.vlgmr.msra.gmra.mxu1 %vm887_vm4, %v3938_v45 }
0x1e3f   :  { %6911 = vmatpush3.xpose.msk.msra.mxu1 %vm887_vm4, %v4178_v46  ;;  %6912 = vmatprep.mubr.msk.f32.mxu1 %vm7523_vm3, %v7522_v16 }
0x1e40   :  { %6920 = vmatprep.subr.mxu1 %v7522_v16 }
0x1e42   :  { %6913 = vmatmul.mubr.msk.f32.vlgmr.msra.gmra.mxu1 %vm887_vm4, %v4176_v29  ;;  %v4643_v29 = vld [vmem:[#allocation5 + $0x6e0] sm:$0xff] }
0x1e43   :  { %6922 = vmatprep.mubr.msk.f32.mxu1 %vm7523_vm3, %v7522_v16 }
0x1ef3   :  { %v4011_v48 = vpop.f32.mrf.mxu0 }
0x1ef4   :  { %6907 = vmatprep.mubr.msk.f32.mxu0 %vm887_vm4, %v4011_v48  ;;  %v4641_v48 = vld [vmem:[#allocation5 + $0x6d0] sm:$0xff] }
0x1ef5   :  { %v6899_v19 = vpop.f32.mrf.mxu0 }
0x1ef6   :  { %v4640_v19 = vld [vmem:[#allocation5 + $0x6c8] sm:$0xff] }
0x1efe   :  { %v4087_v52 = vpop.f32.mrf.mxu1 }
0x1eff   :  { %6908 = vmatmul.mubr.msk.f32.vlgmr.msra.gmra.mxu0 %vm887_vm4, %v4087_v52  ;;  %v4638_v52 = vld [vmem:[#allocation5 + $0x6b8] sm:$0xff] }
0x1f00   :  { %6916 = vmatpush3.xpose.msk.msra.mxu0 %vm887_vm4, %v4256_v49  ;;  %v6904_v21 = vpop.f32.mrf.mxu1  ;;  %6917 = vmatprep.mubr.msk.f32.mxu0 %vm7523_vm3, %v7522_v16  ;;  %v4639_v49 = vld [vmem:[#allocation5 + $0x6c0] sm:$0xff] }
0x1f01   :  { %6925 = vmatprep.subr.mxu0 %v7522_v16  ;;  %v4637_v21 = vld [vmem:[#allocation5 + $0x6b0] sm:$0xff] }
0x1f02   :  { %v4249_v56 = vpop.f32.mrf.mxu1 }
0x1f03   :  { %v4331_v57 = vmul.f32 0.35355338, %v4249_v56  ;;  %6918 = vmatmul.mubr.msk.f32.vlgmr.msra.gmra.mxu0 %vm887_vm4, %v4254_v54  ;;  %v4636_v54 = vld [vmem:[#allocation5 + $0x6a8] sm:$0xff]  ;;  %v4635_v56 = vld [vmem:[#allocation5 + $0x6a0] sm:$0xff] }
0x1f04   :  { %v6914_v58 = vpop.f32.mrf.mxu1  ;;  %6927 = vmatprep.mubr.msk.f32.mxu0 %vm7523_vm3, %v7522_v16 }
0x1f05   :  { %v4333_v59 = vsel %vm887_vm4, %v4331_v57, -inf  ;;  %v4633_v58 = vld [vmem:[#allocation5 + $0x690] sm:$0xff] }
0x1f06   :  { %4334 = vmax.xlane.f32.xlu0 %v4333_v59  ;;  %v4632_v59 = vld [vmem:[#allocation5 + $0x688] sm:$0xff] }
0x1f8f   :  { %v4335_v60 = vpop.xlane.xlu0 %4334 }
0x1f90   :  { %v4339_v61 = vsub.f32 %v4331_v57, %v4335_v60  ;;  %v4634_v57 = vld [vmem:[#allocation5 + $0x698] sm:$0xff]  ;;  %v4631_v60 = vld [vmem:[#allocation5 + $0x680] sm:$0xff] }
0x1f92   :  { %v4341_v62 = vmul.f32 1.442695, %v4339_v61  ;;  %v4744_v61 = vld [vmem:[#allocation5 + $0x778] sm:$0xff] }
0x1f94   :  { %7407 = vpow2.f32 %v4341_v62  ;;  %v4743_v62 = vld [vmem:[#allocation5 + $0x770] sm:$0xff] }
0x1fa1   :  { %v7408_v63 = vpop.eup %7407 }
0x1fa2   :  { %v4345_v0 = vsel %vm887_vm4, %v7408_v63, 0.0 }
0x1fa3   :  { %4346 = vadd.xlane.f32.xlu0 %v4345_v0  ;;  %v4741_v0 = vld [vmem:[#allocation5 + $0x760] sm:$0xff] }
0x1fbf   :  { %v6909_v1 = vpop.f32.mrf.mxu0 }
0x1fc0   :  { %v4174_v2 = vadd.f32 %v6909_v1, %v7885_v25  ;;  %v4507_v25 = vld [vmem:[#allocation5 + $0x618] sm:$0xff] }
0x1fc1   :  { %v4164_v3 = vpop.f32.mrf.mxu0  ;;  %v4740_v1 = vld [vmem:[#allocation5 + $0x758] sm:$0xff] }
0x1fc2   :  { %v4173_v15 = vadd.f32 %v4164_v3, %v7887_v27  ;;  %v4738_v3 = vld [vmem:[#allocation5 + $0x748] sm:$0xff] }
0x1fc3   :  { %v4327_v4 = vpop.f32.mrf.mxu0 }
0x1fc4   :  { %v4332_v14 = vmul.f32 0.35355338, %v4327_v4  ;;  %v4736_v4 = vld [vmem:[#allocation5 + $0x738] sm:$0xff] }
0x1fc5   :  { %v6919_v5 = vpop.f32.mrf.mxu0 }
0x1fc6   :  { %v4336_v6 = vsel %vm887_vm4, %v4332_v14, -inf  ;;  %v4734_v5 = vld [vmem:[#allocation5 + $0x728] sm:$0xff] }
0x1fc7   :  { %4337 = vmax.xlane.f32.xlu1 %v4336_v6  ;;  %v4733_v6 = vld [vmem:[#allocation5 + $0x720] sm:$0xff] }
0x1fd8   :  { %4431 = vrot.lane.b32.xlu1 %v7785_v53, %s7534_s9 }
0x202c   :  { %v4347_v17 = vpop.xlane.xlu0 %4346 }
0x2050   :  { %v4338_v7 = vpop.xlane.xlu1 %4337 }
0x2051   :  { %v4340_v9 = vsub.f32 %v4332_v14, %v4338_v7  ;;  %v4735_v14 = vld [vmem:[#allocation5 + $0x730] sm:$0xff] }
0x2053   :  { %v4343_v10 = vmul.f32 1.442695, %v4340_v9 }
0x2054   :  { %v4432_v11 = vpop.permute.xlu1 %4431 }
0x2055   :  { %7409 = vpow2.f32 %v4343_v10  ;;  %6926 = vmatpush3.msra.mxu0 %v4432_v11 }
0x2056   :  { %7411 = vrcp.f32 %v4347_v17  ;;  %6935 = vmatprep.subr.mxu0 %v4646_v36 }
0x2062   :  { %v7410_v12 = vpop.eup %7409 }
0x2063   :  { %v4348_v13 = vsel %vm887_vm4, %v7410_v12, 0.0  ;;  %v7412_v20 = vpop.eup %7411 }
0x2064   :  { %4349 = vadd.xlane.f32.xlu0 %v4348_v13  ;;  %v4353_v53 = vmul.f32 %v7412_v20, %v7408_v63  ;;  %v4742_v63 = vld [vmem:[#allocation5 + $0x768] sm:$0xff] }
0x207a   :  { %4355 = vrot.lane.b32.xlu0 %v7787_v55, %s7534_s9 }
0x20ed   :  { %v4350_v18 = vpop.xlane.xlu0 %4349 }
0x20ee   :  { %7413 = vrcp.f32 %v4350_v18  ;;  %v5859_v18 = vld [vmem:[#allocation7 + $0x11] ss:$0 sm:$0xff] }
0x20f1   :  { %v4356_v22 = vpop.permute.xlu0 %4355 }
0x20f2   :  { %6921 = vmatpush3.msra.mxu1 %v4356_v22 }
0x20f3   :  { %6923 = vmatmul.mubr.msk.f32.vlgmr.msra.gmra.mxu1 %vm887_vm4, %v4353_v53  ;;  %6930 = vmatprep.subr.mxu1 %v4507_v25 }
0x20f4   :  { %6931 = vmatpush3.msra.mxu1 %v4507_v25 }
0x20f5   :  { %6970 = vmatprep.subr.mxu1 %v4744_v61 }
0x20fb   :  { %v7414_v23 = vpop.eup %7413 }
0x20fc   :  { %v4354_v24 = vmul.f32 %v7414_v23, %v7410_v12 }
0x20fe   :  { %6928 = vmatmul.mubr.msk.f32.vlgmr.msra.gmra.mxu0 %vm887_vm4, %v4354_v24  ;;  %v5860_v24 = vld [vmem:[#allocation7 + $0x12] ss:$0 sm:$0xff] }
0x20ff   :  { %6936 = vmatpush3.msra.mxu0 %v4646_v36 }
0x2100   :  { %6937 = vmatprep.subr.mxu0 %v4645_v37 }
0x2101   :  { %6938 = vmatpush3.msra.mxu0 %v4645_v37 }
0x2102   :  { %6939 = vmatprep.subr.mxu0 %v4644_v38 }
0x2103   :  { %6940 = vmatpush3.msra.mxu0 %v4644_v38 }
0x2104   :  { %6941 = vmatprep.subr.mxu0 %v4643_v29 }
0x2105   :  { %6942 = vmatpush3.msra.mxu0 %v4643_v29 }
0x2106   :  { %6943 = vmatprep.subr.mxu0 %v4642_v47 }
0x2107   :  { %6944 = vmatpush3.msra.mxu0 %v4642_v47 }
0x2108   :  { %6945 = vmatprep.subr.mxu0 %v4641_v48 }
0x2109   :  { %6946 = vmatpush3.msra.mxu0 %v4641_v48 }
0x210a   :  { %6947 = vmatprep.subr.mxu0 %v4640_v19 }
0x210b   :  { %6948 = vmatpush3.msra.mxu0 %v4640_v19 }
0x210c   :  { %6949 = vmatprep.subr.mxu0 %v4639_v49 }
0x210d   :  { %6950 = vmatpush3.msra.mxu0 %v4639_v49 }
0x210e   :  { %6951 = vmatprep.subr.mxu0 %v4638_v52 }
0x210f   :  { %6952 = vmatpush3.msra.mxu0 %v4638_v52 }
0x2110   :  { %6953 = vmatprep.subr.mxu0 %v4637_v21 }
0x2111   :  { %6954 = vmatpush3.msra.mxu0 %v4637_v21 }
0x2112   :  { %6955 = vmatprep.subr.mxu0 %v4636_v54 }
0x2113   :  { %6956 = vmatpush3.msra.mxu0 %v4636_v54  ;;  %v4895_v54 = vld [vmem:[#allocation5 + $0x7f8] sm:$0xff] }
0x2114   :  { %6957 = vmatprep.subr.mxu0 %v4635_v56 }
0x2115   :  { %6958 = vmatpush3.msra.mxu0 %v4635_v56  ;;  %v4894_v56 = vld [vmem:[#allocation5 + $0x7f0] sm:$0xff] }
0x2116   :  { %6959 = vmatprep.subr.mxu0 %v4634_v57 }
0x2117   :  { %6960 = vmatpush3.msra.mxu0 %v4634_v57  ;;  %v4893_v57 = vld [vmem:[#allocation5 + $0x7e8] sm:$0xff] }
0x2118   :  { %6961 = vmatprep.subr.mxu0 %v4633_v58 }
0x2119   :  { %6962 = vmatpush3.msra.mxu0 %v4633_v58  ;;  %v4892_v58 = vld [vmem:[#allocation5 + $0x7e0] sm:$0xff] }
0x211a   :  { %6963 = vmatprep.subr.mxu0 %v4632_v59 }
0x211b   :  { %6964 = vmatpush3.msra.mxu0 %v4632_v59  ;;  %v4891_v59 = vld [vmem:[#allocation5 + $0x7d8] sm:$0xff] }
0x211c   :  { %6965 = vmatprep.subr.mxu0 %v4631_v60 }
0x211d   :  { %6966 = vmatpush3.msra.mxu0 %v4631_v60  ;;  %v4890_v60 = vld [vmem:[#allocation5 + $0x7d0] sm:$0xff] }
0x211e   :  { %7005 = vmatprep.subr.mxu0 %v7522_v16 }
0x21b3   :  { %v4427_v26 = vpop.f32.mrf.mxu1 }
0x21b4   :  { %6932 = vmatprep.mubr.msk.f32.mxu1 %vm887_vm4, %v4427_v26 }
0x21b5   :  { %v6924_v55 = vpop.f32.mrf.mxu1 }
0x21be   :  { %v4503_v27 = vpop.f32.mrf.mxu0 }
0x21bf   :  { %6933 = vmatmul.mubr.msk.f32.vlgmr.msra.gmra.mxu1 %vm887_vm4, %v4503_v27  ;;  %v4732_v27 = vld [vmem:[#allocation5 + $0x718] sm:$0xff] }
0x21c0   :  { %v6929_v28 = vpop.f32.mrf.mxu0  ;;  %6971 = vmatpush3.msra.mxu1 %v4744_v61  ;;  %v4889_v61 = vld [vmem:[#allocation5 + $0x7c8] sm:$0xff] }
0x21c1   :  { %6972 = vmatprep.subr.mxu1 %v4743_v62  ;;  %v4731_v28 = vld [vmem:[#allocation5 + $0x710] sm:$0xff] }
0x21c2   :  { %6973 = vmatpush3.msra.mxu1 %v4743_v62  ;;  %v4888_v62 = vld [vmem:[#allocation5 + $0x7c0] sm:$0xff] }
0x21c3   :  { %6974 = vmatprep.subr.mxu1 %v4742_v63 }
0x21c4   :  { %6975 = vmatpush3.msra.mxu1 %v4742_v63  ;;  %v4887_v63 = vld [vmem:[#allocation5 + $0x7b8] sm:$0xff] }
0x21c5   :  { %6976 = vmatprep.subr.mxu1 %v4741_v0 }
0x21c6   :  { %6977 = vmatpush3.msra.mxu1 %v4741_v0  ;;  %v4886_v0 = vld [vmem:[#allocation5 + $0x7b0] sm:$0xff] }
0x21c7   :  { %6978 = vmatprep.subr.mxu1 %v4740_v1 }
0x21c8   :  { %6979 = vmatpush3.msra.mxu1 %v4740_v1  ;;  %v4885_v1 = vld [vmem:[#allocation5 + $0x7a8] sm:$0xff] }
0x227f   :  { %v6934_v30 = vpop.f32.mrf.mxu1 }
0x2280   :  { %v4590_v31 = vadd.f32 %v6934_v30, %v4174_v2  ;;  %v4739_v2 = vld [vmem:[#allocation5 + $0x750] sm:$0xff]  ;;  %v4730_v30 = vld [vmem:[#allocation5 + $0x708] sm:$0xff] }
0x2281   :  { %v4580_v32 = vpop.f32.mrf.mxu1  ;;  %6980 = vmatprep.subr.mxu1 %v4739_v2 }
0x2282   :  { %v4589_v33 = vadd.f32 %v4580_v32, %v4173_v15  ;;  %v4592_v34 = vadd.f32 %v4590_v31, %v7779_v51  ;;  %6981 = vmatpush3.msra.mxu1 %v4739_v2  ;;  %v4737_v15 = vld [vmem:[#allocation5 + $0x740] sm:$0xff]  ;;  %v5861_v32 = vld [vmem:[#allocation7 + $0x13] ss:$0 sm:$0xff] }
0x2283   :  { %6982 = vmatprep.subr.mxu1 %v4738_v3  ;;  %v4729_v31 = vld [vmem:[#allocation5 + $0x700] sm:$0xff] }
0x2284   :  { %4597 = vadd.xlane.f32.xlu0 %v4592_v34  ;;  %v4591_v35 = vadd.f32 %v4589_v33, %v7777_v50  ;;  %6983 = vmatpush3.msra.mxu1 %v4738_v3  ;;  %v4884_v2 = vld [vmem:[#allocation5 + $0x7a0] sm:$0xff]  ;;  %v4883_v3 = vld [vmem:[#allocation5 + $0x798] sm:$0xff] }
0x2285   :  { %6984 = vmatprep.subr.mxu1 %v4737_v15 }
0x2286   :  { %4595 = vadd.xlane.f32.xlu1 %v4591_v35  ;;  %6985 = vmatpush3.msra.mxu1 %v4737_v15  ;;  %v4882_v15 = vld [vmem:[#allocation5 + $0x790] sm:$0xff] }
0x2287   :  { %6986 = vmatprep.subr.mxu1 %v4736_v4 }
0x2288   :  { %6987 = vmatpush3.msra.mxu1 %v4736_v4  ;;  %v4881_v4 = vld [vmem:[#allocation5 + $0x788] sm:$0xff] }
0x2289   :  { %6988 = vmatprep.subr.mxu1 %v4735_v14 }
0x228a   :  { %6989 = vmatpush3.msra.mxu1 %v4735_v14  ;;  %v4880_v14 = vld [vmem:[#allocation5 + $0x780] sm:$0xff] }
0x228b   :  { %6990 = vmatprep.subr.mxu1 %v4734_v5 }
0x228c   :  { %6991 = vmatpush3.msra.mxu1 %v4734_v5  ;;  %v4992_v5 = vld [vmem:[#allocation5 + $0x878] sm:$0xff] }
0x228d   :  { %6992 = vmatprep.subr.mxu1 %v4733_v6 }
0x228e   :  { %6993 = vmatpush3.msra.mxu1 %v4733_v6  ;;  %v4991_v6 = vld [vmem:[#allocation5 + $0x870] sm:$0xff] }
0x228f   :  { %6994 = vmatprep.subr.mxu1 %v4732_v27 }
0x2290   :  { %6995 = vmatpush3.msra.mxu1 %v4732_v27 }
0x2291   :  { %6996 = vmatprep.subr.mxu1 %v4731_v28 }
0x2292   :  { %6997 = vmatpush3.msra.mxu1 %v4731_v28 }
0x2293   :  { %6998 = vmatprep.subr.mxu1 %v4730_v30 }
0x2294   :  { %6999 = vmatpush3.msra.mxu1 %v4730_v30  ;;  %v5863_v30 = vld [vmem:[#allocation7 + $0x15] ss:$0 sm:$0xff] }
0x2295   :  { %7000 = vmatprep.subr.mxu1 %v4729_v31 }
0x2296   :  { %7001 = vmatpush3.msra.mxu1 %v4729_v31 }
0x2297   :  { %7040 = vmatprep.subr.mxu1 %v7522_v16 }
0x230d   :  { %v4598_v39 = vpop.xlane.xlu0 %4597 }
0x230e   :  { %v4600_v40 = vmul.f32 0.03125, %v4598_v39  ;;  %v5862_v39 = vld [vmem:[#allocation7 + $0x14] ss:$0 sm:$0xff] }
0x230f   :  { %v4596_v41 = vpop.xlane.xlu1 %4595 }
0x2310   :  { %v4602_v42 = vsub.f32 %v4592_v34, %v4600_v40  ;;  %v4599_v43 = vmul.f32 0.03125, %v4596_v41 }
0x2312   :  { %v4601_v44 = vsub.f32 %v4591_v35, %v4599_v43  ;;  %v7941_v51 = vsel %vm2561_vm5, %v4602_v42, 0.0 }
0x2313   :  { %v4606_v50 = vmul.f32 %v7941_v51, %v7941_v51 }
0x2314   :  { %v7947_v45 = vsel %vm2561_vm5, %v4601_v44, 0.0 }
0x2315   :  { %4609 = vadd.xlane.f32.xlu1 %v4606_v50  ;;  %v4605_v46 = vmul.f32 %v7947_v45, %v7947_v45 }
0x2317   :  { %4607 = vadd.xlane.f32.xlu0 %v4605_v46 }
0x239e   :  { %v4610_v7 = vpop.xlane.xlu1 %4609 }
0x239f   :  { %v4612_v9 = vmul.f32 0.03125, %v4610_v7  ;;  %v4990_v7 = vld [vmem:[#allocation5 + $0x868] sm:$0xff] }
0x23a0   :  { %v4608_v10 = vpop.xlane.xlu0 %4607 }
0x23a1   :  { %v4614_v11 = vadd.f32 1e-05, %v4612_v9  ;;  %v4611_v12 = vmul.f32 0.03125, %v4608_v10  ;;  %v4989_v9 = vld [vmem:[#allocation5 + $0x860] sm:$0xff]  ;;  %v4988_v10 = vld [vmem:[#allocation5 + $0x858] sm:$0xff] }
0x23a3   :  { %7415 = vrsqrt.f32 %v4614_v11  ;;  %v4613_v13 = vadd.f32 1e-05, %v4611_v12  ;;  %v4987_v11 = vld [vmem:[#allocation5 + $0x850] sm:$0xff]  ;;  %v4986_v12 = vld [vmem:[#allocation5 + $0x848] sm:$0xff] }
0x23a5   :  { %7417 = vrsqrt.f32 %v4613_v13  ;;  %v4985_v13 = vld [vmem:[#allocation5 + $0x840] sm:$0xff] }
0x23b0   :  { %v7416_v17 = vpop.eup %7415 }
0x23b1   :  { %v4618_v20 = vmul.f32 %v7416_v17, %v7941_v51  ;;  %v4984_v17 = vld [vmem:[#allocation5 + $0x838] sm:$0xff] }
0x23b2   :  { %v7418_v22 = vpop.eup %7417 }
0x23b3   :  { %v4617_v53 = vmul.f32 %v7418_v22, %v7947_v45  ;;  %v4624_v23 = vmul.f32 %v5859_v18, %v4618_v20  ;;  %v4982_v20 = vld [vmem:[#allocation5 + $0x828] sm:$0xff]  ;;  %v4981_v22 = vld [vmem:[#allocation5 + $0x820] sm:$0xff] }
0x23b5   :  { %v4623_v25 = vmul.f32 %v5859_v18, %v4617_v53  ;;  %v4630_v55 = vadd.f32 %v5860_v24, %v4624_v23  ;;  %v4983_v18 = vld [vmem:[#allocation5 + $0x830] sm:$0xff]  ;;  %v4980_v53 = vld [vmem:[#allocation5 + $0x818] sm:$0xff] }
0x23b7   :  { %v4629_v26 = vadd.f32 %v5860_v24, %v4623_v25 }
0x23b9   :  { %6967 = vmatprep.mubr.f32.mxu0 %v4629_v26 }
0x23ba   :  { %6968 = vmatmul.mubr.f32.vlgmr.msra.gmra.mxu0 %v4630_v55 }
0x23bb   :  { %7037 = vmatprep.mubr.msk.f32.mxu0 %vm7523_vm3, %v7522_v16  ;;  %7006 = vmatpush3.msra.mxu0 %v4895_v54  ;;  %v4977_v54 = vld [vmem:[#allocation5 + $0x800] sm:$0xff] }
0x23bc   :  { %7007 = vmatprep.subr.mxu0 %v7522_v16 }
0x23bd   :  { %7008 = vmatpush3.msra.mxu0 %v4894_v56  ;;  %v5084_v56 = vld [vmem:[#allocation5 + $0x8f8] sm:$0xff] }
0x23be   :  { %7009 = vmatprep.subr.mxu0 %v7522_v16 }
0x23bf   :  { %7010 = vmatpush3.msra.mxu0 %v4893_v57  ;;  %v5083_v57 = vld [vmem:[#allocation5 + $0x8f0] sm:$0xff] }
0x23c0   :  { %7011 = vmatprep.subr.mxu0 %v7522_v16 }
0x23c1   :  { %7012 = vmatpush3.msra.mxu0 %v4892_v58  ;;  %v5082_v58 = vld [vmem:[#allocation5 + $0x8e8] sm:$0xff] }
0x23c2   :  { %7013 = vmatprep.subr.mxu0 %v7522_v16 }
0x23c3   :  { %7014 = vmatpush3.msra.mxu0 %v4891_v59  ;;  %v5081_v59 = vld [vmem:[#allocation5 + $0x8e0] sm:$0xff] }
0x23c4   :  { %7015 = vmatprep.subr.mxu0 %v7522_v16 }
0x23c5   :  { %7016 = vmatpush3.msra.mxu0 %v4890_v60  ;;  %v5080_v60 = vld [vmem:[#allocation5 + $0x8d8] sm:$0xff] }
0x23c6   :  { %7017 = vmatprep.subr.mxu0 %v7522_v16 }
0x23c7   :  { %7018 = vmatpush3.msra.mxu0 %v4889_v61  ;;  %v5079_v61 = vld [vmem:[#allocation5 + $0x8d0] sm:$0xff] }
0x23c8   :  { %7019 = vmatprep.subr.mxu0 %v7522_v16 }
0x23c9   :  { %7020 = vmatpush3.msra.mxu0 %v4888_v62  ;;  %v5078_v62 = vld [vmem:[#allocation5 + $0x8c8] sm:$0xff] }
0x23ca   :  { %7021 = vmatprep.subr.mxu0 %v7522_v16 }
0x23cb   :  { %7022 = vmatpush3.msra.mxu0 %v4887_v63  ;;  %v5077_v63 = vld [vmem:[#allocation5 + $0x8c0] sm:$0xff] }
0x23cc   :  { %7023 = vmatprep.subr.mxu0 %v7522_v16 }
0x23cd   :  { %7024 = vmatpush3.msra.mxu0 %v4886_v0  ;;  %v5076_v0 = vld [vmem:[#allocation5 + $0x8b8] sm:$0xff] }
0x23ce   :  { %7025 = vmatprep.subr.mxu0 %v7522_v16 }
0x23cf   :  { %7026 = vmatpush3.msra.mxu0 %v4885_v1  ;;  %v5075_v1 = vld [vmem:[#allocation5 + $0x8b0] sm:$0xff] }
0x23d0   :  { %7027 = vmatprep.subr.mxu0 %v7522_v16 }
0x23d1   :  { %7028 = vmatpush3.msra.mxu0 %v4884_v2  ;;  %v5074_v2 = vld [vmem:[#allocation5 + $0x8a8] sm:$0xff] }
0x23d2   :  { %7029 = vmatprep.subr.mxu0 %v7522_v16 }
0x23d3   :  { %7030 = vmatpush3.msra.mxu0 %v4883_v3  ;;  %v5073_v3 = vld [vmem:[#allocation5 + $0x8a0] sm:$0xff] }
0x23d4   :  { %7031 = vmatprep.subr.mxu0 %v7522_v16 }
0x23d5   :  { %7032 = vmatpush3.msra.mxu0 %v4882_v15  ;;  %v5072_v15 = vld [vmem:[#allocation5 + $0x898] sm:$0xff] }
0x23d6   :  { %7033 = vmatprep.subr.mxu0 %v7522_v16 }
0x23d7   :  { %7034 = vmatpush3.msra.mxu0 %v4881_v4  ;;  %v5071_v4 = vld [vmem:[#allocation5 + $0x890] sm:$0xff] }
0x23d8   :  { %7035 = vmatprep.subr.mxu0 %v7522_v16 }
0x23d9   :  { %7036 = vmatpush3.msra.mxu0 %v4880_v14  ;;  %v5865_v14 = vld [vmem:[#allocation7 + $0x17] ss:$0 sm:$0xff] }
0x23da   :  { %7075 = vmatprep.subr.mxu0 %v7522_v16 }
0x247a   :  { %v6969_v33 = vpop.f32.mrf.mxu0 }
0x247b   :  { %v4724_v34 = vadd.f32 %v6969_v33, %v5861_v32  ;;  %v5864_v33 = vld [vmem:[#allocation7 + $0x16] ss:$0 sm:$0xff] }
0x247c   :  { %v4718_v35 = vpop.f32.mrf.mxu0 }
0x247d   :  { %v4719_v36 = vadd.f32 %v5861_v32, %v4718_v35  ;;  %v4728_v38 = vmax.f32 %v4724_v34, 0.0 }
0x247f   :  { %v4727_v37 = vmax.f32 %v4719_v36, 0.0 }
0x2481   :  { %7002 = vmatprep.mubr.f32.mxu1 %v4727_v37 }
0x2482   :  { %7003 = vmatmul.mubr.f32.vlgmr.msra.gmra.mxu1 %v4728_v38 }
0x2483   :  { %7072 = vmatprep.mubr.msk.f32.mxu1 %vm7523_vm3, %v7522_v16  ;;  %7041 = vmatpush3.msra.mxu1 %v4992_v5 }
0x2484   :  { %7042 = vmatprep.subr.mxu1 %v7522_v16 }
0x2485   :  { %7043 = vmatpush3.msra.mxu1 %v4991_v6 }
0x2486   :  { %7044 = vmatprep.subr.mxu1 %v7522_v16 }
0x2487   :  { %7045 = vmatpush3.msra.mxu1 %v4990_v7 }
0x2488   :  { %7046 = vmatprep.subr.mxu1 %v7522_v16 }
0x2489   :  { %7047 = vmatpush3.msra.mxu1 %v4989_v9 }
0x248a   :  { %7048 = vmatprep.subr.mxu1 %v7522_v16 }
0x248b   :  { %7049 = vmatpush3.msra.mxu1 %v4988_v10  ;;  %v5070_v10 = vld [vmem:[#allocation5 + $0x888] sm:$0xff] }
0x248c   :  { %7050 = vmatprep.subr.mxu1 %v7522_v16 }
0x248d   :  { %7051 = vmatpush3.msra.mxu1 %v4987_v11  ;;  %v5069_v11 = vld [vmem:[#allocation5 + $0x880] sm:$0xff] }
0x248e   :  { %7052 = vmatprep.subr.mxu1 %v7522_v16 }
0x248f   :  { %7053 = vmatpush3.msra.mxu1 %v4986_v12  ;;  %v5866_v12 = vld [vmem:[#allocation7 + $0x18] ss:$0 sm:$0xff] }
0x2490   :  { %7054 = vmatprep.subr.mxu1 %v7522_v16 }
0x2491   :  { %7055 = vmatpush3.msra.mxu1 %v4985_v13 }
0x2492   :  { %7056 = vmatprep.subr.mxu1 %v7522_v16 }
0x2493   :  { %7057 = vmatpush3.msra.mxu1 %v4984_v17 }
0x2494   :  { %7058 = vmatprep.subr.mxu1 %v7522_v16 }
0x2495   :  { %7059 = vmatpush3.msra.mxu1 %v4983_v18 }
0x2496   :  { %7060 = vmatprep.subr.mxu1 %v7522_v16 }
0x2497   :  { %7061 = vmatpush3.msra.mxu1 %v4982_v20 }
0x2498   :  { %7062 = vmatprep.subr.mxu1 %v7522_v16 }
0x2499   :  { %7063 = vmatpush3.msra.mxu1 %v4981_v22  ;;  %v5193_v22 = vld [vmem:[#allocation5 + $0x978] sm:$0xff] }
0x249a   :  { %7064 = vmatprep.subr.mxu1 %v7522_v16 }
0x249b   :  { %7065 = vmatpush3.msra.mxu1 %v4980_v53  ;;  %v5192_v53 = vld [vmem:[#allocation5 + $0x970] sm:$0xff] }
0x249c   :  { %7066 = vmatprep.subr.mxu1 %v7522_v16 }
0x2542   :  { %v7004_v40 = vpop.f32.mrf.mxu1 }
0x2543   :  { %v4822_v41 = vadd.f32 %v7004_v40, %v5862_v39 }
0x2544   :  { %v4816_v42 = vpop.f32.mrf.mxu1 }
0x2545   :  { %v4817_v43 = vadd.f32 %v5862_v39, %v4816_v42  ;;  %v4826_v44 = vadd.f32 %v4822_v41, %v4630_v55 }
0x2547   :  { %4831 = vadd.xlane.f32.xlu1 %v4826_v44  ;;  %v4825_v51 = vadd.f32 %v4817_v43, %v4629_v26 }
0x2549   :  { %4829 = vadd.xlane.f32.xlu0 %v4825_v51 }
0x25d0   :  { %v4832_v50 = vpop.xlane.xlu1 %4831 }
0x25d1   :  { %v4834_v45 = vmul.f32 0.03125, %v4832_v50 }
0x25d2   :  { %v4830_v46 = vpop.xlane.xlu0 %4829 }
0x25d3   :  { %v4836_v29 = vsub.f32 %v4826_v44, %v4834_v45  ;;  %v4833_v47 = vmul.f32 0.03125, %v4830_v46 }
0x25d5   :  { %v4835_v48 = vsub.f32 %v4825_v51, %v4833_v47  ;;  %v7961_v19 = vsel %vm2561_vm5, %v4836_v29, 0.0 }
0x25d6   :  { %v4840_v49 = vmul.f32 %v7961_v19, %v7961_v19 }
0x25d7   :  { %v7967_v52 = vsel %vm2561_vm5, %v4835_v48, 0.0 }
0x25d8   :  { %4843 = vadd.xlane.f32.xlu1 %v4840_v49  ;;  %v4839_v21 = vmul.f32 %v7967_v52, %v7967_v52 }
0x25da   :  { %4841 = vadd.xlane.f32.xlu0 %v4839_v21  ;;  %v4978_v21 = vld [vmem:[#allocation5 + $0x808] sm:$0xff] }
0x2661   :  { %v4844_v23 = vpop.xlane.xlu1 %4843 }
0x2662   :  { %v4846_v24 = vmul.f32 0.03125, %v4844_v23  ;;  %v5191_v23 = vld [vmem:[#allocation5 + $0x968] sm:$0xff] }
0x2663   :  { %v4842_v25 = vpop.xlane.xlu0 %4841 }
0x2664   :  { %v4848_v26 = vadd.f32 1e-05, %v4846_v24  ;;  %v4845_v55 = vmul.f32 0.03125, %v4842_v25  ;;  %v5190_v24 = vld [vmem:[#allocation5 + $0x960] sm:$0xff]  ;;  %v5189_v25 = vld [vmem:[#allocation5 + $0x958] sm:$0xff] }
0x2666   :  { %7419 = vrsqrt.f32 %v4848_v26  ;;  %v4847_v27 = vadd.f32 1e-05, %v4845_v55  ;;  %v5188_v26 = vld [vmem:[#allocation5 + $0x950] sm:$0xff]  ;;  %v5187_v55 = vld [vmem:[#allocation5 + $0x948] sm:$0xff] }
0x2668   :  { %7421 = vrsqrt.f32 %v4847_v27  ;;  %v5186_v27 = vld [vmem:[#allocation5 + $0x940] sm:$0xff] }
0x2673   :  { %v7420_v28 = vpop.eup %7419 }
0x2674   :  { %v4852_v31 = vmul.f32 %v7420_v28, %v7961_v19  ;;  %v5185_v28 = vld [vmem:[#allocation5 + $0x938] sm:$0xff] }
0x2675   :  { %v7422_v32 = vpop.eup %7421 }
0x2676   :  { %v4851_v34 = vmul.f32 %v7422_v32, %v7967_v52  ;;  %v4858_v35 = vmul.f32 %v5863_v30, %v4852_v31  ;;  %v4979_v52 = vld [vmem:[#allocation5 + $0x810] sm:$0xff]  ;;  %v5183_v31 = vld [vmem:[#allocation5 + $0x928] sm:$0xff]  ;;  %v5182_v32 = vld [vmem:[#allocation5 + $0x920] sm:$0xff] }
0x2677   :  { %7067 = vmatpush3.msra.mxu1 %v4979_v52 }
0x2678   :  { %v4857_v36 = vmul.f32 %v5863_v30, %v4851_v34  ;;  %v4864_v37 = vadd.f32 %v5864_v33, %v4858_v35  ;;  %7068 = vmatprep.subr.mxu1 %v7522_v16  ;;  %v5184_v30 = vld [vmem:[#allocation5 + $0x930] sm:$0xff]  ;;  %v5179_v35 = vld [vmem:[#allocation5 + $0x908] sm:$0xff] }
0x2679   :  { %7069 = vmatpush3.msra.mxu1 %v4978_v21  ;;  %v5180_v34 = vld [vmem:[#allocation5 + $0x910] sm:$0xff] }
0x267a   :  { %v4863_v38 = vadd.f32 %v5864_v33, %v4857_v36  ;;  %v4871_v39 = vrot.slane %v4864_v37, 4  ;;  %7070 = vmatprep.subr.mxu1 %v7522_v16  ;;  %v5181_v33 = vld [vmem:[#allocation5 + $0x918] sm:$0xff]  ;;  %v5178_v36 = vld [vmem:[#allocation5 + $0x900] sm:$0xff] }
0x267b   :  { %7071 = vmatpush3.msra.mxu1 %v4977_v54 }
0x267c   :  { %v4865_v40 = vrot.slane %v4863_v38, 4  ;;  %v4872_v41 = vadd.f32 %v4871_v39, %v4864_v37  ;;  %7110 = vmatprep.subr.mxu1 %v7522_v16  ;;  %v5867_v37 = vld [vmem:[#allocation7 + $0x19] ss:$0 sm:$0xff] }
0x267e   :  { %v4866_v42 = vadd.f32 %v4865_v40, %v4863_v38  ;;  %v4873_v43 = vrot.slane %v4872_v41, 2 }
0x2680   :  { %v4867_v44 = vrot.slane %v4866_v42, 2  ;;  %v4874_v51 = vadd.f32 %v4873_v43, %v4872_v41 }
0x2682   :  { %v4868_v50 = vadd.f32 %v4867_v44, %v4866_v42  ;;  %v4875_v45 = vrot.slane %v4874_v51, 1 }
0x2684   :  { %v4869_v46 = vrot.slane %v4868_v50, 1  ;;  %v4876_v29 = vadd.f32 %v4875_v45, %v4874_v51  ;;  %v5209_v51 = vld [vmem:[#allocation5 + $0x9f8] sm:$0xff]  ;;  %v5207_v45 = vld [vmem:[#allocation5 + $0x9e8] sm:$0xff] }
0x2686   :  { %v4870_v47 = vadd.f32 %v4869_v46, %v4868_v50  ;;  %v4879_v19 = vmul.f32 0.125, %v4876_v29  ;;  %v5208_v50 = vld [vmem:[#allocation5 + $0x9f0] sm:$0xff]  ;;  %v5206_v46 = vld [vmem:[#allocation5 + $0x9e0] sm:$0xff]  ;;  %v5205_v29 = vld [vmem:[#allocation5 + $0x9d8] sm:$0xff] }
0x2688   :  { %v4878_v48 = vmul.f32 0.125, %v4870_v47  ;;  %v5204_v47 = vld [vmem:[#allocation5 + $0x9d0] sm:$0xff] }
0x268a   :  { %v8002_v49 = vsel %vm4903_vm6, %v4879_v19, %v4878_v48  ;;  %v5203_v48 = vld [vmem:[#allocation5 + $0x9c8] sm:$0xff]  ;;  %v5202_v19 = vld [vmem:[#allocation5 + $0x9c0] sm:$0xff] }
0x268b   :  { %7038 = vmatmul.mubr.f32.vlgmr.msra.gmra.mxu0 %v8002_v49 }
0x268c   :  { %7107 = vmatprep.mubr.msk.f32.mxu0 %vm7523_vm3, %v7522_v16  ;;  %7076 = vmatpush3.msra.mxu0 %v5084_v56 }
0x268d   :  { %7077 = vmatprep.subr.mxu0 %v7522_v16 }
0x268e   :  { %7078 = vmatpush3.msra.mxu0 %v5083_v57  ;;  %v5201_v57 = vld [vmem:[#allocation5 + $0x9b8] sm:$0xff] }
0x268f   :  { %7079 = vmatprep.subr.mxu0 %v7522_v16 }
0x2690   :  { %7080 = vmatpush3.msra.mxu0 %v5082_v58  ;;  %v5200_v58 = vld [vmem:[#allocation5 + $0x9b0] sm:$0xff] }
0x2691   :  { %7081 = vmatprep.subr.mxu0 %v7522_v16 }
0x2692   :  { %7082 = vmatpush3.msra.mxu0 %v5081_v59  ;;  %v5199_v59 = vld [vmem:[#allocation5 + $0x9a8] sm:$0xff] }
0x2693   :  { %7083 = vmatprep.subr.mxu0 %v7522_v16 }
0x2694   :  { %7084 = vmatpush3.msra.mxu0 %v5080_v60  ;;  %v5198_v60 = vld [vmem:[#allocation5 + $0x9a0] sm:$0xff] }
0x2695   :  { %7085 = vmatprep.subr.mxu0 %v7522_v16 }
0x2696   :  { %7086 = vmatpush3.msra.mxu0 %v5079_v61  ;;  %v5197_v61 = vld [vmem:[#allocation5 + $0x998] sm:$0xff] }
0x2697   :  { %7087 = vmatprep.subr.mxu0 %v7522_v16 }
0x2698   :  { %7088 = vmatpush3.msra.mxu0 %v5078_v62  ;;  %v5196_v62 = vld [vmem:[#allocation5 + $0x990] sm:$0xff] }
0x2699   :  { %7089 = vmatprep.subr.mxu0 %v7522_v16 }
0x269a   :  { %7090 = vmatpush3.msra.mxu0 %v5077_v63  ;;  %v5195_v63 = vld [vmem:[#allocation5 + $0x988] sm:$0xff] }
0x269b   :  { %7091 = vmatprep.subr.mxu0 %v7522_v16 }
0x269c   :  { %7092 = vmatpush3.msra.mxu0 %v5076_v0  ;;  %v5194_v0 = vld [vmem:[#allocation5 + $0x980] sm:$0xff] }
0x269d   :  { %7093 = vmatprep.subr.mxu0 %v7522_v16 }
0x269e   :  { %7094 = vmatpush3.msra.mxu0 %v5075_v1 }
0x269f   :  { %7095 = vmatprep.subr.mxu0 %v7522_v16 }
0x26a0   :  { %7096 = vmatpush3.msra.mxu0 %v5074_v2 }
0x26a1   :  { %7097 = vmatprep.subr.mxu0 %v7522_v16 }
0x26a2   :  { %7098 = vmatpush3.msra.mxu0 %v5073_v3 }
0x26a3   :  { %7099 = vmatprep.subr.mxu0 %v7522_v16 }
0x26a4   :  { %7100 = vmatpush3.msra.mxu0 %v5072_v15  ;;  %v5372_v15 = vld [vmem:[#allocation5 + $0xa78] sm:$0xff] }
0x26a5   :  { %7101 = vmatprep.subr.mxu0 %v7522_v16 }
0x26a6   :  { %7102 = vmatpush3.msra.mxu0 %v5071_v4  ;;  %v5371_v4 = vld [vmem:[#allocation5 + $0xa70] sm:$0xff] }
0x26a7   :  { %7103 = vmatprep.subr.mxu0 %v7522_v16 }
0x26a8   :  { %7104 = vmatpush3.msra.mxu0 %v5070_v10  ;;  %v5365_v10 = vld [vmem:[#allocation5 + $0xa40] sm:$0xff] }
0x26a9   :  { %7105 = vmatprep.subr.mxu0 %v7522_v16 }
0x26aa   :  { %7106 = vmatpush3.msra.mxu0 %v5069_v11  ;;  %v5364_v11 = vld [vmem:[#allocation5 + $0xa38] sm:$0xff] }
0x26ab   :  { %7145 = vmatprep.subr.mxu0 %v7522_v16 }
0x274b   :  { %v4972_v5 = vpop.f32.mrf.mxu0 }
0x274c   :  { %v4973_v6 = vadd.f32 %v5865_v14, %v4972_v5  ;;  %v5370_v14 = vld [vmem:[#allocation5 + $0xa68] sm:$0xff]  ;;  %v5369_v5 = vld [vmem:[#allocation5 + $0xa60] sm:$0xff] }
0x274d   :  { %v7039_v7 = vpop.f32.mrf.mxu0 }
0x274e   :  { %v4976_v9 = vmax.f32 %v4973_v6, 0.0  ;;  %v5368_v6 = vld [vmem:[#allocation5 + $0xa58] sm:$0xff]  ;;  %v5367_v7 = vld [vmem:[#allocation5 + $0xa50] sm:$0xff] }
0x2750   :  { %7073 = vmatmul.mubr.f32.vlgmr.msra.gmra.mxu1 %v4976_v9  ;;  %v5366_v9 = vld [vmem:[#allocation5 + $0xa48] sm:$0xff] }
0x2751   :  { %7142 = vmatprep.mubr.msk.f32.mxu1 %vm7523_vm3, %v7522_v16  ;;  %7111 = vmatpush3.msra.mxu1 %v5209_v51  ;;  %v5448_v51 = vld [vmem:[#allocation5 + $0xa80] sm:$0xff] }
0x2752   :  { %7112 = vmatprep.subr.mxu1 %v7522_v16 }
0x2753   :  { %7113 = vmatpush3.msra.mxu1 %v5208_v50  ;;  %v5555_v50 = vld [vmem:[#allocation5 + $0xb78] sm:$0xff] }
0x2754   :  { %7114 = vmatprep.subr.mxu1 %v7522_v16 }
0x2755   :  { %7115 = vmatpush3.msra.mxu1 %v5207_v45  ;;  %v5554_v45 = vld [vmem:[#allocation5 + $0xb70] sm:$0xff] }
0x2756   :  { %7116 = vmatprep.subr.mxu1 %v7522_v16 }
0x2757   :  { %7117 = vmatpush3.msra.mxu1 %v5206_v46  ;;  %v5552_v46 = vld [vmem:[#allocation5 + $0xb60] sm:$0xff] }
0x2758   :  { %7118 = vmatprep.subr.mxu1 %v7522_v16 }
0x2759   :  { %7119 = vmatpush3.msra.mxu1 %v5205_v29  ;;  %v5551_v29 = vld [vmem:[#allocation5 + $0xb58] sm:$0xff] }
0x275a   :  { %7120 = vmatprep.subr.mxu1 %v7522_v16 }
0x275b   :  { %7121 = vmatpush3.msra.mxu1 %v5204_v47  ;;  %v5550_v47 = vld [vmem:[#allocation5 + $0xb50] sm:$0xff] }
0x275c   :  { %7122 = vmatprep.subr.mxu1 %v7522_v16 }
0x275d   :  { %7123 = vmatpush3.msra.mxu1 %v5203_v48  ;;  %v5549_v48 = vld [vmem:[#allocation5 + $0xb48] sm:$0xff] }
0x275e   :  { %7124 = vmatprep.subr.mxu1 %v7522_v16 }
0x275f   :  { %7125 = vmatpush3.msra.mxu1 %v5202_v19  ;;  %v5548_v19 = vld [vmem:[#allocation5 + $0xb40] sm:$0xff] }
0x2760   :  { %7126 = vmatprep.subr.mxu1 %v7522_v16 }
0x2761   :  { %7127 = vmatpush3.msra.mxu1 %v5201_v57  ;;  %v5869_v57 = vld [vmem:[#allocation7 + $0x1b] ss:$0 sm:$0xff] }
0x2762   :  { %7128 = vmatprep.subr.mxu1 %v7522_v16 }
0x2763   :  { %7129 = vmatpush3.msra.mxu1 %v5200_v58 }
0x2764   :  { %7130 = vmatprep.subr.mxu1 %v7522_v16 }
0x2765   :  { %7131 = vmatpush3.msra.mxu1 %v5199_v59 }
0x2766   :  { %7132 = vmatprep.subr.mxu1 %v7522_v16 }
0x2767   :  { %7133 = vmatpush3.msra.mxu1 %v5198_v60 }
0x2768   :  { %7134 = vmatprep.subr.mxu1 %v7522_v16 }
0x2769   :  { %7135 = vmatpush3.msra.mxu1 %v5197_v61  ;;  %v5542_v61 = vld [vmem:[#allocation5 + $0xb10] sm:$0xff] }
0x276a   :  { %7136 = vmatprep.subr.mxu1 %v7522_v16 }
0x276b   :  { %7137 = vmatpush3.msra.mxu1 %v5196_v62  ;;  %v5541_v62 = vld [vmem:[#allocation5 + $0xb08] sm:$0xff] }
0x276c   :  { %7138 = vmatprep.subr.mxu1 %v7522_v16 }
0x276d   :  { %7139 = vmatpush3.msra.mxu1 %v5195_v63  ;;  %v5540_v63 = vld [vmem:[#allocation5 + $0xb00] sm:$0xff] }
0x276e   :  { %7140 = vmatprep.subr.mxu1 %v7522_v16 }
0x276f   :  { %7141 = vmatpush3.msra.mxu1 %v5194_v0  ;;  %v5647_v0 = vld [vmem:[#allocation5 + $0xbf8] sm:$0xff] }
0x2770   :  { %7180 = vmatprep.subr.mxu1 %v7522_v16 }
0x2810   :  { %v5064_v13 = vpop.f32.mrf.mxu1 }
0x2811   :  { %v5065_v17 = vadd.f32 %v5866_v12, %v5064_v13  ;;  %v5363_v12 = vld [vmem:[#allocation5 + $0xa30] sm:$0xff]  ;;  %v5362_v13 = vld [vmem:[#allocation5 + $0xa28] sm:$0xff] }
0x2812   :  { %v7074_v18 = vpop.f32.mrf.mxu1 }
0x2813   :  { %v5068_v20 = vmax.f32 %v5065_v17, 0.0  ;;  %v5361_v17 = vld [vmem:[#allocation5 + $0xa20] sm:$0xff]  ;;  %v5360_v18 = vld [vmem:[#allocation5 + $0xa18] sm:$0xff] }
0x2815   :  { %7108 = vmatmul.mubr.f32.vlgmr.msra.gmra.mxu0 %v5068_v20  ;;  %v5359_v20 = vld [vmem:[#allocation5 + $0xa10] sm:$0xff] }
0x2816   :  { %7146 = vmatpush3.msra.mxu0 %v5193_v22  ;;  %7177 = vmatprep.mubr.msk.f32.mxu0 %vm7523_vm3, %v7522_v16  ;;  %v5358_v22 = vld [vmem:[#allocation5 + $0xa08] sm:$0xff] }
0x2817   :  { %7147 = vmatprep.subr.mxu0 %v7522_v16 }
0x2818   :  { %7148 = vmatpush3.msra.mxu0 %v5192_v53  ;;  %v5357_v53 = vld [vmem:[#allocation5 + $0xa00] sm:$0xff] }
0x2819   :  { %7149 = vmatprep.subr.mxu0 %v7522_v16 }
0x281a   :  { %7150 = vmatpush3.msra.mxu0 %v5191_v23  ;;  %v5463_v23 = vld [vmem:[#allocation5 + $0xaf8] sm:$0xff] }
0x281b   :  { %7151 = vmatprep.subr.mxu0 %v7522_v16 }
0x281c   :  { %7152 = vmatpush3.msra.mxu0 %v5190_v24  ;;  %v5462_v24 = vld [vmem:[#allocation5 + $0xaf0] sm:$0xff] }
0x281d   :  { %7153 = vmatprep.subr.mxu0 %v7522_v16 }
0x281e   :  { %7154 = vmatpush3.msra.mxu0 %v5189_v25  ;;  %v5461_v25 = vld [vmem:[#allocation5 + $0xae8] sm:$0xff] }
0x281f   :  { %7155 = vmatprep.subr.mxu0 %v7522_v16 }
0x2820   :  { %7156 = vmatpush3.msra.mxu0 %v5188_v26  ;;  %v5460_v26 = vld [vmem:[#allocation5 + $0xae0] sm:$0xff] }
0x2821   :  { %7157 = vmatprep.subr.mxu0 %v7522_v16 }
0x2822   :  { %7158 = vmatpush3.msra.mxu0 %v5187_v55  ;;  %v5459_v55 = vld [vmem:[#allocation5 + $0xad8] sm:$0xff] }
0x2823   :  { %7159 = vmatprep.subr.mxu0 %v7522_v16 }
0x2824   :  { %7160 = vmatpush3.msra.mxu0 %v5186_v27  ;;  %v5458_v27 = vld [vmem:[#allocation5 + $0xad0] sm:$0xff] }
0x2825   :  { %7161 = vmatprep.subr.mxu0 %v7522_v16 }
0x2826   :  { %7162 = vmatpush3.msra.mxu0 %v5185_v28  ;;  %v5457_v28 = vld [vmem:[#allocation5 + $0xac8] sm:$0xff] }
0x2827   :  { %7163 = vmatprep.subr.mxu0 %v7522_v16 }
0x2828   :  { %7164 = vmatpush3.msra.mxu0 %v5184_v30  ;;  %v5456_v30 = vld [vmem:[#allocation5 + $0xac0] sm:$0xff] }
0x2829   :  { %7165 = vmatprep.subr.mxu0 %v7522_v16 }
0x282a   :  { %7166 = vmatpush3.msra.mxu0 %v5183_v31  ;;  %v5455_v31 = vld [vmem:[#allocation5 + $0xab8] sm:$0xff] }
0x282b   :  { %7167 = vmatprep.subr.mxu0 %v7522_v16 }
0x282c   :  { %7168 = vmatpush3.msra.mxu0 %v5182_v32  ;;  %v5454_v32 = vld [vmem:[#allocation5 + $0xab0] sm:$0xff] }
0x282d   :  { %7169 = vmatprep.subr.mxu0 %v7522_v16 }
0x282e   :  { %7170 = vmatpush3.msra.mxu0 %v5181_v33  ;;  %v5453_v33 = vld [vmem:[#allocation5 + $0xaa8] sm:$0xff] }
0x282f   :  { %7171 = vmatprep.subr.mxu0 %v7522_v16 }
0x2830   :  { %7172 = vmatpush3.msra.mxu0 %v5180_v34  ;;  %v5452_v34 = vld [vmem:[#allocation5 + $0xaa0] sm:$0xff] }
0x2831   :  { %7173 = vmatprep.subr.mxu0 %v7522_v16 }
0x2832   :  { %7174 = vmatpush3.msra.mxu0 %v5179_v35  ;;  %v5451_v35 = vld [vmem:[#allocation5 + $0xa98] sm:$0xff] }
0x2833   :  { %7175 = vmatprep.subr.mxu0 %v7522_v16 }
0x2834   :  { %7176 = vmatpush3.msra.mxu0 %v5178_v36  ;;  %v5450_v36 = vld [vmem:[#allocation5 + $0xa90] sm:$0xff] }
0x2835   :  { %7178 = vmatmul.mubr.f32.vlgmr.msra.gmra.mxu0 %v8002_v49  ;;  %7215 = vmatprep.subr.mxu0 %v7522_v16 }
0x2836   :  { %7247 = vmatprep.mubr.msk.f32.mxu0 %vm7523_vm3, %v7522_v16  ;;  %7216 = vmatpush3.msra.mxu0 %v5463_v23  ;;  %v5633_v23 = vld [vmem:[#allocation5 + $0xb88] sm:$0xff] }
0x2837   :  { %7217 = vmatprep.subr.mxu0 %v7522_v16 }
0x2838   :  { %7218 = vmatpush3.msra.mxu0 %v5462_v24  ;;  %v5632_v24 = vld [vmem:[#allocation5 + $0xb80] sm:$0xff] }
0x2839   :  { %7219 = vmatprep.subr.mxu0 %v7522_v16 }
0x283a   :  { %7220 = vmatpush3.msra.mxu0 %v5461_v25  ;;  %v5871_v25 = vld [vmem:[#allocation7 + $0x1d] ss:$0 sm:$0xff] }
0x283b   :  { %7221 = vmatprep.subr.mxu0 %v7522_v16 }
0x283c   :  { %7222 = vmatpush3.msra.mxu0 %v5460_v26 }
0x283d   :  { %7223 = vmatprep.subr.mxu0 %v7522_v16 }
0x283e   :  { %7224 = vmatpush3.msra.mxu0 %v5459_v55 }
0x283f   :  { %7225 = vmatprep.subr.mxu0 %v7522_v16 }
0x2840   :  { %7226 = vmatpush3.msra.mxu0 %v5458_v27 }
0x2841   :  { %7227 = vmatprep.subr.mxu0 %v7522_v16 }
0x2842   :  { %7228 = vmatpush3.msra.mxu0 %v5457_v28 }
0x2843   :  { %7229 = vmatprep.subr.mxu0 %v7522_v16 }
0x2844   :  { %7230 = vmatpush3.msra.mxu0 %v5456_v30  ;;  %v5872_v30 = vld [vmem:[#allocation7 + $0x1e] ss:$0 sm:$0xff] }
0x2845   :  { %7231 = vmatprep.subr.mxu0 %v7522_v16 }
0x2846   :  { %7232 = vmatpush3.msra.mxu0 %v5455_v31 }
0x2847   :  { %7233 = vmatprep.subr.mxu0 %v7522_v16 }
0x2848   :  { %7234 = vmatpush3.msra.mxu0 %v5454_v32 }
0x2849   :  { %7235 = vmatprep.subr.mxu0 %v7522_v16 }
0x284a   :  { %7236 = vmatpush3.msra.mxu0 %v5453_v33 }
0x284b   :  { %7237 = vmatprep.subr.mxu0 %v7522_v16 }
0x284c   :  { %7238 = vmatpush3.msra.mxu0 %v5452_v34 }
0x284d   :  { %7239 = vmatprep.subr.mxu0 %v7522_v16 }
0x284e   :  { %7240 = vmatpush3.msra.mxu0 %v5451_v35 }
0x284f   :  { %7241 = vmatprep.subr.mxu0 %v7522_v16 }
0x2850   :  { %7242 = vmatpush3.msra.mxu0 %v5450_v36 }
0x2851   :  { %7243 = vmatprep.subr.mxu0 %v7522_v16 }
0x28d5   :  { %v5156_v38 = vpop.f32.mrf.mxu0 }
0x28d6   :  { %v5157_v39 = vadd.f32 %v5867_v37, %v5156_v38  ;;  %v5868_v38 = vld [vmem:[#allocation7 + $0x1a] ss:$0 sm:$0xff] }
0x28d7   :  { %v7109_v40 = vpop.f32.mrf.mxu0 }
0x28d8   :  { %v5165_v41 = vsel %vm5162_vm9, %v5157_v39, -1e+30 }
0x28d9   :  { %v5167_v42 = vsel %vm5166_vm10, %v5165_v41, -inf }
0x28da   :  { %5168 = vmax.xlane.f32.xlu0 %v5167_v42 }
0x28f5   :  { %v8052_v43 = vpop.f32.mrf.mxu0 }
0x28f7   :  { %v7179_v44 = vpop.f32.mrf.mxu0 }
0x28f8   :  { %v5449_v44 = vld [vmem:[#allocation5 + $0xa88] sm:$0xff] }
0x28f9   :  { %7244 = vmatpush3.msra.mxu0 %v5449_v44 }
0x28fa   :  { %7245 = vmatprep.subr.mxu0 %v7522_v16 }
0x28fb   :  { %7246 = vmatpush3.msra.mxu0 %v5448_v51 }
0x28fc   :  { %7285 = vmatprep.subr.mxu0 %v7522_v16 }
0x2963   :  { %v5169_v49 = vpop.xlane.xlu0 %5168 }
0x2964   :  { %v5170_v52 = vsub.f32 %v5165_v41, %v5169_v49  ;;  %v5547_v49 = vld [vmem:[#allocation5 + $0xb38] sm:$0xff] }
0x2966   :  { %v5171_v21 = vmul.f32 1.442695, %v5170_v52  ;;  %v5546_v52 = vld [vmem:[#allocation5 + $0xb30] sm:$0xff] }
0x2968   :  { %7423 = vpow2.f32 %v5171_v21  ;;  %v5545_v21 = vld [vmem:[#allocation5 + $0xb28] sm:$0xff] }
0x2975   :  { %v7424_v54 = vpop.eup %7423 }
0x2976   :  { %v5173_v56 = vsel %vm5166_vm10, %v7424_v54, 0.0 }
0x2977   :  { %5174 = vadd.xlane.f32.xlu1 %v5173_v56  ;;  %v5543_v56 = vld [vmem:[#allocation5 + $0xb18] sm:$0xff] }
0x2a00   :  { %v5175_v1 = vpop.xlane.xlu1 %5174 }
0x2a01   :  { %7425 = vrcp.f32 %v5175_v1  ;;  %v5646_v1 = vld [vmem:[#allocation5 + $0xbf0] sm:$0xff] }
0x2a0e   :  { %v7426_v2 = vpop.eup %7425 }
0x2a0f   :  { %v8071_v3 = vmul.f32 %v7426_v2, %v7424_v54  ;;  %v5544_v54 = vld [vmem:[#allocation5 + $0xb20] sm:$0xff]  ;;  %v5645_v2 = vld [vmem:[#allocation5 + $0xbe8] sm:$0xff] }
0x2a11   :  { %7143 = vmatmul.mubr.f32.vlgmr.msra.gmra.mxu1 %v8071_v3 }
0x2a12   :  { %7181 = vmatpush3.msra.mxu1 %v5372_v15  ;;  %7212 = vmatprep.mubr.msk.f32.mxu1 %vm7523_vm3, %v7522_v16  ;;  %v5644_v15 = vld [vmem:[#allocation5 + $0xbe0] sm:$0xff] }
0x2a13   :  { %7182 = vmatprep.subr.mxu1 %v7522_v16 }
0x2a14   :  { %7183 = vmatpush3.msra.mxu1 %v5371_v4  ;;  %v5643_v4 = vld [vmem:[#allocation5 + $0xbd8] sm:$0xff] }
0x2a15   :  { %7184 = vmatprep.subr.mxu1 %v7522_v16 }
0x2a16   :  { %7185 = vmatpush3.msra.mxu1 %v5370_v14  ;;  %v5642_v14 = vld [vmem:[#allocation5 + $0xbd0] sm:$0xff] }
0x2a17   :  { %7186 = vmatprep.subr.mxu1 %v7522_v16 }
0x2a18   :  { %7187 = vmatpush3.msra.mxu1 %v5369_v5  ;;  %v5641_v5 = vld [vmem:[#allocation5 + $0xbc8] sm:$0xff] }
0x2a19   :  { %7188 = vmatprep.subr.mxu1 %v7522_v16 }
0x2a1a   :  { %7189 = vmatpush3.msra.mxu1 %v5368_v6  ;;  %v5640_v6 = vld [vmem:[#allocation5 + $0xbc0] sm:$0xff] }
0x2a1b   :  { %7190 = vmatprep.subr.mxu1 %v7522_v16 }
0x2a1c   :  { %7191 = vmatpush3.msra.mxu1 %v5367_v7  ;;  %v5639_v7 = vld [vmem:[#allocation5 + $0xbb8] sm:$0xff] }
0x2a1d   :  { %7192 = vmatprep.subr.mxu1 %v7522_v16 }
0x2a1e   :  { %7193 = vmatpush3.msra.mxu1 %v5366_v9  ;;  %v5638_v9 = vld [vmem:[#allocation5 + $0xbb0] sm:$0xff] }
0x2a1f   :  { %7194 = vmatprep.subr.mxu1 %v7522_v16 }
0x2a20   :  { %7195 = vmatpush3.msra.mxu1 %v5365_v10  ;;  %v5637_v10 = vld [vmem:[#allocation5 + $0xba8] sm:$0xff] }
0x2a21   :  { %7196 = vmatprep.subr.mxu1 %v7522_v16 }
0x2a22   :  { %7197 = vmatpush3.msra.mxu1 %v5364_v11  ;;  %v5636_v11 = vld [vmem:[#allocation5 + $0xba0] sm:$0xff] }
0x2a23   :  { %7198 = vmatprep.subr.mxu1 %v7522_v16 }
0x2a24   :  { %7199 = vmatpush3.msra.mxu1 %v5363_v12  ;;  %v5635_v12 = vld [vmem:[#allocation5 + $0xb98] sm:$0xff] }
0x2a25   :  { %7200 = vmatprep.subr.mxu1 %v7522_v16 }
0x2a26   :  { %7201 = vmatpush3.msra.mxu1 %v5362_v13  ;;  %v5870_v13 = vld [vmem:[#allocation7 + $0x1c] ss:$0 sm:$0xff] }
0x2a27   :  { %7202 = vmatprep.subr.mxu1 %v7522_v16 }
0x2a28   :  { %7203 = vmatpush3.msra.mxu1 %v5361_v17 }
0x2a29   :  { %7204 = vmatprep.subr.mxu1 %v7522_v16 }
0x2a2a   :  { %7205 = vmatpush3.msra.mxu1 %v5360_v18 }
0x2a2b   :  { %7206 = vmatprep.subr.mxu1 %v7522_v16 }
0x2a2c   :  { %7207 = vmatpush3.msra.mxu1 %v5359_v20 }
0x2a2d   :  { %7208 = vmatprep.subr.mxu1 %v7522_v16 }
0x2a2e   :  { %7209 = vmatpush3.msra.mxu1 %v5358_v22 }
0x2a2f   :  { %7210 = vmatprep.subr.mxu1 %v7522_v16 }
0x2a30   :  { %7211 = vmatpush3.msra.mxu1 %v5357_v53  ;;  %v5634_v53 = vld [vmem:[#allocation5 + $0xb90] sm:$0xff] }
0x2a31   :  { %7250 = vmatprep.subr.mxu1 %v7522_v16 }
0x2ad1   :  { %v5276_v37 = vpop.f32.mrf.mxu1 }
0x2ad2   :  { %v5347_v39 = vadd.f32 %v8052_v43, %v5276_v37  ;;  %v5553_v43 = vld [vmem:[#allocation5 + $0xb68] sm:$0xff] }
0x2ad3   :  { %v7144_v40 = vpop.f32.mrf.mxu1 }
0x2ad4   :  { %v5355_v41 = vadd.f32 %v5868_v38, %v5347_v39 }
0x2ad6   :  { %v5356_v42 = vmax.f32 %v5355_v41, 0.0 }
0x2ad8   :  { %7213 = vmatmul.mubr.f32.vlgmr.msra.gmra.mxu1 %v5356_v42 }
0x2ad9   :  { %7282 = vmatprep.mubr.msk.f32.mxu1 %vm7523_vm3, %v7522_v16  ;;  %7251 = vmatpush3.msra.mxu1 %v5555_v50 }
0x2ada   :  { %7252 = vmatprep.subr.mxu1 %v7522_v16 }
0x2adb   :  { %7253 = vmatpush3.msra.mxu1 %v5554_v45 }
0x2adc   :  { %7254 = vmatprep.subr.mxu1 %v7522_v16 }
0x2add   :  { %7255 = vmatpush3.msra.mxu1 %v5553_v43 }
0x2ade   :  { %7256 = vmatprep.subr.mxu1 %v7522_v16 }
0x2adf   :  { %7257 = vmatpush3.msra.mxu1 %v5552_v46 }
0x2ae0   :  { %7258 = vmatprep.subr.mxu1 %v7522_v16 }
0x2ae1   :  { %7259 = vmatpush3.msra.mxu1 %v5551_v29 }
0x2ae2   :  { %7260 = vmatprep.subr.mxu1 %v7522_v16 }
0x2ae3   :  { %7261 = vmatpush3.msra.mxu1 %v5550_v47 }
0x2ae4   :  { %7262 = vmatprep.subr.mxu1 %v7522_v16 }
0x2ae5   :  { %7263 = vmatpush3.msra.mxu1 %v5549_v48 }
0x2ae6   :  { %7264 = vmatprep.subr.mxu1 %v7522_v16 }
0x2ae7   :  { %7265 = vmatpush3.msra.mxu1 %v5548_v19 }
0x2ae8   :  { %7266 = vmatprep.subr.mxu1 %v7522_v16 }
0x2ae9   :  { %7267 = vmatpush3.msra.mxu1 %v5547_v49 }
0x2aea   :  { %7268 = vmatprep.subr.mxu1 %v7522_v16 }
0x2aeb   :  { %7269 = vmatpush3.msra.mxu1 %v5546_v52 }
0x2aec   :  { %7270 = vmatprep.subr.mxu1 %v7522_v16 }
0x2aed   :  { %7271 = vmatpush3.msra.mxu1 %v5545_v21 }
0x2aee   :  { %7272 = vmatprep.subr.mxu1 %v7522_v16 }
0x2aef   :  { %7273 = vmatpush3.msra.mxu1 %v5544_v54 }
0x2af0   :  { %7274 = vmatprep.subr.mxu1 %v7522_v16 }
0x2af1   :  { %7275 = vmatpush3.msra.mxu1 %v5543_v56 }
0x2af2   :  { %7276 = vmatprep.subr.mxu1 %v7522_v16 }
0x2af3   :  { %7277 = vmatpush3.msra.mxu1 %v5542_v61 }
0x2af4   :  { %7278 = vmatprep.subr.mxu1 %v7522_v16 }
0x2af5   :  { %7279 = vmatpush3.msra.mxu1 %v5541_v62 }
0x2af6   :  { %7280 = vmatprep.subr.mxu1 %v7522_v16 }
0x2af7   :  { %7281 = vmatpush3.msra.mxu1 %v5540_v63 }
0x2b98   :  { %v5444_v58 = vpop.f32.mrf.mxu1 }
0x2b99   :  { %v5445_v59 = vadd.f32 %v5869_v57, %v5444_v58 }
0x2b9a   :  { %v7214_v60 = vpop.f32.mrf.mxu1 }
0x2b9b   :  { %7248 = vmatmul.mubr.f32.vlgmr.msra.gmra.mxu0 %v5445_v59 }
0x2b9c   :  { %7317 = vmatprep.mubr.msk.f32.mxu0 %vm7523_vm3, %v7522_v16  ;;  %7286 = vmatpush3.msra.mxu0 %v5647_v0 }
0x2b9d   :  { %7287 = vmatprep.subr.mxu0 %v7522_v16 }
0x2b9e   :  { %7288 = vmatpush3.msra.mxu0 %v5646_v1 }
0x2b9f   :  { %7289 = vmatprep.subr.mxu0 %v7522_v16 }
0x2ba0   :  { %7290 = vmatpush3.msra.mxu0 %v5645_v2 }
0x2ba1   :  { %7291 = vmatprep.subr.mxu0 %v7522_v16 }
0x2ba2   :  { %7292 = vmatpush3.msra.mxu0 %v5644_v15 }
0x2ba3   :  { %7293 = vmatprep.subr.mxu0 %v7522_v16 }
0x2ba4   :  { %7294 = vmatpush3.msra.mxu0 %v5643_v4 }
0x2ba5   :  { %7295 = vmatprep.subr.mxu0 %v7522_v16 }
0x2ba6   :  { %7296 = vmatpush3.msra.mxu0 %v5642_v14 }
0x2ba7   :  { %7297 = vmatprep.subr.mxu0 %v7522_v16 }
0x2ba8   :  { %7298 = vmatpush3.msra.mxu0 %v5641_v5 }
0x2ba9   :  { %7299 = vmatprep.subr.mxu0 %v7522_v16 }
0x2baa   :  { %7300 = vmatpush3.msra.mxu0 %v5640_v6 }
0x2bab   :  { %7301 = vmatprep.subr.mxu0 %v7522_v16 }
0x2bac   :  { %7302 = vmatpush3.msra.mxu0 %v5639_v7 }
0x2bad   :  { %7303 = vmatprep.subr.mxu0 %v7522_v16 }
0x2bae   :  { %7304 = vmatpush3.msra.mxu0 %v5638_v9 }
0x2baf   :  { %7305 = vmatprep.subr.mxu0 %v7522_v16 }
0x2bb0   :  { %7306 = vmatpush3.msra.mxu0 %v5637_v10 }
0x2bb1   :  { %7307 = vmatprep.subr.mxu0 %v7522_v16 }
0x2bb2   :  { %7308 = vmatpush3.msra.mxu0 %v5636_v11 }
0x2bb3   :  { %7309 = vmatprep.subr.mxu0 %v7522_v16 }
0x2bb4   :  { %7310 = vmatpush3.msra.mxu0 %v5635_v12 }
0x2bb5   :  { %7311 = vmatprep.subr.mxu0 %v7522_v16 }
0x2bb6   :  { %7312 = vmatpush3.msra.mxu0 %v5634_v53 }
0x2bb7   :  { %7313 = vmatprep.subr.mxu0 %v7522_v16 }
0x2bb8   :  { %7314 = vmatpush3.msra.mxu0 %v5633_v23 }
0x2bb9   :  { %7315 = vmatprep.subr.mxu0 %v7522_v16 }
0x2bba   :  { %7316 = vmatpush3.msra.mxu0 %v5632_v24 }
0x2c5b   :  { %v5535_v17 = vpop.f32.mrf.mxu0 }
0x2c5c   :  { %v5536_v18 = vadd.f32 %v5870_v13, %v5535_v17 }
0x2c5d   :  { %v7249_v20 = vpop.f32.mrf.mxu0 }
0x2c5e   :  { %v5539_v22 = vmax.f32 %v5536_v18, 0.0 }
0x2c60   :  { %7283 = vmatmul.mubr.f32.vlgmr.msra.gmra.mxu1 %v5539_v22 }
0x2d20   :  { %v5627_v26 = vpop.f32.mrf.mxu1 }
0x2d21   :  { %v5628_v55 = vadd.f32 %v5871_v25, %v5627_v26 }
0x2d22   :  { %v7284_v27 = vpop.f32.mrf.mxu1 }
0x2d23   :  { %v5631_v28 = vmax.f32 %v5628_v55, 0.0 }
0x2d25   :  { %7318 = vmatmul.mubr.f32.vlgmr.msra.gmra.mxu0 %v5631_v28 }
0x2de5   :  { %v5719_v31 = vpop.f32.mrf.mxu0 }
0x2de6   :  { %v5720_v32 = vadd.f32 %v5872_v30, %v5719_v31 }
0x2de7   :  { %v7319_v33 = vpop.f32.mrf.mxu0 }
0x2de8   :  { %v5873_v34 = vclamps-f32 %v5720_v32, 10.0  ;;  %v5874_v42 = vclamps-f32 %v5720_v32, 100.0  ;;  %v5754_v43 = vsel %vm5751_vm15, %v5720_v32, 0.0 }
0x2dea   :  { %v5730_v35 = vsel %vm5726_vm11, %v5873_v34, -1e+30  ;;  %v5747_v50 = vsel %vm5742_vm14, %v5874_v42, 0.0 }
0x2deb   :  { %v5731_v36 = vsel %vm5166_vm10, %v5730_v35, -inf }
0x2dec   :  { %5732 = vmax.xlane.f32.xlu0 %v5731_v36 }
0x2e75   :  { %v5733_v37 = vpop.xlane.xlu0 %5732 }
0x2e76   :  { %v5734_v16 = vsub.f32 %v5730_v35, %v5733_v37 }
0x2e78   :  { %v5735_v38 = vmul.f32 1.442695, %v5734_v16 }
0x2e7a   :  { %7427 = vpow2.f32 %v5735_v38 }
0x2e87   :  { %v7428_v39 = vpop.eup %7427 }
0x2e88   :  { %v5737_v40 = vsel %vm5166_vm10, %v7428_v39, 0.0 }
0x2e89   :  { %5738 = vadd.xlane.f32.xlu1 %v5737_v40 }
0x2f12   :  { %v5739_v41 = vpop.xlane.xlu1 %5738 }
0x2f13   :  { %7429 = vrcp.f32 %v5739_v41 }
0x2f20   :  { %v7430_v44 = vpop.eup %7429 }
0x2f21   :  { %v5741_v51 = vmul.f32 %v7430_v44, %v7428_v39 }
0x2f23   :  { %v5748_v45 = vadd.f32 %v5747_v50, %v5741_v51 }
0x2f25   :  { %v5755_v46 = vadd.f32 %v5754_v43, %v5748_v45 }
0x2f27   :  { %v5756_v29 = vadd.f32 %v5755_v46, %v8071_v3 }
0x2f29   :  { %5757 = vst [vmem:[#allocation8] sm:$0x3] %v5756_v29 }
0x2f2a   :  { %7502 = shalt.err (!%p7499_p5)
}
0x2f2b   :  { %5767 = dma.vmem_to_hbm [thread:$0]  %s5765_s11, 32, %s8156_s3, [#allocation4]  }
0x2f2c   :  { %7515 = dma.done.wait [#allocation4], 32  }
0x2f2d   :  { %7516 = vsyncadd [#allocation4], 4294967264 }
0x2f2e   :  { %5771 = vsyncpa [#allocation3], 1 }
0x2f2f   :  { %5772 = vsyncpa [#allocation6], 1 }
0x2f30   :  { %5773 = vsyncpa [#allocation4], 1 }

</bundles_post_ra>
